<compile_context>
chip_gen: v7x
topology: tpu7x:2x2x1
jax: 0.10.0
libtpu: 0.0.40
codegen_flags: <defaults>
</compile_context>

<pallas_src>
import functools

import jax
import jax.numpy as jnp
from jax import lax
from jax.experimental import pallas as pl
from jax.experimental.pallas import tpu as pltpu


def _bottleneck_kernel(x_ref, mask_ref, w1_ref, b1_ref, w2_ref, b2_ref,
                       w3_ref, b3_ref, o_ref, pad_ref, *, H, WS, TH, WID):
    """One batch image per grid step.

    x_ref   : (H*WS, CIN)     bf16 input, W zero-padded to WS, rows flattened
    mask_ref: (TH*WS, 1)      f32  1.0 for columns < W, 0.0 for pad columns
    w1_ref  : (CIN, WID)      bf16 conv1 (1x1) weight, bn1 folded
    b1_ref  : (1, WID)        f32
    w2_ref  : (9, WID, WID)   bf16 conv2 (3x3) taps, bn2 folded, (ci, co)
    b2_ref  : (1, WID)        f32
    w3_ref  : (WID, COUT)     bf16 conv3 (1x1) weight, bn3 folded
    b3_ref  : (1, COUT)       f32
    o_ref   : (H*WS, COUT)    bf16 output in the same padded-row layout
    pad_ref : ((H+4)*WS, WID) bf16 scratch: image row h lives in row block
              h+2 (columns [0, W) data, rest zero); blocks 0,1,H+2,H+3 zero.
    """
    CHUNK = TH * WS                 # flat rows per chunk (multiple of 16)
    NC = H // TH                    # number of row chunks (static)

    # Zero only the 4 halo row-blocks.  Done every grid step (tiny) rather
    # than under program_id==0, so it stays correct when the batch axis is
    # megacore-partitioned and each core gets its own scratch.
    zeros_halo = jnp.zeros((2 * WS, WID), jnp.bfloat16)
    pad_ref[0:2 * WS, :] = zeros_halo
    pad_ref[(H + 2) * WS:(H + 4) * WS, :] = zeros_halo

    b1 = b1_ref[...]
    b2 = b2_ref[...]
    b3 = b3_ref[...]
    # Hoisted lane-wide pad-column mask (broadcast once, reused every chunk).
    mask_b = jnp.broadcast_to(mask_ref[...], (CHUNK, WID))

    def conv1_chunk(c):
        # conv1x1 + bn1 + relu, written straight into the pad scratch.
        src = c * CHUNK                              # static, 16-aligned
        xs = x_ref[src:src + CHUNK, :]               # already bf16, no cast
        y1 = jnp.dot(xs, w1_ref[...], preferred_element_type=jnp.float32)
        y1 = jnp.maximum(y1 + b1, 0.0) * mask_b      # zero the pad columns
        dst = (c * TH + 2) * WS                      # static, 16-aligned
        pad_ref[dst:dst + CHUNK, :] = y1.astype(jnp.bfloat16)

    def conv23_chunk(c):
        # conv3x3 (9 contiguous-window taps) + bn2 + relu, conv1x1 + bn3,
        # residual add (f32), final relu.
        acc = jnp.zeros((CHUNK, WID), jnp.float32)
        for dy in range(3):
            for dx in range(3):
                off = (c * TH + dy + 1) * WS + dx - 1    # static offset
                tap = pad_ref[off:off + CHUNK, :]         # contiguous rows
                acc = acc + jnp.dot(tap, w2_ref[dy * 3 + dx],
                                    preferred_element_type=jnp.float32)
        y2 = jnp.maximum(acc + b2, 0.0).astype(jnp.bfloat16)
        y3 = jnp.dot(y2, w3_ref[...], preferred_element_type=jnp.float32) + b3
        src = c * CHUNK
        res = x_ref[src:src + CHUNK, :].astype(jnp.float32)  # f32 skip path
        out = jnp.maximum(y3 + res, 0.0)
        o_ref[src:src + CHUNK, :] = out.astype(o_ref.dtype)

    # Software-pipelined chunk loop: issue conv1 for chunk c+1 together with
    # conv2/3 for chunk c, so the LLO scheduler can hide the bf16 stores of
    # conv1 behind the tap matmuls.  conv2/3(c) only needs the first image
    # row of chunk c+1, which conv1(c+1) has just produced.
    conv1_chunk(0)
    for c in range(NC):
        if c + 1 < NC:
            conv1_chunk(c + 1)
        conv23_chunk(c)


def bottleneck_pallas(x_flat, colmask, w1, b1, w2, b2, w3, b3, *, H, W, WS, TH):
    """x_flat: (N, H*WS, CIN) bf16, padded-row layout.  Weights BN-folded."""
    N, HWS, CIN = x_flat.shape
    WID = w1.shape[1]
    COUT = w3.shape[1]
    assert HWS == H * WS and WS % 16 == 0 and H % TH == 0
    assert COUT == CIN, "identity residual requires inplanes == planes * 4"

    kernel = functools.partial(_bottleneck_kernel,
                               H=H, WS=WS, TH=TH, WID=WID)

    # Explicit VMEM budget: double-buffered bf16 in/out blocks + weights
    # (conservatively counted twice) + pad scratch + headroom.  No big floor.
    blk_bytes = H * WS * (CIN + COUT) * 2
    wgt_bytes = (CIN * WID + 9 * WID * WID + WID * COUT) * 2 \
        + (2 * WID + COUT + TH * WS) * 4
    scratch_bytes = (H + 4) * WS * WID * 2
    vmem_limit = int(min(max(2 * blk_bytes + 2 * wgt_bytes + scratch_bytes
                             + (4 << 20), 12 << 20), 100 << 20))

    flops = 2 * N * H * W * (CIN * WID + 9 * WID * WID + WID * COUT)
    bytes_accessed = (N * H * WS * (CIN + COUT) * 2
                      + (CIN * WID + 9 * WID * WID + WID * COUT) * 2
                      + (2 * WID + COUT + TH * WS) * 4)
    cost = pl.CostEstimate(flops=flops, transcendentals=0,
                           bytes_accessed=bytes_accessed)

    return pl.pallas_call(
        kernel,
        out_shape=jax.ShapeDtypeStruct((N, H * WS, COUT), jnp.bfloat16),
        grid_spec=pltpu.PrefetchScalarGridSpec(
            num_scalar_prefetch=0,
            grid=(N,),
            in_specs=[
                pl.BlockSpec((None, H * WS, CIN), lambda n: (n, 0, 0)),
                pl.BlockSpec((TH * WS, 1), lambda n: (0, 0)),
                pl.BlockSpec((CIN, WID), lambda n: (0, 0)),
                pl.BlockSpec((1, WID), lambda n: (0, 0)),
                pl.BlockSpec((9, WID, WID), lambda n: (0, 0, 0)),
                pl.BlockSpec((1, WID), lambda n: (0, 0)),
                pl.BlockSpec((WID, COUT), lambda n: (0, 0)),
                pl.BlockSpec((1, COUT), lambda n: (0, 0)),
            ],
            out_specs=pl.BlockSpec((None, H * WS, COUT), lambda n: (n, 0, 0)),
            scratch_shapes=[pltpu.VMEM(((H + 4) * WS, WID), jnp.bfloat16)],
        ),
        compiler_params=pltpu.CompilerParams(
            dimension_semantics=("parallel",),
            vmem_limit_bytes=vmem_limit),
        cost_estimate=cost,
    )(x_flat, colmask, w1, b1, w2, b2, w3, b3)


def fold_bn(gamma, beta, mean, var, eps=1e-5):
    """Eval-mode BatchNorm -> per-output-channel (scale, bias)."""
    s = gamma / jnp.sqrt(var + eps)
    return s, beta - mean * s


def _round_up(v, m):
    return ((v + m - 1) // m) * m


def _pick_row_chunk(H, WS, WID, max_acc_bytes=128 * 1024):
    """Largest TH dividing H with TH*WS flat rows, keeping the phase-B f32
    accumulator (CHUNK x WID x 4 B) at or below ~32 vregs."""
    cap = max(WS, min(256, max_acc_bytes // (4 * max(WID, 1))))
    th = 1
    for d in range(1, H + 1):
        if H % d == 0 and d * WS <= cap:
            th = d
    return th


def bottleneck_forward(x_nchw, params):
    """Public wrapper matching the PyTorch module (NCHW f32 in / NCHW f32 out)."""
    (w1_oihw, bn1), (w2_oihw, bn2), (w3_oihw, bn3) = params
    N, CIN, H, W = x_nchw.shape
    WID = w1_oihw.shape[0]
    COUT = w3_oihw.shape[0]

    # Fold BN (eval mode) into conv weights / biases.
    s1, b1 = fold_bn(*bn1)
    s2, b2 = fold_bn(*bn2)
    s3, b3 = fold_bn(*bn3)

    w1_k = (w1_oihw[:, :, 0, 0] * s1[:, None]).T                     # (CIN, WID)
    w2_hwio = jnp.transpose(w2_oihw * s2[:, None, None, None], (2, 3, 1, 0))
    w2_k = w2_hwio.reshape(9, WID, WID)                              # (9, ci, co)
    w3_k = (w3_oihw[:, :, 0, 0] * s3[:, None]).T                     # (WID, COUT)

    # Padded row width: one shared zero column serves both left and right
    # 3x3 halos, so W+1 suffices; round to 16 for bf16 sublane alignment.
    WS = _round_up(W + 1, 16)
    TH = _pick_row_chunk(H, WS, WID)

    # NCHW -> NHWC, cast to bf16, zero-pad W -> WS, flatten (H, WS) -> H*WS.
    x_nhwc = jnp.transpose(x_nchw, (0, 2, 3, 1)).astype(jnp.bfloat16)
    x_pad = jnp.pad(x_nhwc, ((0, 0), (0, 0), (0, WS - W), (0, 0)))
    x_flat = x_pad.reshape(N, H * WS, CIN)

    colmask = (jnp.arange(WS) < W).astype(jnp.float32)
    colmask = jnp.tile(colmask, TH)[:, None]                         # (TH*WS, 1)

    out_flat = bottleneck_pallas(
        x_flat, colmask,
        w1_k.astype(jnp.bfloat16), b1[None, :].astype(jnp.float32),
        w2_k.astype(jnp.bfloat16), b2[None, :].astype(jnp.float32),
        w3_k.astype(jnp.bfloat16), b3[None, :].astype(jnp.float32),
        H=H, W=W, WS=WS, TH=TH)

    out = out_flat.reshape(N, H, WS, COUT)[:, :, :W, :]
    return jnp.transpose(out, (0, 3, 1, 2)).astype(jnp.float32)


def bottleneck_reference(x_nchw, params):
    """Plain-JAX NCHW reference mirroring the PyTorch forward (eval BN)."""
    (w1, bn1), (w2, bn2), (w3, bn3) = params
    dn = ("NCHW", "OIHW", "NCHW")
    hi = lax.Precision.HIGHEST

    def bn(y, p):
        gamma, beta, mean, var = p
        inv = gamma / jnp.sqrt(var + 1e-5)
        return (y - mean[None, :, None, None]) * inv[None, :, None, None] \
            + beta[None, :, None, None]

    out = lax.conv_general_dilated(x_nchw, w1, (1, 1), [(0, 0), (0, 0)],
                                   dimension_numbers=dn, precision=hi)
    out = jax.nn.relu(bn(out, bn1))
    out = lax.conv_general_dilated(out, w2, (1, 1), [(1, 1), (1, 1)],
                                   dimension_numbers=dn, precision=hi)
    out = jax.nn.relu(bn(out, bn2))
    out = lax.conv_general_dilated(out, w3, (1, 1), [(0, 0), (0, 0)],
                                   dimension_numbers=dn, precision=hi)
    out = bn(out, bn3)
    return jax.nn.relu(out + x_nchw)


def make_params(key, inplanes, planes):
    width = planes          # base_width=64, groups=1
    cout = planes * 4       # expansion = 4
    ks = jax.random.split(key, 6)

    def bn_params(k, c):
        k1, k2, k3, k4 = jax.random.split(k, 4)
        gamma = 1.0 + 0.1 * jax.random.normal(k1, (c,), jnp.float32)
        beta = 0.1 * jax.random.normal(k2, (c,), jnp.float32)
        mean = 0.1 * jax.random.normal(k3, (c,), jnp.float32)
        var = jnp.abs(1.0 + 0.1 * jax.random.normal(k4, (c,), jnp.float32))
        return gamma, beta, mean, var

    w1 = 0.1 * jax.random.normal(ks[0], (width, inplanes, 1, 1), jnp.float32)
    w2 = 0.1 * jax.random.normal(ks[1], (width, width, 3, 3), jnp.float32)
    w3 = 0.1 * jax.random.normal(ks[2], (cout, width, 1, 1), jnp.float32)
    return ((w1, bn_params(ks[3], width)),
            (w2, bn_params(ks[4], width)),
            (w3, bn_params(ks[5], cout)))


if __name__ == "__main__":
    key = jax.random.PRNGKey(0)
    kx, kp = jax.random.split(key)

    N, INPLANES, PLANES, HH, WW = 2, 16, 4, 16, 16   # inplanes == planes*4
    x = jax.random.normal(kx, (N, INPLANES, HH, WW), jnp.float32)  # NCHW
    params = make_params(kp, INPLANES, PLANES)

    out = jax.block_until_ready(bottleneck_forward(x, params))
    ref = jax.block_until_ready(bottleneck_reference(x, params))

    assert out.shape == (N, INPLANES, HH, WW)
    err = jnp.max(jnp.abs(out - ref))
    # bf16 input / weights / output with f32 accumulation & f32 skip add ->
    # looser tolerance than a pure-f32 reference.
    assert jnp.allclose(out, ref, rtol=3e-2, atol=3e-2), f"max abs err {err}"
    print("KERNEL_OK")
</pallas_src>

<mosaic_0001>
module attributes {stable_mosaic.version = 11 : i64} {
  func.func @_bottleneck_kernel(%arg0: i32, %arg1: memref<1x512x16xbf16, #tpu.memory_space<vmem>>, %arg2: memref<256x1xf32, #tpu.memory_space<vmem>>, %arg3: memref<16x4xbf16, #tpu.memory_space<vmem>>, %arg4: memref<1x4xf32, #tpu.memory_space<vmem>>, %arg5: memref<9x4x4xbf16, #tpu.memory_space<vmem>>, %arg6: memref<1x4xf32, #tpu.memory_space<vmem>>, %arg7: memref<4x16xbf16, #tpu.memory_space<vmem>>, %arg8: memref<1x16xf32, #tpu.memory_space<vmem>>, %arg9: memref<1x512x16xbf16, #tpu.memory_space<vmem>>, %arg10: memref<640x4xbf16, #tpu.memory_space<vmem>>) attributes {dimension_semantics = [#tpu.dimension_semantics<parallel>], iteration_bounds = array<i64: 2>, scalar_prefetch = 0 : i64, scratch_operands = 1 : i64, tpu.core_type = #tpu.core_type<tc>, window_params = [{transform_indices = @transform_0, window_bounds = array<i64: 1, 512, 16>}, {pipeline_mode = #tpu.pipeline_mode<synchronous>, transform_indices = @transform_1, window_bounds = array<i64: 256, 1>}, {pipeline_mode = #tpu.pipeline_mode<synchronous>, transform_indices = @transform_2, window_bounds = array<i64: 16, 4>}, {pipeline_mode = #tpu.pipeline_mode<synchronous>, transform_indices = @transform_3, window_bounds = array<i64: 1, 4>}, {pipeline_mode = #tpu.pipeline_mode<synchronous>, transform_indices = @transform_4, window_bounds = array<i64: 9, 4, 4>}, {pipeline_mode = #tpu.pipeline_mode<synchronous>, transform_indices = @transform_5, window_bounds = array<i64: 1, 4>}, {pipeline_mode = #tpu.pipeline_mode<synchronous>, transform_indices = @transform_6, window_bounds = array<i64: 4, 16>}, {pipeline_mode = #tpu.pipeline_mode<synchronous>, transform_indices = @transform_7, window_bounds = array<i64: 1, 16>}, {transform_indices = @transform_8, window_bounds = array<i64: 1, 512, 16>}]} {
    %cst = arith.constant 0.000000e+00 : bf16
    %0 = vector.broadcast %cst : bf16 to vector<64x4xbf16>
    %c0 = arith.constant 0 : index
    %c0_0 = arith.constant 0 : index
    %1 = vector.load %arg10[%c0, %c0_0] : memref<640x4xbf16, #tpu.memory_space<vmem>>, vector<64x4xbf16>
    tpu.vector_store %arg10[%c0, %c0_0], %0 {strides = array<i32>} : memref<640x4xbf16, #tpu.memory_space<vmem>>, vector<64x4xbf16>,
    %c576 = arith.constant 576 : index
    %c0_1 = arith.constant 0 : index
    %2 = vector.load %arg10[%c576, %c0_1] : memref<640x4xbf16, #tpu.memory_space<vmem>>, vector<64x4xbf16>
    tpu.vector_store %arg10[%c576, %c0_1], %0 {strides = array<i32>} : memref<640x4xbf16, #tpu.memory_space<vmem>>, vector<64x4xbf16>,
    %c0_2 = arith.constant 0 : index
    %c0_3 = arith.constant 0 : index
    %3 = vector.load %arg4[%c0_2, %c0_3] : memref<1x4xf32, #tpu.memory_space<vmem>>, vector<1x4xf32>
    %c0_4 = arith.constant 0 : index
    %c0_5 = arith.constant 0 : index
    %4 = vector.load %arg6[%c0_4, %c0_5] : memref<1x4xf32, #tpu.memory_space<vmem>>, vector<1x4xf32>
    %c0_6 = arith.constant 0 : index
    %c0_7 = arith.constant 0 : index
    %5 = vector.load %arg8[%c0_6, %c0_7] : memref<1x16xf32, #tpu.memory_space<vmem>>, vector<1x16xf32>
    %c0_8 = arith.constant 0 : index
    %c0_9 = arith.constant 0 : index
    %6 = vector.load %arg2[%c0_8, %c0_9] : memref<256x1xf32, #tpu.memory_space<vmem>>, vector<256x1xf32>
    %7 = vector.shape_cast %6 : vector<256x1xf32> to vector<256x1xf32>
    %8 = vector.broadcast %7 : vector<256x1xf32> to vector<256x4xf32>
    %c0_10 = arith.constant 0 : index
    %c0_11 = arith.constant 0 : index
    %c0_12 = arith.constant 0 : index
    %9 = vector.load %arg1[%c0_10, %c0_11, %c0_12] : memref<1x512x16xbf16, #tpu.memory_space<vmem>>, vector<1x256x16xbf16>
    %10 = vector.shape_cast %9 : vector<1x256x16xbf16> to vector<256x16xbf16>
    %c0_13 = arith.constant 0 : index
    %c0_14 = arith.constant 0 : index
    %11 = vector.load %arg3[%c0_13, %c0_14] : memref<16x4xbf16, #tpu.memory_space<vmem>>, vector<16x4xbf16>
    %cst_15 = arith.constant dense<0.000000e+00> : vector<256x4xf32>
    %12 = tpu.matmul %10, %11, %cst_15 {dimension_numbers = #tpu.dot_dimension_numbers<[1], [0], [0], [1], [0, 0, 1, 1], [], []>} : vector<256x16xbf16>, vector<16x4xbf16>, vector<256x4xf32> -> vector<256x4xf32>
    %13 = vector.broadcast %3 : vector<1x4xf32> to vector<256x4xf32>
    %14 = arith.addf %12, %13 : vector<256x4xf32>
    %cst_16 = arith.constant 0.000000e+00 : f32
    %15 = vector.broadcast %cst_16 : f32 to vector<256x4xf32>
    %16 = arith.maximumf %14, %15 : vector<256x4xf32>
    %17 = arith.mulf %16, %8 : vector<256x4xf32>
    %18 = arith.truncf %17 : vector<256x4xf32> to vector<256x4xbf16>
    %c64 = arith.constant 64 : index
    %c0_17 = arith.constant 0 : index
    %19 = vector.load %arg10[%c64, %c0_17] : memref<640x4xbf16, #tpu.memory_space<vmem>>, vector<256x4xbf16>
    tpu.vector_store %arg10[%c64, %c0_17], %18 {strides = array<i32>} : memref<640x4xbf16, #tpu.memory_space<vmem>>, vector<256x4xbf16>,
    %c0_18 = arith.constant 0 : index
    %c256 = arith.constant 256 : index
    %c0_19 = arith.constant 0 : index
    %20 = vector.load %arg1[%c0_18, %c256, %c0_19] : memref<1x512x16xbf16, #tpu.memory_space<vmem>>, vector<1x256x16xbf16>
    %21 = vector.shape_cast %20 : vector<1x256x16xbf16> to vector<256x16xbf16>
    %c0_20 = arith.constant 0 : index
    %c0_21 = arith.constant 0 : index
    %22 = vector.load %arg3[%c0_20, %c0_21] : memref<16x4xbf16, #tpu.memory_space<vmem>>, vector<16x4xbf16>
    %cst_22 = arith.constant dense<0.000000e+00> : vector<256x4xf32>
    %23 = tpu.matmul %21, %22, %cst_22 {dimension_numbers = #tpu.dot_dimension_numbers<[1], [0], [0], [1], [0, 0, 1, 1], [], []>} : vector<256x16xbf16>, vector<16x4xbf16>, vector<256x4xf32> -> vector<256x4xf32>
    %24 = vector.broadcast %3 : vector<1x4xf32> to vector<256x4xf32>
    %25 = arith.addf %23, %24 : vector<256x4xf32>
    %cst_23 = arith.constant 0.000000e+00 : f32
    %26 = vector.broadcast %cst_23 : f32 to vector<256x4xf32>
    %27 = arith.maximumf %25, %26 : vector<256x4xf32>
    %28 = arith.mulf %27, %8 : vector<256x4xf32>
    %29 = arith.truncf %28 : vector<256x4xf32> to vector<256x4xbf16>
    %c320 = arith.constant 320 : index
    %c0_24 = arith.constant 0 : index
    %30 = vector.load %arg10[%c320, %c0_24] : memref<640x4xbf16, #tpu.memory_space<vmem>>, vector<256x4xbf16>
    tpu.vector_store %arg10[%c320, %c0_24], %29 {strides = array<i32>} : memref<640x4xbf16, #tpu.memory_space<vmem>>, vector<256x4xbf16>,
    %cst_25 = arith.constant 0.000000e+00 : f32
    %31 = vector.broadcast %cst_25 : f32 to vector<256x4xf32>
    %c31 = arith.constant 31 : index
    %c0_26 = arith.constant 0 : index
    %32 = vector.load %arg10[%c31, %c0_26] : memref<640x4xbf16, #tpu.memory_space<vmem>>, vector<256x4xbf16>
    %c0_27 = arith.constant 0 : index
    %c0_28 = arith.constant 0 : index
    %c0_29 = arith.constant 0 : index
    %33 = vector.load %arg5[%c0_27, %c0_28, %c0_29] : memref<9x4x4xbf16, #tpu.memory_space<vmem>>, vector<1x4x4xbf16>
    %34 = vector.shape_cast %33 : vector<1x4x4xbf16> to vector<4x4xbf16>
    %cst_30 = arith.constant dense<0.000000e+00> : vector<256x4xf32>
    %35 = tpu.matmul %32, %34, %cst_30 {dimension_numbers = #tpu.dot_dimension_numbers<[1], [0], [0], [1], [0, 0, 1, 1], [], []>} : vector<256x4xbf16>, vector<4x4xbf16>, vector<256x4xf32> -> vector<256x4xf32>
    %36 = arith.addf %31, %35 : vector<256x4xf32>
    %c32 = arith.constant 32 : index
    %c0_31 = arith.constant 0 : index
    %37 = vector.load %arg10[%c32, %c0_31] : memref<640x4xbf16, #tpu.memory_space<vmem>>, vector<256x4xbf16>
    %c1 = arith.constant 1 : index
    %c0_32 = arith.constant 0 : index
    %c0_33 = arith.constant 0 : index
    %38 = vector.load %arg5[%c1, %c0_32, %c0_33] : memref<9x4x4xbf16, #tpu.memory_space<vmem>>, vector<1x4x4xbf16>
    %39 = vector.shape_cast %38 : vector<1x4x4xbf16> to vector<4x4xbf16>
    %cst_34 = arith.constant dense<0.000000e+00> : vector<256x4xf32>
    %40 = tpu.matmul %37, %39, %cst_34 {dimension_numbers = #tpu.dot_dimension_numbers<[1], [0], [0], [1], [0, 0, 1, 1], [], []>} : vector<256x4xbf16>, vector<4x4xbf16>, vector<256x4xf32> -> vector<256x4xf32>
    %41 = arith.addf %36, %40 : vector<256x4xf32>
    %c33 = arith.constant 33 : index
    %c0_35 = arith.constant 0 : index
    %42 = vector.load %arg10[%c33, %c0_35] : memref<640x4xbf16, #tpu.memory_space<vmem>>, vector<256x4xbf16>
    %c2 = arith.constant 2 : index
    %c0_36 = arith.constant 0 : index
    %c0_37 = arith.constant 0 : index
    %43 = vector.load %arg5[%c2, %c0_36, %c0_37] : memref<9x4x4xbf16, #tpu.memory_space<vmem>>, vector<1x4x4xbf16>
    %44 = vector.shape_cast %43 : vector<1x4x4xbf16> to vector<4x4xbf16>
    %cst_38 = arith.constant dense<0.000000e+00> : vector<256x4xf32>
    %45 = tpu.matmul %42, %44, %cst_38 {dimension_numbers = #tpu.dot_dimension_numbers<[1], [0], [0], [1], [0, 0, 1, 1], [], []>} : vector<256x4xbf16>, vector<4x4xbf16>, vector<256x4xf32> -> vector<256x4xf32>
    %46 = arith.addf %41, %45 : vector<256x4xf32>
    %c63 = arith.constant 63 : index
    %c0_39 = arith.constant 0 : index
    %47 = vector.load %arg10[%c63, %c0_39] : memref<640x4xbf16, #tpu.memory_space<vmem>>, vector<256x4xbf16>
    %c3 = arith.constant 3 : index
    %c0_40 = arith.constant 0 : index
    %c0_41 = arith.constant 0 : index
    %48 = vector.load %arg5[%c3, %c0_40, %c0_41] : memref<9x4x4xbf16, #tpu.memory_space<vmem>>, vector<1x4x4xbf16>
    %49 = vector.shape_cast %48 : vector<1x4x4xbf16> to vector<4x4xbf16>
    %cst_42 = arith.constant dense<0.000000e+00> : vector<256x4xf32>
    %50 = tpu.matmul %47, %49, %cst_42 {dimension_numbers = #tpu.dot_dimension_numbers<[1], [0], [0], [1], [0, 0, 1, 1], [], []>} : vector<256x4xbf16>, vector<4x4xbf16>, vector<256x4xf32> -> vector<256x4xf32>
    %51 = arith.addf %46, %50 : vector<256x4xf32>
    %c64_43 = arith.constant 64 : index
    %c0_44 = arith.constant 0 : index
    %52 = vector.load %arg10[%c64_43, %c0_44] : memref<640x4xbf16, #tpu.memory_space<vmem>>, vector<256x4xbf16>
    %c4 = arith.constant 4 : index
    %c0_45 = arith.constant 0 : index
    %c0_46 = arith.constant 0 : index
    %53 = vector.load %arg5[%c4, %c0_45, %c0_46] : memref<9x4x4xbf16, #tpu.memory_space<vmem>>, vector<1x4x4xbf16>
    %54 = vector.shape_cast %53 : vector<1x4x4xbf16> to vector<4x4xbf16>
    %cst_47 = arith.constant dense<0.000000e+00> : vector<256x4xf32>
    %55 = tpu.matmul %52, %54, %cst_47 {dimension_numbers = #tpu.dot_dimension_numbers<[1], [0], [0], [1], [0, 0, 1, 1], [], []>} : vector<256x4xbf16>, vector<4x4xbf16>, vector<256x4xf32> -> vector<256x4xf32>
    %56 = arith.addf %51, %55 : vector<256x4xf32>
    %c65 = arith.constant 65 : index
    %c0_48 = arith.constant 0 : index
    %57 = vector.load %arg10[%c65, %c0_48] : memref<640x4xbf16, #tpu.memory_space<vmem>>, vector<256x4xbf16>
    %c5 = arith.constant 5 : index
    %c0_49 = arith.constant 0 : index
    %c0_50 = arith.constant 0 : index
    %58 = vector.load %arg5[%c5, %c0_49, %c0_50] : memref<9x4x4xbf16, #tpu.memory_space<vmem>>, vector<1x4x4xbf16>
    %59 = vector.shape_cast %58 : vector<1x4x4xbf16> to vector<4x4xbf16>
    %cst_51 = arith.constant dense<0.000000e+00> : vector<256x4xf32>
    %60 = tpu.matmul %57, %59, %cst_51 {dimension_numbers = #tpu.dot_dimension_numbers<[1], [0], [0], [1], [0, 0, 1, 1], [], []>} : vector<256x4xbf16>, vector<4x4xbf16>, vector<256x4xf32> -> vector<256x4xf32>
    %61 = arith.addf %56, %60 : vector<256x4xf32>
    %c95 = arith.constant 95 : index
    %c0_52 = arith.constant 0 : index
    %62 = vector.load %arg10[%c95, %c0_52] : memref<640x4xbf16, #tpu.memory_space<vmem>>, vector<256x4xbf16>
    %c6 = arith.constant 6 : index
    %c0_53 = arith.constant 0 : index
    %c0_54 = arith.constant 0 : index
    %63 = vector.load %arg5[%c6, %c0_53, %c0_54] : memref<9x4x4xbf16, #tpu.memory_space<vmem>>, vector<1x4x4xbf16>
    %64 = vector.shape_cast %63 : vector<1x4x4xbf16> to vector<4x4xbf16>
    %cst_55 = arith.constant dense<0.000000e+00> : vector<256x4xf32>
    %65 = tpu.matmul %62, %64, %cst_55 {dimension_numbers = #tpu.dot_dimension_numbers<[1], [0], [0], [1], [0, 0, 1, 1], [], []>} : vector<256x4xbf16>, vector<4x4xbf16>, vector<256x4xf32> -> vector<256x4xf32>
    %66 = arith.addf %61, %65 : vector<256x4xf32>
    %c96 = arith.constant 96 : index
    %c0_56 = arith.constant 0 : index
    %67 = vector.load %arg10[%c96, %c0_56] : memref<640x4xbf16, #tpu.memory_space<vmem>>, vector<256x4xbf16>
    %c7 = arith.constant 7 : index
    %c0_57 = arith.constant 0 : index
    %c0_58 = arith.constant 0 : index
    %68 = vector.load %arg5[%c7, %c0_57, %c0_58] : memref<9x4x4xbf16, #tpu.memory_space<vmem>>, vector<1x4x4xbf16>
    %69 = vector.shape_cast %68 : vector<1x4x4xbf16> to vector<4x4xbf16>
    %cst_59 = arith.constant dense<0.000000e+00> : vector<256x4xf32>
    %70 = tpu.matmul %67, %69, %cst_59 {dimension_numbers = #tpu.dot_dimension_numbers<[1], [0], [0], [1], [0, 0, 1, 1], [], []>} : vector<256x4xbf16>, vector<4x4xbf16>, vector<256x4xf32> -> vector<256x4xf32>
    %71 = arith.addf %66, %70 : vector<256x4xf32>
    %c97 = arith.constant 97 : index
    %c0_60 = arith.constant 0 : index
    %72 = vector.load %arg10[%c97, %c0_60] : memref<640x4xbf16, #tpu.memory_space<vmem>>, vector<256x4xbf16>
    %c8 = arith.constant 8 : index
    %c0_61 = arith.constant 0 : index
    %c0_62 = arith.constant 0 : index
    %73 = vector.load %arg5[%c8, %c0_61, %c0_62] : memref<9x4x4xbf16, #tpu.memory_space<vmem>>, vector<1x4x4xbf16>
    %74 = vector.shape_cast %73 : vector<1x4x4xbf16> to vector<4x4xbf16>
    %cst_63 = arith.constant dense<0.000000e+00> : vector<256x4xf32>
    %75 = tpu.matmul %72, %74, %cst_63 {dimension_numbers = #tpu.dot_dimension_numbers<[1], [0], [0], [1], [0, 0, 1, 1], [], []>} : vector<256x4xbf16>, vector<4x4xbf16>, vector<256x4xf32> -> vector<256x4xf32>
    %76 = arith.addf %71, %75 : vector<256x4xf32>
    %77 = vector.broadcast %4 : vector<1x4xf32> to vector<256x4xf32>
    %78 = arith.addf %76, %77 : vector<256x4xf32>
    %cst_64 = arith.constant 0.000000e+00 : f32
    %79 = vector.broadcast %cst_64 : f32 to vector<256x4xf32>
    %80 = arith.maximumf %78, %79 : vector<256x4xf32>
    %81 = arith.truncf %80 : vector<256x4xf32> to vector<256x4xbf16>
    %c0_65 = arith.constant 0 : index
    %c0_66 = arith.constant 0 : index
    %82 = vector.load %arg7[%c0_65, %c0_66] : memref<4x16xbf16, #tpu.memory_space<vmem>>, vector<4x16xbf16>
    %cst_67 = arith.constant dense<0.000000e+00> : vector<256x16xf32>
    %83 = tpu.matmul %81, %82, %cst_67 {dimension_numbers = #tpu.dot_dimension_numbers<[1], [0], [0], [1], [0, 0, 1, 1], [], []>} : vector<256x4xbf16>, vector<4x16xbf16>, vector<256x16xf32> -> vector<256x16xf32>
    %84 = vector.broadcast %5 : vector<1x16xf32> to vector<256x16xf32>
    %85 = arith.addf %83, %84 : vector<256x16xf32>
    %c0_68 = arith.constant 0 : index
    %c0_69 = arith.constant 0 : index
    %c0_70 = arith.constant 0 : index
    %86 = vector.load %arg1[%c0_68, %c0_69, %c0_70] : memref<1x512x16xbf16, #tpu.memory_space<vmem>>, vector<1x256x16xbf16>
    %87 = vector.shape_cast %86 : vector<1x256x16xbf16> to vector<256x16xbf16>
    %88 = arith.extf %87 : vector<256x16xbf16> to vector<256x16xf32>
    %89 = arith.addf %85, %88 : vector<256x16xf32>
    %cst_71 = arith.constant 0.000000e+00 : f32
    %90 = vector.broadcast %cst_71 : f32 to vector<256x16xf32>
    %91 = arith.maximumf %89, %90 : vector<256x16xf32>
    %92 = arith.truncf %91 : vector<256x16xf32> to vector<256x16xbf16>
    %c0_72 = arith.constant 0 : index
    %c0_73 = arith.constant 0 : index
    %c0_74 = arith.constant 0 : index
    %93 = vector.load %arg9[%c0_72, %c0_73, %c0_74] : memref<1x512x16xbf16, #tpu.memory_space<vmem>>, vector<1x256x16xbf16>
    %94 = vector.shape_cast %93 : vector<1x256x16xbf16> to vector<256x16xbf16>
    %95 = vector.shape_cast %92 : vector<256x16xbf16> to vector<1x256x16xbf16>
    tpu.vector_store %arg9[%c0_72, %c0_73, %c0_74], %95 {strides = array<i32>} : memref<1x512x16xbf16, #tpu.memory_space<vmem>>, vector<1x256x16xbf16>,
    %cst_75 = arith.constant 0.000000e+00 : f32
    %96 = vector.broadcast %cst_75 : f32 to vector<256x4xf32>
    %c287 = arith.constant 287 : index
    %c0_76 = arith.constant 0 : index
    %97 = vector.load %arg10[%c287, %c0_76] : memref<640x4xbf16, #tpu.memory_space<vmem>>, vector<256x4xbf16>
    %c0_77 = arith.constant 0 : index
    %c0_78 = arith.constant 0 : index
    %c0_79 = arith.constant 0 : index
    %98 = vector.load %arg5[%c0_77, %c0_78, %c0_79] : memref<9x4x4xbf16, #tpu.memory_space<vmem>>, vector<1x4x4xbf16>
    %99 = vector.shape_cast %98 : vector<1x4x4xbf16> to vector<4x4xbf16>
    %cst_80 = arith.constant dense<0.000000e+00> : vector<256x4xf32>
    %100 = tpu.matmul %97, %99, %cst_80 {dimension_numbers = #tpu.dot_dimension_numbers<[1], [0], [0], [1], [0, 0, 1, 1], [], []>} : vector<256x4xbf16>, vector<4x4xbf16>, vector<256x4xf32> -> vector<256x4xf32>
    %101 = arith.addf %96, %100 : vector<256x4xf32>
    %c288 = arith.constant 288 : index
    %c0_81 = arith.constant 0 : index
    %102 = vector.load %arg10[%c288, %c0_81] : memref<640x4xbf16, #tpu.memory_space<vmem>>, vector<256x4xbf16>
    %c1_82 = arith.constant 1 : index
    %c0_83 = arith.constant 0 : index
    %c0_84 = arith.constant 0 : index
    %103 = vector.load %arg5[%c1_82, %c0_83, %c0_84] : memref<9x4x4xbf16, #tpu.memory_space<vmem>>, vector<1x4x4xbf16>
    %104 = vector.shape_cast %103 : vector<1x4x4xbf16> to vector<4x4xbf16>
    %cst_85 = arith.constant dense<0.000000e+00> : vector<256x4xf32>
    %105 = tpu.matmul %102, %104, %cst_85 {dimension_numbers = #tpu.dot_dimension_numbers<[1], [0], [0], [1], [0, 0, 1, 1], [], []>} : vector<256x4xbf16>, vector<4x4xbf16>, vector<256x4xf32> -> vector<256x4xf32>
    %106 = arith.addf %101, %105 : vector<256x4xf32>
    %c289 = arith.constant 289 : index
    %c0_86 = arith.constant 0 : index
    %107 = vector.load %arg10[%c289, %c0_86] : memref<640x4xbf16, #tpu.memory_space<vmem>>, vector<256x4xbf16>
    %c2_87 = arith.constant 2 : index
    %c0_88 = arith.constant 0 : index
    %c0_89 = arith.constant 0 : index
    %108 = vector.load %arg5[%c2_87, %c0_88, %c0_89] : memref<9x4x4xbf16, #tpu.memory_space<vmem>>, vector<1x4x4xbf16>
    %109 = vector.shape_cast %108 : vector<1x4x4xbf16> to vector<4x4xbf16>
    %cst_90 = arith.constant dense<0.000000e+00> : vector<256x4xf32>
    %110 = tpu.matmul %107, %109, %cst_90 {dimension_numbers = #tpu.dot_dimension_numbers<[1], [0], [0], [1], [0, 0, 1, 1], [], []>} : vector<256x4xbf16>, vector<4x4xbf16>, vector<256x4xf32> -> vector<256x4xf32>
    %111 = arith.addf %106, %110 : vector<256x4xf32>
    %c319 = arith.constant 319 : index
    %c0_91 = arith.constant 0 : index
    %112 = vector.load %arg10[%c319, %c0_91] : memref<640x4xbf16, #tpu.memory_space<vmem>>, vector<256x4xbf16>
    %c3_92 = arith.constant 3 : index
    %c0_93 = arith.constant 0 : index
    %c0_94 = arith.constant 0 : index
    %113 = vector.load %arg5[%c3_92, %c0_93, %c0_94] : memref<9x4x4xbf16, #tpu.memory_space<vmem>>, vector<1x4x4xbf16>
    %114 = vector.shape_cast %113 : vector<1x4x4xbf16> to vector<4x4xbf16>
    %cst_95 = arith.constant dense<0.000000e+00> : vector<256x4xf32>
    %115 = tpu.matmul %112, %114, %cst_95 {dimension_numbers = #tpu.dot_dimension_numbers<[1], [0], [0], [1], [0, 0, 1, 1], [], []>} : vector<256x4xbf16>, vector<4x4xbf16>, vector<256x4xf32> -> vector<256x4xf32>
    %116 = arith.addf %111, %115 : vector<256x4xf32>
    %c320_96 = arith.constant 320 : index
    %c0_97 = arith.constant 0 : index
    %117 = vector.load %arg10[%c320_96, %c0_97] : memref<640x4xbf16, #tpu.memory_space<vmem>>, vector<256x4xbf16>
    %c4_98 = arith.constant 4 : index
    %c0_99 = arith.constant 0 : index
    %c0_100 = arith.constant 0 : index
    %118 = vector.load %arg5[%c4_98, %c0_99, %c0_100] : memref<9x4x4xbf16, #tpu.memory_space<vmem>>, vector<1x4x4xbf16>
    %119 = vector.shape_cast %118 : vector<1x4x4xbf16> to vector<4x4xbf16>
    %cst_101 = arith.constant dense<0.000000e+00> : vector<256x4xf32>
    %120 = tpu.matmul %117, %119, %cst_101 {dimension_numbers = #tpu.dot_dimension_numbers<[1], [0], [0], [1], [0, 0, 1, 1], [], []>} : vector<256x4xbf16>, vector<4x4xbf16>, vector<256x4xf32> -> vector<256x4xf32>
    %121 = arith.addf %116, %120 : vector<256x4xf32>
    %c321 = arith.constant 321 : index
    %c0_102 = arith.constant 0 : index
    %122 = vector.load %arg10[%c321, %c0_102] : memref<640x4xbf16, #tpu.memory_space<vmem>>, vector<256x4xbf16>
    %c5_103 = arith.constant 5 : index
    %c0_104 = arith.constant 0 : index
    %c0_105 = arith.constant 0 : index
    %123 = vector.load %arg5[%c5_103, %c0_104, %c0_105] : memref<9x4x4xbf16, #tpu.memory_space<vmem>>, vector<1x4x4xbf16>
    %124 = vector.shape_cast %123 : vector<1x4x4xbf16> to vector<4x4xbf16>
    %cst_106 = arith.constant dense<0.000000e+00> : vector<256x4xf32>
    %125 = tpu.matmul %122, %124, %cst_106 {dimension_numbers = #tpu.dot_dimension_numbers<[1], [0], [0], [1], [0, 0, 1, 1], [], []>} : vector<256x4xbf16>, vector<4x4xbf16>, vector<256x4xf32> -> vector<256x4xf32>
    %126 = arith.addf %121, %125 : vector<256x4xf32>
    %c351 = arith.constant 351 : index
    %c0_107 = arith.constant 0 : index
    %127 = vector.load %arg10[%c351, %c0_107] : memref<640x4xbf16, #tpu.memory_space<vmem>>, vector<256x4xbf16>
    %c6_108 = arith.constant 6 : index
    %c0_109 = arith.constant 0 : index
    %c0_110 = arith.constant 0 : index
    %128 = vector.load %arg5[%c6_108, %c0_109, %c0_110] : memref<9x4x4xbf16, #tpu.memory_space<vmem>>, vector<1x4x4xbf16>
    %129 = vector.shape_cast %128 : vector<1x4x4xbf16> to vector<4x4xbf16>
    %cst_111 = arith.constant dense<0.000000e+00> : vector<256x4xf32>
    %130 = tpu.matmul %127, %129, %cst_111 {dimension_numbers = #tpu.dot_dimension_numbers<[1], [0], [0], [1], [0, 0, 1, 1], [], []>} : vector<256x4xbf16>, vector<4x4xbf16>, vector<256x4xf32> -> vector<256x4xf32>
    %131 = arith.addf %126, %130 : vector<256x4xf32>
    %c352 = arith.constant 352 : index
    %c0_112 = arith.constant 0 : index
    %132 = vector.load %arg10[%c352, %c0_112] : memref<640x4xbf16, #tpu.memory_space<vmem>>, vector<256x4xbf16>
    %c7_113 = arith.constant 7 : index
    %c0_114 = arith.constant 0 : index
    %c0_115 = arith.constant 0 : index
    %133 = vector.load %arg5[%c7_113, %c0_114, %c0_115] : memref<9x4x4xbf16, #tpu.memory_space<vmem>>, vector<1x4x4xbf16>
    %134 = vector.shape_cast %133 : vector<1x4x4xbf16> to vector<4x4xbf16>
    %cst_116 = arith.constant dense<0.000000e+00> : vector<256x4xf32>
    %135 = tpu.matmul %132, %134, %cst_116 {dimension_numbers = #tpu.dot_dimension_numbers<[1], [0], [0], [1], [0, 0, 1, 1], [], []>} : vector<256x4xbf16>, vector<4x4xbf16>, vector<256x4xf32> -> vector<256x4xf32>
    %136 = arith.addf %131, %135 : vector<256x4xf32>
    %c353 = arith.constant 353 : index
    %c0_117 = arith.constant 0 : index
    %137 = vector.load %arg10[%c353, %c0_117] : memref<640x4xbf16, #tpu.memory_space<vmem>>, vector<256x4xbf16>
    %c8_118 = arith.constant 8 : index
    %c0_119 = arith.constant 0 : index
    %c0_120 = arith.constant 0 : index
    %138 = vector.load %arg5[%c8_118, %c0_119, %c0_120] : memref<9x4x4xbf16, #tpu.memory_space<vmem>>, vector<1x4x4xbf16>
    %139 = vector.shape_cast %138 : vector<1x4x4xbf16> to vector<4x4xbf16>
    %cst_121 = arith.constant dense<0.000000e+00> : vector<256x4xf32>
    %140 = tpu.matmul %137, %139, %cst_121 {dimension_numbers = #tpu.dot_dimension_numbers<[1], [0], [0], [1], [0, 0, 1, 1], [], []>} : vector<256x4xbf16>, vector<4x4xbf16>, vector<256x4xf32> -> vector<256x4xf32>
    %141 = arith.addf %136, %140 : vector<256x4xf32>
    %142 = vector.broadcast %4 : vector<1x4xf32> to vector<256x4xf32>
    %143 = arith.addf %141, %142 : vector<256x4xf32>
    %cst_122 = arith.constant 0.000000e+00 : f32
    %144 = vector.broadcast %cst_122 : f32 to vector<256x4xf32>
    %145 = arith.maximumf %143, %144 : vector<256x4xf32>
    %146 = arith.truncf %145 : vector<256x4xf32> to vector<256x4xbf16>
    %c0_123 = arith.constant 0 : index
    %c0_124 = arith.constant 0 : index
    %147 = vector.load %arg7[%c0_123, %c0_124] : memref<4x16xbf16, #tpu.memory_space<vmem>>, vector<4x16xbf16>
    %cst_125 = arith.constant dense<0.000000e+00> : vector<256x16xf32>
    %148 = tpu.matmul %146, %147, %cst_125 {dimension_numbers = #tpu.dot_dimension_numbers<[1], [0], [0], [1], [0, 0, 1, 1], [], []>} : vector<256x4xbf16>, vector<4x16xbf16>, vector<256x16xf32> -> vector<256x16xf32>
    %149 = vector.broadcast %5 : vector<1x16xf32> to vector<256x16xf32>
    %150 = arith.addf %148, %149 : vector<256x16xf32>
    %c0_126 = arith.constant 0 : index
    %c256_127 = arith.constant 256 : index
    %c0_128 = arith.constant 0 : index
    %151 = vector.load %arg1[%c0_126, %c256_127, %c0_128] : memref<1x512x16xbf16, #tpu.memory_space<vmem>>, vector<1x256x16xbf16>
    %152 = vector.shape_cast %151 : vector<1x256x16xbf16> to vector<256x16xbf16>
    %153 = arith.extf %152 : vector<256x16xbf16> to vector<256x16xf32>
    %154 = arith.addf %150, %153 : vector<256x16xf32>
    %cst_129 = arith.constant 0.000000e+00 : f32
    %155 = vector.broadcast %cst_129 : f32 to vector<256x16xf32>
    %156 = arith.maximumf %154, %155 : vector<256x16xf32>
    %157 = arith.truncf %156 : vector<256x16xf32> to vector<256x16xbf16>
    %c0_130 = arith.constant 0 : index
    %c256_131 = arith.constant 256 : index
    %c0_132 = arith.constant 0 : index
    %158 = vector.load %arg9[%c0_130, %c256_131, %c0_132] : memref<1x512x16xbf16, #tpu.memory_space<vmem>>, vector<1x256x16xbf16>
    %159 = vector.shape_cast %158 : vector<1x256x16xbf16> to vector<256x16xbf16>
    %160 = vector.shape_cast %157 : vector<256x16xbf16> to vector<1x256x16xbf16>
    tpu.vector_store %arg9[%c0_130, %c256_131, %c0_132], %160 {strides = array<i32>} : memref<1x512x16xbf16, #tpu.memory_space<vmem>>, vector<1x256x16xbf16>,
    return
  }
  func.func @transform_0(%arg0: i32) -> (i32, i32, i32) {
    %c0_i32 = arith.constant 0 : i32
    %c0_i32_0 = arith.constant 0 : i32
    %c0_i32_1 = arith.constant 0 : i32
    return %arg0, %c0_i32, %c0_i32_0 : i32, i32, i32
  }
  func.func @transform_1(%arg0: i32) -> (i32, i32) {
    %c0_i32 = arith.constant 0 : i32
    %c0_i32_0 = arith.constant 0 : i32
    %c0_i32_1 = arith.constant 0 : i32
    return %c0_i32, %c0_i32_0 : i32, i32
  }
  func.func @transform_2(%arg0: i32) -> (i32, i32) {
    %c0_i32 = arith.constant 0 : i32
    %c0_i32_0 = arith.constant 0 : i32
    %c0_i32_1 = arith.constant 0 : i32
    return %c0_i32, %c0_i32_0 : i32, i32
  }
  func.func @transform_3(%arg0: i32) -> (i32, i32) {
    %c0_i32 = arith.constant 0 : i32
    %c0_i32_0 = arith.constant 0 : i32
    %c0_i32_1 = arith.constant 0 : i32
    return %c0_i32, %c0_i32_0 : i32, i32
  }
  func.func @transform_4(%arg0: i32) -> (i32, i32, i32) {
    %c0_i32 = arith.constant 0 : i32
    %c0_i32_0 = arith.constant 0 : i32
    %c0_i32_1 = arith.constant 0 : i32
    %c0_i32_2 = arith.constant 0 : i32
    return %c0_i32, %c0_i32_0, %c0_i32_1 : i32, i32, i32
  }
  func.func @transform_5(%arg0: i32) -> (i32, i32) {
    %c0_i32 = arith.constant 0 : i32
    %c0_i32_0 = arith.constant 0 : i32
    %c0_i32_1 = arith.constant 0 : i32
    return %c0_i32, %c0_i32_0 : i32, i32
  }
  func.func @transform_6(%arg0: i32) -> (i32, i32) {
    %c0_i32 = arith.constant 0 : i32
    %c0_i32_0 = arith.constant 0 : i32
    %c0_i32_1 = arith.constant 0 : i32
    return %c0_i32, %c0_i32_0 : i32, i32
  }
  func.func @transform_7(%arg0: i32) -> (i32, i32) {
    %c0_i32 = arith.constant 0 : i32
    %c0_i32_0 = arith.constant 0 : i32
    %c0_i32_1 = arith.constant 0 : i32
    return %c0_i32, %c0_i32_0 : i32, i32
  }
  func.func @transform_8(%arg0: i32) -> (i32, i32, i32) {
    %c0_i32 = arith.constant 0 : i32
    %c0_i32_0 = arith.constant 0 : i32
    %c0_i32_1 = arith.constant 0 : i32
    return %arg0, %c0_i32, %c0_i32_0 : i32, i32, i32
  }
}

</mosaic_0001>

<bundles_post_ra>
// kernel: tpu_custom_call.1
= control target key start
LH: loop header
LB: loop body
LE: loop exit
PB: predicated region body
PF: predicated region fallthrough
CT: control target
= control target key end

     0   :  { %s11061_s27 = smov 0   ;;  %s13465_s0 = inlined_call_operand.vmem [shape: bf16[2,512,16], index: 0, kind: input, shape index: {}]   ;;  %s13466_s1 = inlined_call_operand.vmem [shape: f32[256,1], index: 1, kind: input, shape index: {}]   ;;  %s13467_s2 = inlined_call_operand.vmem [shape: bf16[16,4], index: 2, kind: input, shape index: {}]   ;;  %s13468_s3 = inlined_call_operand.vmem [shape: f32[1,4], index: 3, kind: input, shape index: {}]   ;;  %s13469_s4 = inlined_call_operand.vmem [shape: bf16[9,4,4], index: 4, kind: input, shape index: {}]   ;;  %s13470_s5 = inlined_call_operand.vmem [shape: f32[1,4], index: 5, kind: input, shape index: {}]   ;;  %s13471_s6 = inlined_call_operand.vmem [shape: bf16[4,16], index: 6, kind: input, shape index: {}]   ;;  %s13472_s7 = inlined_call_operand.vmem [shape: f32[1,16], index: 7, kind: input, shape index: {}]   ;;  %s13473_s8 = inlined_call_operand.vmem [shape: bf16[2,512,16], index: 8, kind: output, shape index: {}]  }
   0x1 LB: > { %s8583_s28 = sadd.s32 4294967295, %s11013_s27   ;;  %p8587_p0 = scmp.ge.s32.totalorder %s11013_s27, 1  ;;  %s11013_s27 = sphi %s11061_s27, %s18_s27  }
   0x2   : > { %p262_p1 = scmp.lt.s32.totalorder %s11013_s27, 3 }
   0x4   : > { %p263_p2 = pnand %p8587_p0, %p262_p1 }
   0x6   : > { %266 = sbr.rel (%p263_p2) target bundleno = 2057 (0x809), region = 52 }
   0xd   : > { %v10953_v0 = vld [vmem:[%s13467_s2] sm:$0xff]   ;;  %p296_p3 = scmp.lt.s32.totalorder %s8583_s28, 1  ;;  %vm307_vm0 = vcmask 31744   ;;  %v11015_v3 = vmov 0   ;;  %v321_v4 = vld [vmem:[%s13466_s1 + $0x10] sm:$0xff]  ;;  %vm637_vm1 = vcmask 130048  }
   0xe   : > { %v10954_v1 = vld [vmem:[%s13467_s2] sm:$0xff]   ;;  %9662 = vmatprep.subr.bf16.mxu0 %v10953_v0  ;;  %309 = vst.msk [vmem:[#allocation2 + $0x8] sm:$0xff] %vm307_vm0, %v11015_v3  ;;  %310 = vst.msk [vmem:[#allocation2 + $0x10] sm:$0xff] %vm307_vm0, %v11015_v3  ;;  %10951 = vset.pattern.permute.xlu0 %v11015_v3  ;;  %v320_v5 = vld [vmem:[%s13466_s1 + $0x8] sm:$0xff]  ;;  %vm1436_vm2 = vcmask 1041408   ;;  %vm4927_vm5 = vcmask 125952  }
   0xf   : > { %s13703_s28 = smov (!%p296_p3, %s8583_s28), 1  ;;  %v319_v2 = vld [vmem:[%s13466_s1] sm:$0xff]  ;;  %9696 = vmatprep.subr.bf16.mxu1 %v10954_v1  ;;  %9663 = vmatpush3.bf16.msra.mxu0 %v10953_v0  ;;  %311 = vst.msk [vmem:[#allocation2 + $0x18] sm:$0xff] %vm307_vm0, %v11015_v3  ;;  %312 = vst.msk [vmem:[#allocation2 + $0x120] sm:$0xff] %vm307_vm0, %v11015_v3  ;;  %v322_v6 = vld [vmem:[%s13466_s1 + $0x18] sm:$0xff] }
  0x10   : > { %313 = vst.msk [vmem:[#allocation2 + $0x128] sm:$0xff] %vm307_vm0, %v11015_v3  ;;  %314 = vst.msk [vmem:[#allocation2 + $0x130] sm:$0xff] %vm307_vm0, %v11015_v3  ;;  %9697 = vmatpush3.bf16.msra.mxu1 %v10954_v1  ;;  %s9063_s15 = sshll.u32 %s13703_s28, 8  ;;  %10952 = vset.pattern.permute.xlu1 %v11015_v3  ;;  %v323_v10 = vld [vmem:[%s13466_s1 + $0x20] sm:$0xff]  ;;  %v324_v12 = vld [vmem:[%s13466_s1 + $0x28] sm:$0xff] }
  0x11   : > { %s11095_s18 = scalar_lea.vmem %s13465_s0, %s9063_s15  ;;  %353 = vperm.xlu0 %10951, %v319_v2   ;;  %363 = vperm.xlu1 %10952, %v321_v4   ;;  %v325_v15 = vld [vmem:[%s13466_s1 + $0x30] sm:$0xff]  ;;  %v326_v17 = vld [vmem:[%s13466_s1 + $0x38] sm:$0xff]  ;;  %v327_v21 = vld [vmem:[%s13466_s1 + $0x40] sm:$0xff]  ;;  %vm1949_vm3 = vsmask.f32 7424  ;;  %s12734_s29 = scalar_lea.vmem %s13473_s8, %s9063_s15 }
  0x12   : > { %v10955_v7 = vld [vmem:[%s11095_s18] sm:$0xff]   ;;  %v10957_v9 = vld [vmem:[%s11095_s18 + $0x8] sm:$0xff]   ;;  %v10959_v13 = vld [vmem:[%s11095_s18 + $0x10] sm:$0xff]   ;;  %vm1601_vm4 = vsmask.f32 256 }
  0x13   : > { %v10956_v8 = vld [vmem:[%s11095_s18 + $0x80] sm:$0xff]   ;;  %9664 = vmatprep.mubr.msk.bf16.mxu0 %vm637_vm1, %v10955_v7  ;;  %v10958_v11 = vld [vmem:[%s11095_s18 + $0x88] sm:$0xff]   ;;  %v10960_v14 = vld [vmem:[%s11095_s18 + $0x90] sm:$0xff]  }
  0x14   : > { %9698 = vmatprep.mubr.msk.bf16.mxu1 %vm637_vm1, %v10956_v8  ;;  %9665 = vmatmul.mubr.msk.bf16.vlgmr.msra.gmra.mrb[0].mxu0 %vm637_vm1, %v10957_v9  ;;  %v10961_v16 = vld [vmem:[%s11095_s18 + $0x18] sm:$0xff]   ;;  %v10963_v19 = vld [vmem:[%s11095_s18 + $0x20] sm:$0xff]   ;;  %v328_v22 = vld [vmem:[%s13466_s1 + $0x48] sm:$0xff] }
  0x15   : > { %358 = vperm.xlu0 %10951, %v320_v5   ;;  %368 = vperm.xlu1 %10952, %v322_v6   ;;  %v10962_v18 = vld [vmem:[%s11095_s18 + $0x98] sm:$0xff]   ;;  %v10964_v20 = vld [vmem:[%s11095_s18 + $0xa0] sm:$0xff]   ;;  %v329_v23 = vld [vmem:[%s13466_s1 + $0x50] sm:$0xff] }
  0x16   : > { %9699 = vmatmul.mubr.msk.bf16.vlgmr.msra.gmra.mrb[0].mxu1 %vm637_vm1, %v10958_v11  ;;  %9668 = vmatprep.mubr.msk.bf16.mxu0 %vm637_vm1, %v10959_v13  ;;  %v10965_v24 = vld [vmem:[%s11095_s18 + $0x28] sm:$0xff]   ;;  %v330_v25 = vld [vmem:[%s13466_s1 + $0x58] sm:$0xff]  ;;  %v10967_v27 = vld [vmem:[%s11095_s18 + $0x30] sm:$0xff]  }
  0x17   : > { %9702 = vmatprep.mubr.msk.bf16.mxu1 %vm637_vm1, %v10960_v14  ;;  %v10966_v26 = vld [vmem:[%s11095_s18 + $0xa8] sm:$0xff]   ;;  %v10968_v28 = vld [vmem:[%s11095_s18 + $0xb0] sm:$0xff]   ;;  %v10969_v29 = vld [vmem:[%s11095_s18 + $0x38] sm:$0xff]  }
  0x18   : > { %v10970_v30 = vld [vmem:[%s11095_s18 + $0xb8] sm:$0xff]   ;;  %v10971_v31 = vld [vmem:[%s11095_s18 + $0x40] sm:$0xff]   ;;  %v332_v34 = vld [vmem:[%s13466_s1 + $0x68] sm:$0xff] }
  0x19   : > { %373 = vperm.xlu0 %10951, %v323_v10   ;;  %378 = vperm.xlu1 %10952, %v324_v12   ;;  %v10972_v32 = vld [vmem:[%s11095_s18 + $0xc0] sm:$0xff]   ;;  %v10973_v35 = vld [vmem:[%s11095_s18 + $0x48] sm:$0xff]   ;;  %v333_v36 = vld [vmem:[%s13466_s1 + $0x70] sm:$0xff] }
  0x1a   : > { %v331_v33 = vld [vmem:[%s13466_s1 + $0x60] sm:$0xff]  ;;  %v334_v37 = vld [vmem:[%s13466_s1 + $0x78] sm:$0xff]  ;;  %v10974_v38 = vld [vmem:[%s11095_s18 + $0xc8] sm:$0xff]  }
  0x1b   : > { %v10975_v39 = vld [vmem:[%s11095_s18 + $0x50] sm:$0xff]   ;;  %v335_v41 = vld [vmem:[%s13466_s1 + $0x80] sm:$0xff]  ;;  %v336_v42 = vld [vmem:[%s13466_s1 + $0x88] sm:$0xff] }
  0x1c   : > { %9669 = vmatmul.mubr.msk.bf16.gmra.mrb[4].mxu0 %vm637_vm1, %v10961_v16  ;;  %v10976_v40 = vld [vmem:[%s11095_s18 + $0xd0] sm:$0xff]   ;;  %v8659_v43 = vld [vmem:[%s13469_s4 + $0x2] sm:$0x3]  ;;  %v10977_v46 = vld [vmem:[%s11095_s18 + $0x58] sm:$0xff]  }
  0x1d   : > { %383 = vperm.xlu0 %10951, %v325_v15   ;;  %388 = vperm.xlu1 %10952, %v326_v17   ;;  %v337_v44 = vld [vmem:[%s13466_s1 + $0x90] sm:$0xff]  ;;  %v1438_v45 = vsel %vm1436_vm2, %v8659_v43, 0  ;;  %v338_v47 = vld [vmem:[%s13466_s1 + $0x98] sm:$0xff]  ;;  %v10979_v49 = vld [vmem:[%s11095_s18 + $0x60] sm:$0xff]  }
  0x1e   : > { %9703 = vmatmul.mubr.msk.bf16.gmra.mrb[4].mxu1 %vm637_vm1, %v10962_v18  ;;  %9672 = vmatprep.mubr.msk.bf16.mxu0 %vm637_vm1, %v10963_v19  ;;  %v10978_v48 = vld [vmem:[%s11095_s18 + $0xd8] sm:$0xff]   ;;  %v10980_v50 = vld [vmem:[%s11095_s18 + $0xe0] sm:$0xff]   ;;  %v340_v52 = vld [vmem:[%s13466_s1 + $0xa8] sm:$0xff] }
  0x1f   : > { %9706 = vmatprep.mubr.msk.bf16.mxu1 %vm637_vm1, %v10964_v20  ;;  %10922 = vmatprep.subr.msk.bf16.mxu0 %vm1436_vm2, %v8659_v43  ;;  %v339_v51 = vld [vmem:[%s13466_s1 + $0xa0] sm:$0xff]  ;;  %v341_v53 = vld [vmem:[%s13466_s1 + $0xb0] sm:$0xff]  ;;  %v10981_v54 = vld [vmem:[%s11095_s18 + $0x68] sm:$0xff]  }
  0x20   : > { %9731 = vmatpush3.bf16.msra.mxu0 %v1438_v45  ;;  %v342_v55 = vld [vmem:[%s13466_s1 + $0xb8] sm:$0xff]  ;;  %v10982_v56 = vld [vmem:[%s11095_s18 + $0xe8] sm:$0xff]   ;;  %v10983_v57 = vld [vmem:[%s11095_s18 + $0x70] sm:$0xff]  }
  0x21   : > { %393 = vperm.xlu0 %10951, %v327_v21   ;;  %398 = vperm.xlu1 %10952, %v328_v22   ;;  %v10984_v58 = vld [vmem:[%s11095_s18 + $0xf0] sm:$0xff]   ;;  %v343_v59 = vld [vmem:[%s13466_s1 + $0xc0] sm:$0xff]  ;;  %v344_v60 = vld [vmem:[%s13466_s1 + $0xc8] sm:$0xff] }
  0x22   : > { %v345_v61 = vld [vmem:[%s13466_s1 + $0xd0] sm:$0xff]  ;;  %v10985_v62 = vld [vmem:[%s11095_s18 + $0x78] sm:$0xff]   ;;  %v347_v1 = vld [vmem:[%s13466_s1 + $0xe0] sm:$0xff] }
  0x23   : > { %v346_v63 = vld [vmem:[%s13466_s1 + $0xd8] sm:$0xff]  ;;  %v348_v2 = vld [vmem:[%s13466_s1 + $0xe8] sm:$0xff]  ;;  %v349_v3 = vld [vmem:[%s13466_s1 + $0xf0] sm:$0xff] }
  0x24   : > { %9673 = vmatmul.mubr.msk.bf16.gmra.mrb[8].mxu0 %vm637_vm1, %v10965_v24  ;;  %v10986_v0 = vld [vmem:[%s11095_s18 + $0xf8] sm:$0xff]   ;;  %v11256_v5 = vld [vmem:[#allocation2 + $0x10] sm:$0xff]  ;;  %v1385_v7 = vld [vmem:[%s13469_s4] sm:$0x3] }
  0x25   : > { %403 = vperm.xlu0 %10951, %v329_v23   ;;  %408 = vperm.xlu1 %10952, %v330_v25   ;;  %v350_v4 = vld [vmem:[%s13466_s1 + $0xf8] sm:$0xff]  ;;  %v1767_v8 = vsel %vm1436_vm2, %v1385_v7, 0  ;;  %v11283_v13 = vld [vmem:[%s13469_s4 + $0x4] sm:$0x3] }
  0x26   : > { %9707 = vmatmul.mubr.msk.bf16.gmra.mrb[8].mxu1 %vm637_vm1, %v10966_v26  ;;  %9676 = vmatprep.mubr.msk.bf16.mxu0 %vm637_vm1, %v10967_v27  ;;  %v11260_v6 = vld [vmem:[#allocation2 + $0x18] sm:$0xff]  ;;  %v11306_v26 = vld [vmem:[%s13468_s3] ss:$0 sm:$0xff] }
  0x27   : > { %9710 = vmatprep.mubr.msk.bf16.mxu1 %vm637_vm1, %v10968_v28  ;;  %10923 = vmatprep.subr.msk.bf16.mxu0 %vm1436_vm2, %v1385_v7  ;;  %v1616_v9 = vshll.u32 %v11260_v6, 16  ;;  %v1613_v10 = vshrl.u32 %v11260_v6, 16 }
  0x29   : > { %413 = vperm.xlu0 %10951, %v331_v33   ;;  %418 = vperm.xlu1 %10952, %v332_v34   ;;  %v11273_v11 = vrot.slane %v1616_v9, 1 }
  0x2b   : > { %v11278_v12 = vor.u32 %v11273_v11, %v1613_v10 }
  0x2c   : > { %9677 = vmatmul.mubr.msk.bf16.gmra.mrb[12].mxu0 %vm637_vm1, %v10969_v29 }
  0x2d   : > { %9680 = vmatprep.mubr.msk.bf16.mxu0 %vm637_vm1, %v10971_v31  ;;  %423 = vperm.xlu0 %10951, %v333_v36  }
  0x2e   : > { %9711 = vmatmul.mubr.msk.bf16.gmra.mrb[12].mxu1 %vm637_vm1, %v10970_v30  ;;  %428 = vperm.xlu1 %10952, %v334_v37  }
  0x2f   : > { %9714 = vmatprep.mubr.msk.bf16.mxu1 %vm637_vm1, %v10972_v32 }
  0x31   : > { %433 = vperm.xlu0 %10951, %v335_v41  }
  0x32   : > { %438 = vperm.xlu1 %10952, %v336_v42  }
  0x34   : > { %9681 = vmatmul.mubr.msk.bf16.gmra.mrb[16].mxu0 %vm637_vm1, %v10973_v35 }
  0x35   : > { %9684 = vmatprep.mubr.msk.bf16.mxu0 %vm637_vm1, %v10975_v39  ;;  %443 = vperm.xlu0 %10951, %v337_v44  }
  0x36   : > { %9715 = vmatmul.mubr.msk.bf16.gmra.mrb[16].mxu1 %vm637_vm1, %v10974_v38  ;;  %448 = vperm.xlu1 %10952, %v338_v47  }
  0x37   : > { %9718 = vmatprep.mubr.msk.bf16.mxu1 %vm637_vm1, %v10976_v40 }
  0x39   : > { %453 = vperm.xlu0 %10951, %v339_v51  }
  0x3a   : > { %458 = vperm.xlu1 %10952, %v340_v52   ;;  %v1609_v52 = vshll.u32 %v11256_v5, 16 }
  0x3c   : > { %9685 = vmatmul.mubr.msk.bf16.gmra.mrb[20].mxu0 %vm637_vm1, %v10977_v46  ;;  %v1955_v7 = vrot.slane %v1609_v52, 1 }
  0x3d   : > { %9688 = vmatprep.mubr.msk.bf16.mxu0 %vm637_vm1, %v10979_v49  ;;  %463 = vperm.xlu0 %10951, %v341_v53  }
  0x3e   : > { %9719 = vmatmul.mubr.msk.bf16.gmra.mrb[20].mxu1 %vm637_vm1, %v10978_v48  ;;  %468 = vperm.xlu1 %10952, %v342_v55  }
  0x3f   : > { %9722 = vmatprep.mubr.msk.bf16.mxu1 %vm637_vm1, %v10980_v50 }
  0x41   : > { %473 = vperm.xlu0 %10951, %v343_v59  }
  0x42   : > { %478 = vperm.xlu1 %10952, %v344_v60  }
  0x44   : > { %9689 = vmatmul.mubr.msk.bf16.gmra.mrb[24].mxu0 %vm637_vm1, %v10981_v54 }
  0x45   : > { %9692 = vmatprep.mubr.msk.bf16.mxu0 %vm637_vm1, %v10983_v57  ;;  %483 = vperm.xlu0 %10951, %v345_v61  }
  0x46   : > { %9723 = vmatmul.mubr.msk.bf16.gmra.mrb[24].mxu1 %vm637_vm1, %v10982_v56  ;;  %488 = vperm.xlu1 %10952, %v346_v63  }
  0x47   : > { %9726 = vmatprep.mubr.msk.bf16.mxu1 %vm637_vm1, %v10984_v58 }
  0x49   : > { %493 = vperm.xlu0 %10951, %v347_v1  }
  0x4a   : > { %498 = vperm.xlu1 %10952, %v348_v2  }
  0x4c   : > { %9693 = vmatmul.mubr.msk.bf16.gmra.mrb[28].mxu0 %vm637_vm1, %v10985_v62 }
  0x4d   : > { %503 = vperm.xlu0 %10951, %v349_v3   ;;  %9732 = vmatprep.mubr.msk.bf16.mxu0 %vm307_vm0, %v11256_v5 }
  0x4e   : > { %9727 = vmatmul.mubr.msk.bf16.gmra.mrb[28].mxu1 %vm637_vm1, %v10986_v0  ;;  %508 = vperm.xlu1 %10952, %v350_v4  }
  0x54   : > { %9733 = vmatmul.mubr.msk.bf16.vlgmr.msra.gmra.mrb[32].mxu0 %vm307_vm0, %v11260_v6  ;;  %v2131_v6 = vsel %vm1436_vm2, %v11283_v13, 0 }
  0x55   : > { %9765 = vmatpush3.bf16.msra.mxu0 %v1767_v8 }
  0x56   : > { %10924 = vmatprep.subr.msk.bf16.mxu0 %vm1436_vm2, %v11283_v13 }
  0x90   : > { %v354_v14 = vpop.permute.xlu0 %353  ;;  %v364_v15 = vpop.permute.xlu1 %363 }
  0x94   : > { %v359_v16 = vpop.permute.xlu0 %358  ;;  %v369_v17 = vpop.permute.xlu1 %368 }
  0x98   : > { %v11287_v18 = vpop.permute.xlu0 %373  ;;  %v11289_v19 = vpop.permute.xlu1 %378 }
  0x9c   : > { %v11291_v20 = vpop.permute.xlu0 %383  ;;  %v11293_v21 = vpop.permute.xlu1 %388 }
  0xa0   : > { %v11295_v22 = vpop.permute.xlu0 %393  ;;  %v11297_v23 = vpop.permute.xlu1 %398 }
  0xa4   : > { %v11299_v24 = vpop.permute.xlu0 %403  ;;  %v11301_v25 = vpop.permute.xlu1 %408 }
  0xa8   : > { %v11308_v27 = vpop.permute.xlu0 %413  ;;  %v11310_v28 = vpop.permute.xlu1 %418 }
  0xac   : > { %v11321_v53 = vpop.permute.xlu0 %423 }
  0xad   : > { %v11323_v58 = vpop.permute.xlu1 %428 }
  0xe7   : > { %v9666_v29 = vpop.f32.mrb[0].mxu0 }
  0xe8   : > { %v729_v30 = vadd.f32 %v9666_v29, %v11306_v26  ;;  %v720_v32 = vpop.f32.mrb[1].mxu0 }
  0xe9   : > { %v9700_v31 = vpop.f32.mrb[0].mxu1  ;;  %v721_v34 = vadd.f32 %v11306_v26, %v720_v32  ;;  %v9667_v36 = vpop.f32.mrb[2].mxu0 }
  0xea   : > { %v1154_v33 = vadd.f32 %v9700_v31, %v11306_v26  ;;  %v1145_v35 = vpop.f32.mrb[1].mxu1  ;;  %v849_v37 = vmax.f32 %v729_v30, 0.0  ;;  %v732_v39 = vadd.f32 %v9667_v36, %v11306_v26  ;;  %v723_v41 = vpop.f32.mrb[3].mxu0 }
  0xeb   : > { %v1146_v38 = vadd.f32 %v11306_v26, %v1145_v35  ;;  %v9701_v40 = vpop.f32.mrb[2].mxu1  ;;  %v847_v43 = vmax.f32 %v721_v34, 0.0  ;;  %v724_v45 = vadd.f32 %v11306_v26, %v723_v41 }
  0xec   : > { %v1274_v42 = vmax.f32 %v1154_v33, 0.0  ;;  %v1157_v44 = vadd.f32 %v9701_v40, %v11306_v26  ;;  %v1148_v46 = vpop.f32.mrb[3].mxu1  ;;  %v850_v48 = vmax.f32 %v732_v39, 0.0  ;;  %v881_v54 = vmul.f32 %v849_v37, %v364_v15 }
  0xed   : > { %v1272_v47 = vmax.f32 %v1146_v38, 0.0  ;;  %v1149_v49 = vadd.f32 %v11306_v26, %v1148_v46  ;;  %v848_v51 = vmax.f32 %v724_v45, 0.0  ;;  %v879_v59 = vmul.f32 %v847_v43, %v354_v14 }
  0xee   : > { %v1275_v50 = vmax.f32 %v1157_v44, 0.0  ;;  %v1306_v55 = vmul.f32 %v1274_v42, %v364_v15  ;;  %v882_v56 = vmul.f32 %v850_v48, %v369_v17  ;;  %v1606_v44 = vshrl.u32 %v11256_v5, 16  ;;  %v11341_v48 = vpop.permute.xlu0 %433 }
  0xef   : > { %v1273_v57 = vmax.f32 %v1149_v49, 0.0  ;;  %v1304_v60 = vmul.f32 %v1272_v47, %v354_v14  ;;  %v880_v62 = vmul.f32 %v848_v51, %v359_v16  ;;  %v9670_v63 = vpop.f32.mrb[4].mxu0 }
  0xf0   : > { %v1307_v61 = vmul.f32 %v1275_v50, %v369_v17  ;;  %v912_v0 = vpack.c.bf16 %v882_v56, %v881_v54  ;;  %v745_v2 = vadd.f32 %v9670_v63, %v11306_v26  ;;  %v736_v4 = vpop.f32.mrb[5].mxu0  ;;  %v1956_v54 = vor.u32 %v1955_v7, %v1606_v44 }
  0xf1   : > { %v1305_v1 = vmul.f32 %v1273_v57, %v359_v16  ;;  %v9704_v3 = vpop.f32.mrb[4].mxu1  ;;  %v911_v15 = vpack.c.bf16 %v880_v62, %v879_v59  ;;  %v737_v30 = vadd.f32 %v11306_v26, %v736_v4  ;;  %v9671_v14 = vpop.f32.mrb[6].mxu0 }
  0xf2   : > { %v1337_v8 = vpack.c.bf16 %v1307_v61, %v1306_v55  ;;  %v1170_v29 = vadd.f32 %v9704_v3, %v11306_v26  ;;  %v1161_v31 = vpop.f32.mrb[5].mxu1  ;;  %928 = vst.msk [vmem:[#allocation2 + $0x28] sm:$0xff] %vm307_vm0, %v912_v0  ;;  %v853_v32 = vmax.f32 %v745_v2, 0.0  ;;  %v748_v33 = vadd.f32 %v9671_v14, %v11306_v26  ;;  %v739_v35 = vpop.f32.mrb[7].mxu0 }
  0xf3   : > { %v1336_v17 = vpack.c.bf16 %v1305_v1, %v1304_v60  ;;  %v1162_v16 = vadd.f32 %v11306_v26, %v1161_v31  ;;  %v9705_v34 = vpop.f32.mrb[6].mxu1  ;;  %927 = vst.msk [vmem:[#allocation2 + $0x20] sm:$0xff] %vm307_vm0, %v911_v15  ;;  %v851_v37 = vmax.f32 %v737_v30, 0.0  ;;  %v740_v39 = vadd.f32 %v11306_v26, %v739_v35  ;;  %v11347_v55 = vpop.permute.xlu1 %438 }
  0xf4   : > { %1353 = vst.msk [vmem:[#allocation2 + $0xa8] sm:$0xff] %vm307_vm0, %v1337_v8  ;;  %v1278_v36 = vmax.f32 %v1170_v29, 0.0  ;;  %v1173_v38 = vadd.f32 %v9705_v34, %v11306_v26  ;;  %v1164_v40 = vpop.f32.mrb[7].mxu1  ;;  %v854_v42 = vmax.f32 %v748_v33, 0.0  ;;  %v885_v45 = vmul.f32 %v853_v32, %v11291_v20 }
  0xf5   : > { %1352 = vst.msk [vmem:[#allocation2 + $0xa0] sm:$0xff] %vm307_vm0, %v1336_v17  ;;  %v1276_v41 = vmax.f32 %v1162_v16, 0.0  ;;  %v1165_v43 = vadd.f32 %v11306_v26, %v1164_v40  ;;  %v852_v47 = vmax.f32 %v740_v39, 0.0  ;;  %v883_v56 = vmul.f32 %v851_v37, %v11287_v18 }
  0xf6   : > { %v1279_v46 = vmax.f32 %v1173_v38, 0.0  ;;  %v1310_v49 = vmul.f32 %v1278_v36, %v11291_v20  ;;  %v886_v50 = vmul.f32 %v854_v42, %v11293_v21  ;;  %v11357_v2 = vsel %vm1949_vm3, %v1956_v54, %v11273_v11 }
  0xf7   : > { %v1277_v51 = vmax.f32 %v1165_v43, 0.0  ;;  %v1308_v57 = vmul.f32 %v1276_v41, %v11287_v18  ;;  %v884_v60 = vmul.f32 %v852_v47, %v11289_v19  ;;  %v9674_v61 = vpop.f32.mrb[8].mxu0  ;;  %v11378_v41 = vpop.permute.xlu0 %443 }
  0xf8   : > { %v1311_v59 = vmul.f32 %v1279_v46, %v11293_v21  ;;  %v914_v62 = vpack.c.bf16 %v886_v50, %v885_v45  ;;  %v761_v63 = vadd.f32 %v9674_v61, %v11306_v26  ;;  %v752_v1 = vpop.f32.mrb[9].mxu0  ;;  %v11382_v46 = vpop.permute.xlu1 %448 }
  0xf9   : > { %v1309_v20 = vmul.f32 %v1277_v51, %v11289_v19  ;;  %v9708_v0 = vpop.f32.mrb[8].mxu1  ;;  %v913_v4 = vpack.c.bf16 %v884_v60, %v883_v56  ;;  %v753_v21 = vadd.f32 %v11306_v26, %v752_v1  ;;  %v9675_v8 = vpop.f32.mrb[10].mxu0  ;;  %v11372_v35 = vld [vmem:[#allocation2 + $0x28] sm:$0xff] }
  0xfa   : > { %v1339_v3 = vpack.c.bf16 %v1311_v59, %v1310_v49  ;;  %v1186_v18 = vadd.f32 %v9708_v0, %v11306_v26  ;;  %v1177_v7 = vpop.f32.mrb[9].mxu1  ;;  %930 = vst.msk [vmem:[#allocation2 + $0x38] sm:$0xff] %vm307_vm0, %v914_v62  ;;  %v857_v19 = vmax.f32 %v761_v63, 0.0  ;;  %v764_v30 = vadd.f32 %v9675_v8, %v11306_v26  ;;  %v755_v14 = vpop.f32.mrb[11].mxu0  ;;  %v11364_v11 = vld [vmem:[#allocation2 + $0x20] sm:$0xff] }
  0xfb   : > { %v1338_v15 = vpack.c.bf16 %v1309_v20, %v1308_v57  ;;  %v1178_v29 = vadd.f32 %v11306_v26, %v1177_v7  ;;  %v9709_v31 = vpop.f32.mrb[10].mxu1  ;;  %929 = vst.msk [vmem:[#allocation2 + $0x30] sm:$0xff] %vm307_vm0, %v913_v4  ;;  %v855_v32 = vmax.f32 %v753_v21, 0.0  ;;  %v756_v33 = vadd.f32 %v11306_v26, %v755_v14  ;;  %9736 = vmatprep.mubr.msk.bf16.mxu0 %vm307_vm0, %v11364_v11 }
  0xfc   : > { %1355 = vst.msk [vmem:[#allocation2 + $0xb8] sm:$0xff] %vm307_vm0, %v1339_v3  ;;  %v1282_v17 = vmax.f32 %v1186_v18, 0.0  ;;  %v1189_v16 = vadd.f32 %v9709_v31, %v11306_v26  ;;  %v1180_v34 = vpop.f32.mrb[11].mxu1  ;;  %v858_v37 = vmax.f32 %v764_v30, 0.0  ;;  %9737 = vmatmul.mubr.msk.bf16.gmra.mrb[36].mxu0 %vm307_vm0, %v11372_v35  ;;  %v889_v42 = vmul.f32 %v857_v19, %v11299_v24 }
  0xfd   : > { %1354 = vst.msk [vmem:[#allocation2 + $0xb0] sm:$0xff] %vm307_vm0, %v1338_v15  ;;  %v1280_v36 = vmax.f32 %v1178_v29, 0.0  ;;  %v1181_v38 = vadd.f32 %v11306_v26, %v1180_v34  ;;  %v856_v40 = vmax.f32 %v756_v33, 0.0  ;;  %v887_v49 = vmul.f32 %v855_v32, %v11295_v22 }
  0xfe   : > { %v1283_v39 = vmax.f32 %v1189_v16, 0.0  ;;  %v890_v43 = vmul.f32 %v858_v37, %v11301_v25  ;;  %v1314_v47 = vmul.f32 %v1282_v17, %v11299_v24  ;;  %v11410_v16 = vpop.permute.xlu0 %453 }
  0xff   : > { %v1281_v45 = vmax.f32 %v1181_v38, 0.0  ;;  %v888_v51 = vmul.f32 %v856_v40, %v11297_v23  ;;  %v9678_v54 = vpop.f32.mrb[12].mxu0  ;;  %v1312_v56 = vmul.f32 %v1280_v36, %v11295_v22  ;;  %v11412_v36 = vpop.permute.xlu1 %458 }
 0x100   : > { %v1315_v50 = vmul.f32 %v1283_v39, %v11301_v25  ;;  %v916_v57 = vpack.c.bf16 %v890_v43, %v889_v42  ;;  %v768_v61 = vpop.f32.mrb[13].mxu0  ;;  %v777_v63 = vadd.f32 %v9678_v54, %v11306_v26 }
 0x101   : > { %v1313_v59 = vmul.f32 %v1281_v45, %v11297_v23  ;;  %v9712_v60 = vpop.f32.mrb[12].mxu1  ;;  %v915_v20 = vpack.c.bf16 %v888_v51, %v887_v49  ;;  %v9679_v24 = vpop.f32.mrb[14].mxu0  ;;  %v769_v3 = vadd.f32 %v11306_v26, %v768_v61  ;;  %v11402_v15 = vld [vmem:[#allocation2 + $0x38] sm:$0xff] }
 0x102   : > { %v1341_v62 = vpack.c.bf16 %v1315_v50, %v1314_v47  ;;  %v1193_v0 = vpop.f32.mrb[13].mxu1  ;;  %932 = vst.msk [vmem:[#allocation2 + $0x48] sm:$0xff] %vm307_vm0, %v916_v57  ;;  %v1202_v25 = vadd.f32 %v9712_v60, %v11306_v26  ;;  %v771_v22 = vpop.f32.mrb[15].mxu0  ;;  %v11394_v18 = vld [vmem:[#allocation2 + $0x30] sm:$0xff]  ;;  %v861_v23 = vmax.f32 %v777_v63, 0.0  ;;  %v780_v7 = vadd.f32 %v9679_v24, %v11306_v26 }
 0x103   : > { %v1340_v1 = vpack.c.bf16 %v1313_v59, %v1312_v56  ;;  %v9713_v4 = vpop.f32.mrb[14].mxu1  ;;  %931 = vst.msk [vmem:[#allocation2 + $0x40] sm:$0xff] %vm307_vm0, %v915_v20  ;;  %v1194_v21 = vadd.f32 %v11306_v26, %v1193_v0  ;;  %9740 = vmatprep.mubr.msk.bf16.mxu0 %vm307_vm0, %v11394_v18  ;;  %v859_v29 = vmax.f32 %v769_v3, 0.0  ;;  %v772_v31 = vadd.f32 %v11306_v26, %v771_v22 }
 0x104   : > { %1357 = vst.msk [vmem:[#allocation2 + $0xc8] sm:$0xff] %vm307_vm0, %v1341_v62  ;;  %v1196_v8 = vpop.f32.mrb[15].mxu1  ;;  %v1286_v19 = vmax.f32 %v1202_v25, 0.0  ;;  %v1205_v30 = vadd.f32 %v9713_v4, %v11306_v26  ;;  %9741 = vmatmul.mubr.msk.bf16.gmra.mrb[40].mxu0 %vm307_vm0, %v11402_v15  ;;  %v862_v17 = vmax.f32 %v780_v7, 0.0  ;;  %v893_v37 = vmul.f32 %v861_v23, %v11321_v53  ;;  %v464_v7 = vpop.permute.xlu0 %463 }
 0x105   : > { %1356 = vst.msk [vmem:[#allocation2 + $0xc0] sm:$0xff] %vm307_vm0, %v1340_v1  ;;  %v1284_v14 = vmax.f32 %v1194_v21, 0.0  ;;  %v1197_v32 = vadd.f32 %v11306_v26, %v1196_v8  ;;  %v860_v34 = vmax.f32 %v772_v31, 0.0  ;;  %v891_v43 = vmul.f32 %v859_v29, %v11308_v27 }
 0x106   : > { %v1287_v33 = vmax.f32 %v1205_v30, 0.0  ;;  %v894_v38 = vmul.f32 %v862_v17, %v11323_v58  ;;  %v1318_v42 = vmul.f32 %v1286_v19, %v11321_v53  ;;  %v469_v30 = vpop.permute.xlu1 %468  ;;  %v13478_v13 = vshll.u32 %v11394_v18, 16 }
 0x107   : > { %v1285_v39 = vmax.f32 %v1197_v32, 0.0  ;;  %v9682_v40 = vpop.f32.mrb[16].mxu0  ;;  %v892_v47 = vmul.f32 %v860_v34, %v11310_v28  ;;  %v1316_v51 = vmul.f32 %v1284_v14, %v11308_v27 }
 0x108   : > { %v1319_v45 = vmul.f32 %v1287_v33, %v11323_v58  ;;  %v784_v50 = vpop.f32.mrb[17].mxu0  ;;  %v918_v54 = vpack.c.bf16 %v894_v38, %v893_v37  ;;  %v793_v62 = vadd.f32 %v9682_v40, %v11306_v26 }
 0x109   : > { %v9716_v49 = vpop.f32.mrb[16].mxu1  ;;  %v1317_v56 = vmul.f32 %v1285_v39, %v11310_v28  ;;  %v9683_v59 = vpop.f32.mrb[18].mxu0  ;;  %v917_v61 = vpack.c.bf16 %v892_v47, %v891_v43  ;;  %v785_v27 = vadd.f32 %v11306_v26, %v784_v50  ;;  %v11430_v28 = vld [vmem:[#allocation2 + $0x48] sm:$0xff] }
 0x10a   : > { %v1209_v57 = vpop.f32.mrb[17].mxu1  ;;  %v1343_v60 = vpack.c.bf16 %v1319_v45, %v1318_v42  ;;  %v787_v20 = vpop.f32.mrb[19].mxu0  ;;  %v11423_v63 = vld [vmem:[#allocation2 + $0x40] sm:$0xff]  ;;  %934 = vst.msk [vmem:[#allocation2 + $0x58] sm:$0xff] %vm307_vm0, %v918_v54  ;;  %v1218_v0 = vadd.f32 %v9716_v49, %v11306_v26  ;;  %v865_v1 = vmax.f32 %v793_v62, 0.0  ;;  %v796_v3 = vadd.f32 %v9683_v59, %v11306_v26 }
 0x10b   : > { %v9717_v53 = vpop.f32.mrb[18].mxu1  ;;  %v1342_v58 = vpack.c.bf16 %v1317_v56, %v1316_v51  ;;  %9744 = vmatprep.mubr.msk.bf16.mxu0 %vm307_vm0, %v11423_v63  ;;  %933 = vst.msk [vmem:[#allocation2 + $0x50] sm:$0xff] %vm307_vm0, %v917_v61  ;;  %v1210_v25 = vadd.f32 %v11306_v26, %v1209_v57  ;;  %v863_v22 = vmax.f32 %v785_v27, 0.0  ;;  %v788_v21 = vadd.f32 %v11306_v26, %v787_v20 }
 0x10c   : > { %v1212_v24 = vpop.f32.mrb[19].mxu1  ;;  %1359 = vst.msk [vmem:[#allocation2 + $0xd8] sm:$0xff] %vm307_vm0, %v1343_v60  ;;  %9745 = vmatmul.mubr.msk.bf16.gmra.mrb[44].mxu0 %vm307_vm0, %v11430_v28  ;;  %v1290_v4 = vmax.f32 %v1218_v0, 0.0  ;;  %v1221_v23 = vadd.f32 %v9717_v53, %v11306_v26  ;;  %v866_v19 = vmax.f32 %v796_v3, 0.0  ;;  %v897_v32 = vmul.f32 %v865_v1, %v11378_v41  ;;  %v11466_v0 = vpop.permute.xlu0 %473 }
 0x10d   : > { %1358 = vst.msk [vmem:[#allocation2 + $0xd0] sm:$0xff] %vm307_vm0, %v1342_v58  ;;  %v1288_v8 = vmax.f32 %v1210_v25, 0.0  ;;  %v1213_v29 = vadd.f32 %v11306_v26, %v1212_v24  ;;  %v864_v14 = vmax.f32 %v788_v21, 0.0  ;;  %v895_v40 = vmul.f32 %v863_v22, %v11341_v48  ;;  %v11471_v3 = vpop.permute.xlu1 %478 }
 0x10e   : > { %v1291_v31 = vmax.f32 %v1221_v23, 0.0  ;;  %v898_v33 = vmul.f32 %v866_v19, %v11382_v46  ;;  %v1322_v39 = vmul.f32 %v1290_v4, %v11378_v41 }
 0x10f   : > { %v9686_v17 = vpop.f32.mrb[20].mxu0  ;;  %v1289_v34 = vmax.f32 %v1213_v29, 0.0  ;;  %v896_v43 = vmul.f32 %v864_v14, %v11347_v55  ;;  %v1320_v49 = vmul.f32 %v1288_v8, %v11341_v48 }
 0x110   : > { %v800_v38 = vpop.f32.mrb[21].mxu0  ;;  %v1323_v42 = vmul.f32 %v1291_v31, %v11382_v46  ;;  %v920_v50 = vpack.c.bf16 %v898_v33, %v897_v32  ;;  %v809_v60 = vadd.f32 %v9686_v17, %v11306_v26 }
 0x111   : > { %v9720_v37 = vpop.f32.mrb[20].mxu1  ;;  %v9687_v47 = vpop.f32.mrb[22].mxu0  ;;  %v1321_v51 = vmul.f32 %v1289_v34, %v11347_v55  ;;  %v919_v59 = vpack.c.bf16 %v896_v43, %v895_v40  ;;  %v801_v53 = vadd.f32 %v11306_v26, %v800_v38  ;;  %v11458_v48 = vld [vmem:[#allocation2 + $0x58] sm:$0xff] }
 0x112   : > { %v1225_v45 = vpop.f32.mrb[21].mxu1  ;;  %v803_v56 = vpop.f32.mrb[23].mxu0  ;;  %v1345_v57 = vpack.c.bf16 %v1323_v42, %v1322_v39  ;;  %v11451_v61 = vld [vmem:[#allocation2 + $0x50] sm:$0xff]  ;;  %936 = vst.msk [vmem:[#allocation2 + $0x68] sm:$0xff] %vm307_vm0, %v920_v50  ;;  %v1234_v62 = vadd.f32 %v9720_v37, %v11306_v26  ;;  %v869_v55 = vmax.f32 %v809_v60, 0.0  ;;  %v812_v58 = vadd.f32 %v9687_v47, %v11306_v26 }
 0x113   : > { %v9721_v54 = vpop.f32.mrb[22].mxu1  ;;  %v1344_v46 = vpack.c.bf16 %v1321_v51, %v1320_v49  ;;  %9748 = vmatprep.mubr.msk.bf16.mxu0 %vm307_vm0, %v11451_v61  ;;  %935 = vst.msk [vmem:[#allocation2 + $0x60] sm:$0xff] %vm307_vm0, %v919_v59  ;;  %v1226_v20 = vadd.f32 %v11306_v26, %v1225_v45  ;;  %v867_v24 = vmax.f32 %v801_v53, 0.0  ;;  %v804_v25 = vadd.f32 %v11306_v26, %v803_v56  ;;  %v489_v60 = vpop.permute.xlu1 %488 }
 0x114   : > { %v1228_v41 = vpop.f32.mrb[23].mxu1  ;;  %1361 = vst.msk [vmem:[#allocation2 + $0xe8] sm:$0xff] %vm307_vm0, %v1345_v57  ;;  %9749 = vmatmul.mubr.msk.bf16.gmra.mrb[48].mxu0 %vm307_vm0, %v11458_v48  ;;  %v1294_v27 = vmax.f32 %v1234_v62, 0.0  ;;  %v1237_v1 = vadd.f32 %v9721_v54, %v11306_v26  ;;  %v870_v22 = vmax.f32 %v812_v58, 0.0  ;;  %v901_v14 = vmul.f32 %v869_v55, %v464_v7 }
 0x115   : > { %1360 = vst.msk [vmem:[#allocation2 + $0xe0] sm:$0xff] %vm307_vm0, %v1344_v46  ;;  %v1292_v4 = vmax.f32 %v1226_v20, 0.0  ;;  %v1229_v23 = vadd.f32 %v11306_v26, %v1228_v41  ;;  %v868_v19 = vmax.f32 %v804_v25, 0.0  ;;  %v899_v38 = vmul.f32 %v867_v24, %v11410_v16 }
 0x116   : > { %v1295_v8 = vmax.f32 %v1237_v1, 0.0  ;;  %v902_v17 = vmul.f32 %v870_v22, %v469_v30  ;;  %v1326_v37 = vmul.f32 %v1294_v27, %v464_v7 }
 0x117   : > { %v9690_v21 = vpop.f32.mrb[24].mxu0  ;;  %v1293_v32 = vmax.f32 %v1229_v23, 0.0  ;;  %v900_v40 = vmul.f32 %v868_v19, %v11412_v36  ;;  %v1324_v45 = vmul.f32 %v1292_v4, %v11410_v16 }
 0x118   : > { %v816_v31 = vpop.f32.mrb[25].mxu0  ;;  %v1327_v39 = vmul.f32 %v1295_v8, %v469_v30  ;;  %v922_v47 = vpack.c.bf16 %v902_v17, %v901_v14  ;;  %v825_v56 = vadd.f32 %v9690_v21, %v11306_v26 }
 0x119   : > { %v9724_v29 = vpop.f32.mrb[24].mxu1  ;;  %v9691_v34 = vpop.f32.mrb[26].mxu0  ;;  %v1325_v49 = vmul.f32 %v1293_v32, %v11412_v36  ;;  %v921_v54 = vpack.c.bf16 %v900_v40, %v899_v38  ;;  %v817_v59 = vadd.f32 %v11306_v26, %v816_v31  ;;  %v11486_v16 = vld [vmem:[#allocation2 + $0x68] sm:$0xff] }
 0x11a   : > { %v1241_v33 = vpop.f32.mrb[25].mxu1  ;;  %v819_v43 = vpop.f32.mrb[27].mxu0  ;;  %v1347_v51 = vpack.c.bf16 %v1327_v39, %v1326_v37  ;;  %v11479_v57 = vld [vmem:[#allocation2 + $0x60] sm:$0xff]  ;;  %938 = vst.msk [vmem:[#allocation2 + $0x78] sm:$0xff] %vm307_vm0, %v922_v47  ;;  %v1250_v30 = vadd.f32 %v9724_v29, %v11306_v26  ;;  %v873_v41 = vmax.f32 %v825_v56, 0.0  ;;  %v828_v62 = vadd.f32 %v9691_v34, %v11306_v26 }
 0x11b   : > { %v9725_v42 = vpop.f32.mrb[26].mxu1  ;;  %v1346_v7 = vpack.c.bf16 %v1325_v49, %v1324_v45  ;;  %9752 = vmatprep.mubr.msk.bf16.mxu0 %vm307_vm0, %v11479_v57  ;;  %v484_v36 = vpop.permute.xlu0 %483  ;;  %937 = vst.msk [vmem:[#allocation2 + $0x70] sm:$0xff] %vm307_vm0, %v921_v54  ;;  %v1242_v46 = vadd.f32 %v11306_v26, %v1241_v33  ;;  %v871_v55 = vmax.f32 %v817_v59, 0.0  ;;  %v820_v58 = vadd.f32 %v11306_v26, %v819_v43  ;;  %v1368_v40 = vld [vmem:[#allocation2 + $0x8] sm:$0x80] }
 0x11c   : > { %v1244_v50 = vpop.f32.mrb[27].mxu1  ;;  %1363 = vst.msk [vmem:[#allocation2 + $0xf8] sm:$0xff] %vm307_vm0, %v1347_v51  ;;  %9753 = vmatmul.mubr.msk.bf16.gmra.mrb[52].mxu0 %vm307_vm0, %v11486_v16  ;;  %v1298_v53 = vmax.f32 %v1250_v30, 0.0  ;;  %v1253_v20 = vadd.f32 %v9725_v42, %v11306_v26  ;;  %v874_v1 = vmax.f32 %v828_v62, 0.0  ;;  %v905_v29 = vmul.f32 %v873_v41, %v484_v36  ;;  %v499_v43 = vpop.permute.xlu1 %498 }
 0x11d   : > { %1362 = vst.msk [vmem:[#allocation2 + $0xf0] sm:$0xff] %vm307_vm0, %v1346_v7  ;;  %v1296_v24 = vmax.f32 %v1242_v46, 0.0  ;;  %v1245_v25 = vadd.f32 %v11306_v26, %v1244_v50  ;;  %v872_v21 = vmax.f32 %v820_v58, 0.0  ;;  %v903_v34 = vmul.f32 %v871_v55, %v11466_v0 }
 0x11e   : > { %v1299_v23 = vmax.f32 %v1253_v20, 0.0  ;;  %v906_v31 = vmul.f32 %v874_v1, %v489_v60  ;;  %v1330_v33 = vmul.f32 %v1298_v53, %v484_v36  ;;  %v11504_v50 = vrot.slane %v1606_v44, 7 }
 0x11f   : > { %v9694_v27 = vpop.f32.mrb[28].mxu0  ;;  %v1297_v14 = vmax.f32 %v1245_v25, 0.0  ;;  %v904_v38 = vmul.f32 %v872_v21, %v11471_v3  ;;  %v494_v42 = vpop.permute.xlu0 %493  ;;  %v1328_v45 = vmul.f32 %v1296_v24, %v11466_v0  ;;  %v1603_v44 = vshrl.u32 %v1368_v40, 16 }
 0x120   : > { %v832_v22 = vpop.f32.mrb[29].mxu0  ;;  %v1331_v37 = vmul.f32 %v1299_v23, %v489_v60  ;;  %v924_v47 = vpack.c.bf16 %v906_v31, %v905_v29  ;;  %v841_v56 = vadd.f32 %v9694_v27, %v11306_v26  ;;  %v509_v1 = vpop.permute.xlu1 %508  ;;  %v1611_v25 = vor.u32 %v1609_v52, %v11504_v50 }
 0x121   : > { %v9728_v4 = vpop.f32.mrb[28].mxu1  ;;  %v9695_v19 = vpop.f32.mrb[30].mxu0  ;;  %v1329_v49 = vmul.f32 %v1297_v14, %v11471_v3  ;;  %v923_v54 = vpack.c.bf16 %v904_v38, %v903_v34  ;;  %v833_v0 = vadd.f32 %v11306_v26, %v832_v22  ;;  %v11514_v3 = vld [vmem:[#allocation2 + $0x78] sm:$0xff]  ;;  %v1605_v23 = vrot.slane %v1603_v44, 7 }
 0x122   : > { %v1257_v8 = vpop.f32.mrb[29].mxu1  ;;  %v835_v32 = vpop.f32.mrb[31].mxu0  ;;  %v1349_v51 = vpack.c.bf16 %v1331_v37, %v1330_v33  ;;  %v11507_v7 = vld [vmem:[#allocation2 + $0x70] sm:$0xff]  ;;  %940 = vst.msk [vmem:[#allocation2 + $0x88] sm:$0xff] %vm307_vm0, %v924_v47  ;;  %v1266_v59 = vadd.f32 %v9728_v4, %v11306_v26  ;;  %13561 = vst [vmem:[#allocation4_spill] sm:$0xff] %v11514_v3  ;;  %v877_v36 = vmax.f32 %v841_v56, 0.0  ;;  %v844_v41 = vadd.f32 %v9695_v19, %v11306_v26 }
 0x123   : > { %v9729_v17 = vpop.f32.mrb[30].mxu1  ;;  %13560 = vst [vmem:[#allocation3_spill] sm:$0xff] %v11507_v7  ;;  %v1348_v30 = vpack.c.bf16 %v1329_v49, %v1328_v45  ;;  %9756 = vmatprep.mubr.msk.bf16.mxu0 %vm307_vm0, %v11507_v7  ;;  %939 = vst.msk [vmem:[#allocation2 + $0x80] sm:$0xff] %vm307_vm0, %v923_v54  ;;  %v1258_v60 = vadd.f32 %v11306_v26, %v1257_v8  ;;  %v875_v62 = vmax.f32 %v833_v0, 0.0  ;;  %v504_v24 = vpop.permute.xlu0 %503  ;;  %v13480_v21 = vshrl.u32 %v11364_v11, 16 }
 0x124   : > { %v1260_v39 = vpop.f32.mrb[31].mxu1  ;;  %1365 = vst.msk [vmem:[#allocation2 + $0x108] sm:$0xff] %vm307_vm0, %v1349_v51  ;;  %9757 = vmatmul.mubr.msk.bf16.gmra.mrb[56].mxu0 %vm307_vm0, %v11514_v3  ;;  %v1302_v46 = vmax.f32 %v1266_v59, 0.0  ;;  %v1269_v53 = vadd.f32 %v9729_v17, %v11306_v26  ;;  %v836_v55 = vadd.f32 %v11306_v26, %v835_v32  ;;  %v878_v58 = vmax.f32 %v844_v41, 0.0  ;;  %v11566_v56 = vld [vmem:[%s13469_s4 + $0x6] sm:$0x3] }
 0x125   : > { %1364 = vst.msk [vmem:[#allocation2 + $0x100] sm:$0xff] %vm307_vm0, %v1348_v30  ;;  %v1300_v20 = vmax.f32 %v1258_v60, 0.0  ;;  %v1261_v27 = vadd.f32 %v11306_v26, %v1260_v39  ;;  %v909_v8 = vmul.f32 %v877_v36, %v504_v24  ;;  %v907_v14 = vmul.f32 %v875_v62, %v494_v42 }
 0x126   : > { %v1303_v4 = vmax.f32 %v1269_v53, 0.0  ;;  %v876_v22 = vmax.f32 %v836_v55, 0.0  ;;  %v910_v19 = vmul.f32 %v878_v58, %v509_v1  ;;  %v1334_v31 = vmul.f32 %v1302_v46, %v504_v24 }
 0x127   : > { %v1301_v29 = vmax.f32 %v1261_v27, 0.0  ;;  %v1332_v33 = vmul.f32 %v1300_v20, %v494_v42  ;;  %v1612_v52 = vsel %vm1601_vm4, %v1605_v23, %v1611_v25  ;;  %v1615_v39 = vrot.slane %v1613_v10, 7 }
 0x128   : > { %v1335_v17 = vmul.f32 %v1303_v4, %v509_v1  ;;  %v908_v32 = vmul.f32 %v876_v22, %v499_v43  ;;  %v926_v26 = vpack.c.bf16 %v910_v19, %v909_v8  ;;  %v1622_v42 = vrot.slane %v13480_v21, 7 }
 0x129   : > { %v1333_v34 = vmul.f32 %v1301_v29, %v499_v43  ;;  %v11538_v45 = vld [vmem:[#allocation2 + $0x88] sm:$0xff]  ;;  %v1618_v10 = vor.u32 %v1616_v9, %v1615_v39  ;;  %v13485_v43 = vshll.u32 %v11364_v11, 16  ;;  %v13477_v47 = vshrl.u32 %v11372_v35, 16 }
 0x12a   : > { %v1351_v37 = vpack.c.bf16 %v1335_v17, %v1334_v31  ;;  %v925_v38 = vpack.c.bf16 %v908_v32, %v907_v14  ;;  %v11530_v5 = vld [vmem:[#allocation2 + $0x80] sm:$0xff]  ;;  %942 = vst.msk [vmem:[#allocation2 + $0x98] sm:$0xff] %vm307_vm0, %v926_v26  ;;  %v13476_v51 = vshrl.u32 %v11394_v18, 16  ;;  %v13474_v0 = vshrl.u32 %v11402_v15, 16 }
 0x12b   : > { %v1350_v40 = vpack.c.bf16 %v1333_v34, %v1332_v33  ;;  %9760 = vmatprep.mubr.msk.bf16.mxu0 %vm307_vm0, %v11530_v5  ;;  %v11554_v49 = vor.u32 %v13485_v43, %v1622_v42  ;;  %v1619_v54 = vsel %vm1601_vm4, %v11504_v50, %v1618_v10  ;;  %v1629_v9 = vrot.slane %v13477_v47, 7 }
 0x12c   : > { %1367 = vst.msk [vmem:[#allocation2 + $0x118] sm:$0xff] %vm307_vm0, %v1351_v37  ;;  %941 = vst.msk [vmem:[#allocation2 + $0x90] sm:$0xff] %vm307_vm0, %v925_v38  ;;  %9761 = vmatmul.mubr.msk.bf16.gmra.mrb[60].mxu0 %vm307_vm0, %v11538_v45  ;;  %v1636_v30 = vrot.slane %v13476_v51, 7  ;;  %v13479_v50 = vshll.u32 %v11372_v35, 16  ;;  %v1648_v44 = vshrl.u32 %v11423_v63, 16  ;;  %v1655_v36 = vshrl.u32 %v11430_v28, 16 }
 0x12d   : > { %1366 = vst.msk [vmem:[#allocation2 + $0x110] sm:$0xff] %vm307_vm0, %v1350_v40  ;;  %9766 = vmatprep.mubr.msk.bf16.mxu0 %vm307_vm0, %v1612_v52  ;;  %v1626_v59 = vsel %vm1601_vm4, %v1615_v39, %v11554_v49  ;;  %v1662_v41 = vshrl.u32 %v11451_v61, 16  ;;  %v1643_v62 = vrot.slane %v13474_v0, 7  ;;  %v1669_v58 = vshrl.u32 %v11458_v48, 16 }
 0x12e   : > { %v1632_v60 = vor.u32 %v13479_v50, %v1629_v9  ;;  %v1639_v46 = vor.u32 %v13478_v13, %v1636_v30  ;;  %v1650_v53 = vrot.slane %v1648_v44, 7  ;;  %v11588_v55 = vrot.slane %v1655_v36, 7 }
 0x12f   : > { %v11590_v20 = vrot.slane %v1662_v41, 7  ;;  %v13475_v24 = vshll.u32 %v11402_v15, 16  ;;  %v1651_v1 = vshll.u32 %v11423_v63, 16  ;;  %v1658_v25 = vshll.u32 %v11430_v28, 16 }
 0x130   : > { %v11594_v27 = vsel %vm1601_vm4, %v1622_v42, %v1632_v60  ;;  %v11602_v4 = vsel %vm1601_vm4, %v1629_v9, %v1639_v46  ;;  %v1665_v22 = vshll.u32 %v11451_v61, 16  ;;  %v11611_v28 = vrot.slane %v1669_v58, 7 }
 0x131   : > { %v1646_v23 = vor.u32 %v13475_v24, %v1643_v62  ;;  %v1653_v8 = vor.u32 %v1651_v1, %v1650_v53  ;;  %v1660_v19 = vor.u32 %v1658_v25, %v11588_v55  ;;  %v1672_v29 = vshll.u32 %v11458_v48, 16 }
 0x132   : > { %v1667_v63 = vor.u32 %v1665_v22, %v11590_v20  ;;  %v1676_v31 = vshrl.u32 %v11479_v57, 16  ;;  %v1679_v14 = vshll.u32 %v11479_v57, 16  ;;  %v1683_v17 = vshrl.u32 %v11486_v16, 16 }
 0x133   : > { %v1686_v32 = vshll.u32 %v11486_v16, 16  ;;  %v1690_v33 = vshrl.u32 %v11507_v7, 16  ;;  %v1693_v26 = vshll.u32 %v11507_v7, 16  ;;  %v1697_v34 = vshrl.u32 %v11514_v3, 16  ;;  %v11622_v38 = vld [vmem:[#allocation2 + $0x90] sm:$0xff] }
 0x134   : > { %9767 = vmatmul.mubr.msk.bf16.vlgmr.msra.gmra.mrb[32].mxu0 %vm307_vm0, %v1619_v54  ;;  %v13490_v37 = vshll.u32 %v11514_v3, 16  ;;  %v11624_v52 = vrot.slane %v1651_v1, 1  ;;  %v1704_v39 = vshrl.u32 %v11530_v5, 16  ;;  %v13488_v40 = vshll.u32 %v11530_v5, 16  ;;  %v11630_v54 = vld [vmem:[#allocation2 + $0x98] sm:$0xff] }
 0x135   : > { %9799 = vmatpush3.bf16.msra.mxu0 %v2131_v6  ;;  %9770 = vmatprep.mubr.msk.bf16.mxu0 %vm307_vm0, %v1626_v59  ;;  %v13487_v42 = vshrl.u32 %v11538_v45, 16  ;;  %v13486_v10 = vshll.u32 %v11538_v45, 16  ;;  %v11633_v6 = vsel %vm1601_vm4, %v1636_v30, %v1646_v23  ;;  %v11636_v9 = vsel %vm1601_vm4, %v1643_v62, %v1653_v8 }
 0x136   : > { %10925 = vmatprep.subr.msk.bf16.mxu0 %vm1436_vm2, %v11566_v56  ;;  %v3012_v59 = vrot.slane %v1658_v25, 1  ;;  %v11641_v60 = vsel %vm1601_vm4, %v1650_v53, %v1660_v19  ;;  %v13484_v46 = vshrl.u32 %v11622_v38, 16  ;;  %v13483_v1 = vshll.u32 %v11622_v38, 16 }
 0x137   : > { %v13482_v30 = vshrl.u32 %v11630_v54, 16  ;;  %v3008_v23 = vor.u32 %v11624_v52, %v1648_v44  ;;  %v3020_v62 = vrot.slane %v1665_v22, 1  ;;  %v3028_v25 = vrot.slane %v1672_v29, 1 }
 0x138   : > { %v13481_v8 = vshll.u32 %v11630_v54, 16  ;;  %v3016_v0 = vor.u32 %v3012_v59, %v1655_v36  ;;  %v3036_v53 = vrot.slane %v1679_v14, 1  ;;  %v3044_v19 = vrot.slane %v1686_v32, 1 }
 0x139   : > { %v11657_v24 = vsel %vm1949_vm3, %v3008_v23, %v3012_v59  ;;  %v3024_v51 = vor.u32 %v3020_v62, %v1662_v41  ;;  %v3032_v47 = vor.u32 %v3028_v25, %v1669_v58  ;;  %v3052_v44 = vrot.slane %v1693_v26, 1 }
 0x13a   : > { %v11662_v22 = vsel %vm1949_vm3, %v3016_v0, %v3020_v62  ;;  %v3040_v13 = vor.u32 %v3036_v53, %v1676_v31  ;;  %v3048_v36 = vor.u32 %v3044_v19, %v1683_v17  ;;  %v3060_v50 = vrot.slane %v13490_v37, 1 }
 0x13b   : > { %v11669_v21 = vsel %vm1949_vm3, %v3024_v51, %v3028_v25  ;;  %v11672_v59 = vsel %vm1949_vm3, %v3032_v47, %v3036_v53  ;;  %v3056_v41 = vor.u32 %v3052_v44, %v1690_v33  ;;  %v3068_v58 = vrot.slane %v13488_v40, 1 }
 0x13c   : > { %9771 = vmatmul.mubr.msk.bf16.gmra.mrb[36].mxu0 %vm307_vm0, %v11594_v27  ;;  %v11677_v0 = vsel %vm1949_vm3, %v3040_v13, %v3044_v19  ;;  %v11680_v23 = vsel %vm1949_vm3, %v3048_v36, %v3052_v44  ;;  %v3064_v62 = vor.u32 %v3060_v50, %v1697_v34  ;;  %v3076_v51 = vrot.slane %v13486_v10, 1 }
 0x13d   : > { %9774 = vmatprep.mubr.msk.bf16.mxu0 %vm307_vm0, %v11602_v4  ;;  %v11687_v25 = vsel %vm1949_vm3, %v3056_v41, %v3060_v50  ;;  %v3072_v47 = vor.u32 %v3068_v58, %v1704_v39  ;;  %v11693_v53 = vrot.slane %v13483_v1, 1  ;;  %v3092_v13 = vrot.slane %v13481_v8, 1  ;;  %v11712_v41 = vld [vmem:[#allocation2 + $0x38] sm:$0xff] }
 0x13e   : > { %v1678_v19 = vrot.slane %v1676_v31, 7  ;;  %v11701_v44 = vsel %vm1601_vm4, %v11588_v55, %v1667_v63  ;;  %v11704_v50 = vsel %vm1949_vm3, %v3064_v62, %v3068_v58  ;;  %v11708_v36 = vor.u32 %v3076_v51, %v13487_v42  ;;  %13563 = vst [vmem:[#allocation6_spill] sm:$0xff] %v11712_v41  ;;  %v11724_v58 = vld [vmem:[#allocation2 + $0x30] sm:$0xff] }
 0x13f   : > { %13562 = vst [vmem:[#allocation5_spill] sm:$0xff] %v11693_v53  ;;  %v11715_v31 = vsel %vm1949_vm3, %v3072_v47, %v3076_v51  ;;  %v3088_v55 = vor.u32 %v11693_v53, %v13484_v46  ;;  %v11722_v63 = vor.u32 %v3092_v13, %v13482_v30  ;;  %13564 = vst [vmem:[#allocation7_spill] sm:$0xff] %v11724_v58  ;;  %v1685_v30 = vrot.slane %v1683_v17, 7 }
 0x140   : > { %v11729_v62 = vsel %vm1949_vm3, %v11708_v36, %v11693_v53  ;;  %v1674_v51 = vor.u32 %v1672_v29, %v11611_v28  ;;  %v1681_v8 = vor.u32 %v1679_v14, %v1678_v19  ;;  %v11741_v1 = vrot.slane %v1690_v33, 7  ;;  %v11749_v29 = vld [vmem:[#allocation2 + $0x40] sm:$0xff] }
 0x141   : > { %13565 = vst [vmem:[#allocation8_spill] sm:$0xff] %v11729_v62  ;;  %v11735_v47 = vsel %vm1949_vm3, %v3088_v55, %v3092_v13  ;;  %v13489_v46 = vshll.u32 %v11712_v41, 16  ;;  %v13492_v43 = vshll.u32 %v11724_v58, 16  ;;  %13567 = vst [vmem:[#allocation10_spill] sm:$0xff] %v11749_v29  ;;  %v11751_v13 = vld [vmem:[#allocation2 + $0x48] sm:$0xff]  ;;  %v11753_v55 = vld [vmem:[#allocation2 + $0x50] sm:$0xff]  ;;  %v1688_v14 = vor.u32 %v1686_v32, %v1685_v30 }
 0x142   : > { %13566 = vst [vmem:[#allocation9_spill] sm:$0xff] %v11735_v47  ;;  %v11747_v10 = vsel %vm1601_vm4, %v11590_v20, %v1674_v51  ;;  %13568 = vst [vmem:[#allocation11_spill] sm:$0xff] %v11751_v13  ;;  %v11760_v17 = vor.u32 %v1693_v26, %v11741_v1  ;;  %v11766_v20 = vsel %vm1601_vm4, %v11611_v28, %v1681_v8  ;;  %v11770_v51 = vld [vmem:[#allocation2 + $0x58] sm:$0xff]  ;;  %v11782_v8 = vld [vmem:[#allocation2 + $0x60] sm:$0xff]  ;;  %v1699_v37 = vrot.slane %v1697_v34, 7 }
 0x143   : > { %13569 = vst [vmem:[#allocation12_spill] sm:$0xff] %v11753_v55  ;;  %v2996_v33 = vrot.slane %v13489_v46, 1  ;;  %13571 = vst [vmem:[#allocation14_spill] sm:$0xff] %v11770_v51  ;;  %v11776_v32 = vrot.slane %v13492_v43, 1  ;;  %v11784_v46 = vld [vmem:[#allocation2 + $0x68] sm:$0xff]  ;;  %v1706_v53 = vrot.slane %v1704_v39, 7  ;;  %v11793_v42 = vsel %vm1601_vm4, %v1678_v19, %v1688_v14 }
 0x144   : > { %9775 = vmatmul.mubr.msk.bf16.gmra.mrb[40].mxu0 %vm307_vm0, %v11633_v6  ;;  %13570 = vst [vmem:[#allocation13_spill] sm:$0xff] %v11760_v17  ;;  %v11797_v28 = vsel %vm1601_vm4, %v1685_v30, %v11760_v17  ;;  %v13573_v40 = vshrl.u32 %v11712_v41, 16  ;;  %v13575_v19 = vshrl.u32 %v11724_v58, 16  ;;  %v13576_v30 = vshll.u32 %v11749_v29, 16 }
 0x145   : > { %9778 = vmatprep.mubr.msk.bf16.mxu0 %vm307_vm0, %v11636_v9  ;;  %13572 = vst [vmem:[#allocation15_spill] sm:$0xff] %v11776_v32  ;;  %v13578_v34 = vshll.u32 %v11753_v55, 16  ;;  %v13583_v39 = vshrl.u32 %v11751_v13, 16 }
 0x146   : > { %v11801_v47 = vor.u32 %v13573_v40, %v2996_v33  ;;  %v3996_v14 = vor.u32 %v13575_v19, %v11776_v32  ;;  %v4008_v17 = vrot.slane %v13576_v30, 1  ;;  %v13577_v40 = vshll.u32 %v11751_v13, 16  ;;  %v11826_v30 = vld [vmem:[#allocation2 + $0xa0] sm:$0xff] }
 0x147   : > { %v4024_v7 = vrot.slane %v13578_v34, 1  ;;  %v13580_v19 = vshll.u32 %v11770_v51, 16  ;;  %v13582_v34 = vshrl.u32 %v11749_v29, 16  ;;  %v13585_v32 = vshrl.u32 %v11770_v51, 16 }
 0x148   : > { %13574 = vst [vmem:[#allocation16_spill] sm:$0xff] %v11801_v47  ;;  %v4016_v41 = vrot.slane %v13577_v40, 1  ;;  %v11820_v43 = vsel %vm1949_vm3, %v3996_v14, %v2996_v33  ;;  %v11830_v40 = vsel %vm1949_vm3, %v11801_v47, %v4008_v17  ;;  %v13584_v33 = vshrl.u32 %v11753_v55, 16 }
 0x149   : > { %13579 = vst [vmem:[#allocation17_spill] sm:$0xff] %v11820_v43  ;;  %v4032_v58 = vrot.slane %v13580_v19, 1  ;;  %13581 = vst [vmem:[#allocation18_spill] sm:$0xff] %v11830_v40  ;;  %v4012_v62 = vor.u32 %v4008_v17, %v13582_v34  ;;  %v11841_v43 = vld [vmem:[#allocation2 + $0xa8] sm:$0xff]  ;;  %v13586_v40 = vshll.u32 %v11782_v8, 16  ;;  %v13587_v17 = vshll.u32 %v11784_v46, 16 }
 0x14a   : > { %v4020_v26 = vor.u32 %v4016_v41, %v13583_v39  ;;  %v4028_v14 = vor.u32 %v4024_v7, %v13584_v33  ;;  %v13588_v39 = vshll.u32 %v11514_v3, 16  ;;  %v13590_v3 = vshrl.u32 %v11784_v46, 16 }
 0x14b   : > { %v4036_v47 = vor.u32 %v4032_v58, %v13585_v32  ;;  %v4040_v29 = vrot.slane %v13586_v40, 1  ;;  %v4048_v34 = vrot.slane %v13587_v17, 1  ;;  %v11852_v33 = vsel %vm1949_vm3, %v4012_v62, %v4016_v41 }
 0x14c   : > { %9779 = vmatmul.mubr.msk.bf16.gmra.mrb[44].mxu0 %vm307_vm0, %v11641_v60  ;;  %v1702_v55 = vor.u32 %v13588_v39, %v1699_v37  ;;  %v11855_v13 = vsel %vm1949_vm3, %v4020_v26, %v4024_v7  ;;  %v11858_v19 = vsel %vm1949_vm3, %v4028_v14, %v4032_v58  ;;  %v13514_v32 = vshll.u32 %v11826_v30, 16 }
 0x14d   : > { %9782 = vmatprep.mubr.msk.bf16.mxu0 %vm307_vm0, %v11701_v44  ;;  %v11862_v51 = vsel %vm1949_vm3, %v4036_v47, %v4040_v29  ;;  %v13589_v40 = vshrl.u32 %v11782_v8, 16  ;;  %v11868_v39 = vor.u32 %v4048_v34, %v13590_v3  ;;  %v13592_v41 = vshll.u32 %v11530_v5, 16 }
 0x14e   : > { %v13512_v7 = vshll.u32 %v11841_v43, 16  ;;  %v13593_v26 = vshrl.u32 %v11538_v45, 16  ;;  %v11882_v47 = vsel %vm1601_vm4, %v11741_v1, %v1702_v55  ;;  %v4104_v3 = vrot.slane %v13514_v32, 1 }
 0x14f   : > { %v4044_v17 = vor.u32 %v4040_v29, %v13589_v40  ;;  %13591 = vst [vmem:[#allocation19_spill] sm:$0xff] %v11868_v39  ;;  %v1709_v62 = vor.u32 %v13592_v41, %v1706_v53  ;;  %v13515_v29 = vshrl.u32 %v11826_v30, 16  ;;  %v13595_v41 = vshll.u32 %v11538_v45, 16 }
 0x150   : > { %v11878_v14 = vrot.slane %v13593_v26, 7 }
 0x151   : > { %v11874_v58 = vsel %vm1949_vm3, %v4044_v17, %v4048_v34  ;;  %v11890_v40 = vsel %vm1601_vm4, %v1699_v37, %v1709_v62  ;;  %v13513_v34 = vshrl.u32 %v11841_v43, 16  ;;  %v4112_v17 = vrot.slane %v13512_v7, 1 }
 0x152   : > { %v4108_v1 = vor.u32 %v4104_v3, %v13515_v29  ;;  %v1716_v37 = vor.u32 %v13595_v41, %v11878_v14  ;;  %v11908_v62 = vsel %vm1949_vm3, %v11722_v63, %v4104_v3  ;;  %v13599_v41 = vshrl.u32 %v11364_v11, 16 }
 0x153   : > { %v11901_v55 = vor.u32 %v4112_v17, %v13513_v34  ;;  %13596 = vst [vmem:[#allocation21_spill] sm:$0xff] %v11908_v62  ;;  %v13598_v34 = vshll.u32 %v11364_v11, 16  ;;  %v13601_v11 = vshll.u32 %v11394_v18, 16 }
 0x154   : > { %9783 = vmatmul.mubr.msk.bf16.gmra.mrb[48].mxu0 %vm307_vm0, %v11747_v10  ;;  %v11911_v26 = vsel %vm1949_vm3, %v4108_v1, %v4112_v17  ;;  %v11914_v7 = vsel %vm1601_vm4, %v1706_v53, %v1716_v37  ;;  %v13600_v17 = vshll.u32 %v11372_v35, 16  ;;  %v11933_v37 = vld [vmem:[%s13469_s4 + $0x8] sm:$0x3] }
 0x155   : > { %9786 = vmatprep.mubr.msk.bf16.mxu0 %vm307_vm0, %v11766_v20  ;;  %13594 = vst [vmem:[#allocation20_spill] sm:$0xff] %v11901_v55  ;;  %13597 = vst [vmem:[#allocation22_spill] sm:$0xff] %v11911_v26  ;;  %v1968_v32 = vrot.slane %v13598_v34, 1  ;;  %v2526_v55 = vsel %vm1436_vm2, %v11566_v56, 0  ;;  %v1984_v34 = vrot.slane %v13601_v11, 1  ;;  %v13603_v56 = vshrl.u32 %v11372_v35, 16 }
 0x156   : > { %v1976_v1 = vrot.slane %v13600_v17, 1  ;;  %v13604_v17 = vshrl.u32 %v11394_v18, 16  ;;  %v13605_v11 = vshll.u32 %v11402_v15, 16 }
 0x157   : > { %v1972_v29 = vor.u32 %v1968_v32, %v13599_v41  ;;  %v1969_v53 = vsel %vm1949_vm3, %v11278_v12, %v1968_v32  ;;  %v11939_v41 = vld [vmem:[#allocation2 + $0x98] sm:$0xff] }
 0x158   : > { %13602 = vst [vmem:[#allocation23_spill] sm:$0xff] %v11939_v41  ;;  %v13522_v12 = vshll.u32 %v11939_v41, 16  ;;  %v1980_v32 = vor.u32 %v1976_v1, %v13603_v56  ;;  %v1992_v26 = vrot.slane %v13605_v11, 1 }
 0x15c   : > { %9787 = vmatmul.mubr.msk.bf16.gmra.mrb[52].mxu0 %vm307_vm0, %v11793_v42 }
 0x15d   : > { %9790 = vmatprep.mubr.msk.bf16.mxu0 %vm307_vm0, %v11797_v28 }
 0x164   : > { %9791 = vmatmul.mubr.msk.bf16.gmra.mrb[56].mxu0 %vm307_vm0, %v11882_v47 }
 0x165   : > { %9794 = vmatprep.mubr.msk.bf16.mxu0 %vm307_vm0, %v11890_v40 }
 0x16c   : > { %9795 = vmatmul.mubr.msk.bf16.gmra.mrb[60].mxu0 %vm307_vm0, %v11914_v7 }
 0x16d   : > { %9800 = vmatprep.mubr.msk.bf16.mxu0 %vm307_vm0, %v11357_v2  ;;  %v1977_v2 = vsel %vm1949_vm3, %v1972_v29, %v1976_v1  ;;  %v1985_v29 = vsel %vm1949_vm3, %v1980_v32, %v1984_v34  ;;  %v13608_v1 = vshrl.u32 %v11402_v15, 16  ;;  %v11971_v32 = vld [vmem:[#allocation2 + $0xa0] sm:$0xff] }
 0x16e   : > { %13609 = vst [vmem:[#allocation26_spill] sm:$0xff] %v11971_v32 }
 0x174   : > { %9801 = vmatmul.mubr.msk.bf16.vlgmr.msra.gmra.mrb[32].mxu0 %vm307_vm0, %v1969_v53  ;;  %v1988_v53 = vor.u32 %v1984_v34, %v13604_v17  ;;  %v1996_v34 = vor.u32 %v1992_v26, %v13608_v1  ;;  %v13520_v17 = vshll.u32 %v11971_v32, 16 }
 0x175   : > { %9833 = vmatpush3.bf16.msra.mxu0 %v2526_v55  ;;  %9804 = vmatprep.mubr.msk.bf16.mxu0 %vm307_vm0, %v1977_v2  ;;  %v13523_v55 = vshrl.u32 %v11939_v41, 16  ;;  %v11955_v2 = vrot.slane %v13522_v12, 1  ;;  %v12020_v12 = vld [vmem:[#allocation2 + $0x108] sm:$0xff] }
 0x176   : > { %10926 = vmatprep.subr.msk.bf16.mxu0 %vm1436_vm2, %v11933_v37  ;;  %v1993_v62 = vsel %vm1949_vm3, %v1988_v53, %v1992_v26  ;;  %v2001_v56 = vsel %vm1949_vm3, %v1996_v34, %v11624_v52  ;;  %v13521_v53 = vshrl.u32 %v11971_v32, 16  ;;  %v6559_v15 = vrot.slane %v13520_v17, 1  ;;  %v12000_v34 = vld [vmem:[#allocation2 + $0x110] sm:$0xff] }
 0x177   : > { %13606 = vst [vmem:[#allocation24_spill] sm:$0xff] %v11955_v2  ;;  %v5551_v35 = vor.u32 %v11955_v2, %v13523_v55  ;;  %13613 = vst [vmem:[#allocation30_spill] sm:$0xff] %v12000_v34  ;;  %v13539_v32 = vshll.u32 %v12020_v12, 16 }
 0x179   : > { %v11964_v18 = vsel %vm1949_vm3, %v5551_v35, %v4104_v3 }
 0x17a   : > { %13607 = vst [vmem:[#allocation25_spill] sm:$0xff] %v11964_v18  ;;  %v12033_v18 = vld [vmem:[#allocation2 + $0xb8] sm:$0xff] }
 0x17c   : > { %9805 = vmatmul.mubr.msk.bf16.gmra.mrb[36].mxu0 %vm307_vm0, %v1985_v29  ;;  %v6560_v29 = vor.u32 %v6559_v15, %v13521_v53  ;;  %v13524_v15 = vshll.u32 %v12000_v34, 16  ;;  %v12018_v53 = vld [vmem:[#allocation2 + $0xb0] sm:$0xff] }
 0x17d   : > { %9808 = vmatprep.mubr.msk.bf16.mxu0 %vm307_vm0, %v1993_v62  ;;  %v11975_v62 = vld [vmem:[#allocation2 + $0xa8] sm:$0xff] }
 0x17e   : > { %13610 = vst [vmem:[#allocation27_spill] sm:$0xff] %v11975_v62  ;;  %v13518_v3 = vshll.u32 %v11975_v62, 16  ;;  %v13519_v26 = vshrl.u32 %v11975_v62, 16  ;;  %v2326_v62 = vld [vmem:[#allocation2 + $0x18] sm:$0x80] }
 0x17f   : > { %v2346_v41 = vshrl.u32 %v2326_v62, 16  ;;  %v13543_v62 = vshrl.u32 %v12020_v12, 16 }
 0x180   : > { %v6564_v11 = vrot.slane %v13518_v3, 1 }
 0x182   : > { %v11992_v35 = vsel %vm1949_vm3, %v6560_v29, %v6564_v11  ;;  %v11996_v1 = vor.u32 %v6564_v11, %v13519_v26  ;;  %v13534_v29 = vshrl.u32 %v12000_v34, 16  ;;  %v6668_v11 = vrot.slane %v13524_v15, 1  ;;  %v12060_v34 = vld [vmem:[#allocation2 + $0x120] sm:$0xff] }
 0x183   : > { %13611 = vst [vmem:[#allocation28_spill] sm:$0xff] %v11992_v35  ;;  %v1946_v35 = vld [vmem:[#allocation2 + $0x90] sm:$0x1]  ;;  %v13545_v39 = vshll.u32 %v12060_v34, 16 }
 0x184   : > { %9809 = vmatmul.mubr.msk.bf16.gmra.mrb[40].mxu0 %vm307_vm0, %v2001_v56  ;;  %13612 = vst [vmem:[#allocation29_spill] sm:$0xff] %v11996_v1  ;;  %v12004_v56 = vld [vmem:[#allocation2 + $0x118] sm:$0xff]  ;;  %v6672_v55 = vor.u32 %v6668_v11, %v13534_v29  ;;  %v2078_v2 = vshll.u32 %v1946_v35, 16  ;;  %v13544_v29 = vshrl.u32 %v12018_v53, 16 }
 0x185   : > { %9812 = vmatprep.mubr.msk.bf16.mxu0 %vm307_vm0, %v11657_v24  ;;  %13614 = vst [vmem:[#allocation31_spill] sm:$0xff] %v12004_v56  ;;  %v13527_v3 = vshll.u32 %v12004_v56, 16  ;;  %v13533_v26 = vshrl.u32 %v12004_v56, 16 }
 0x186   : > { %v2080_v35 = vrot.slane %v2078_v2, 1 }
 0x187   : > { %v6676_v17 = vrot.slane %v13527_v3, 1  ;;  %v13538_v3 = vshll.u32 %v12018_v53, 16 }
 0x189   : > { %v12026_v15 = vor.u32 %v6676_v17, %v13533_v26  ;;  %v12029_v1 = vsel %vm1949_vm3, %v6672_v55, %v6676_v17  ;;  %v12039_v26 = vrot.slane %v13538_v3, 1  ;;  %v13542_v55 = vshll.u32 %v12033_v18, 16 }
 0x18a   : > { %13615 = vst [vmem:[#allocation32_spill] sm:$0xff] %v12029_v1  ;;  %v12044_v17 = vrot.slane %v13539_v32, 1  ;;  %v2348_v1 = vrot.slane %v2346_v41, 7 }
 0x18b   : > { %v12052_v56 = vrot.slane %v13542_v55, 1  ;;  %v7577_v32 = vor.u32 %v13544_v29, %v12039_v26  ;;  %v2081_v55 = vsel %vm1949_vm3, %v11708_v36, %v2080_v35  ;;  %v12077_v29 = vrot.slane %v13545_v39, 1  ;;  %v8743_v36 = vld [vmem:[%s13469_s4 + $0xa] sm:$0x3] }
 0x18c   : > { %9813 = vmatmul.mubr.msk.bf16.gmra.mrb[44].mxu0 %vm307_vm0, %v11662_v22  ;;  %v6664_v3 = vor.u32 %v13543_v62, %v12044_v17  ;;  %v2356_v62 = vsel %vm1601_vm4, %v2348_v1, %v11554_v49  ;;  %v13617_v49 = vshrl.u32 %v11622_v38, 16  ;;  %v10988_v1 = vld [vmem:[#allocation2 + $0x28] sm:$0xff] }
 0x18d   : > { %9816 = vmatprep.mubr.msk.bf16.mxu0 %vm307_vm0, %v11669_v21  ;;  %v12065_v2 = vsel %vm1949_vm3, %v7577_v32, %v12052_v56  ;;  %v12083_v32 = vsel %vm1949_vm3, %v12026_v15, %v12077_v29  ;;  %v10992_v35 = vld [vmem:[#allocation2 + $0x48] sm:$0xff] }
 0x18e   : > { %v12068_v41 = vsel %vm1949_vm3, %v6664_v3, %v6668_v11  ;;  %13616 = vst [vmem:[#allocation33_spill] sm:$0xff] %v12083_v32  ;;  %v2756_v3 = vsel %vm1436_vm2, %v11933_v37, 0  ;;  %v3151_v37 = vsel %vm1436_vm2, %v8743_v36, 0  ;;  %v10989_v11 = vld [vmem:[#allocation2 + $0x30] sm:$0xff] }
 0x194   : > { %9817 = vmatmul.mubr.msk.bf16.gmra.mrb[48].mxu0 %vm307_vm0, %v11672_v59 }
 0x195   : > { %9820 = vmatprep.mubr.msk.bf16.mxu0 %vm307_vm0, %v11677_v0 }
 0x19c   : > { %9821 = vmatmul.mubr.msk.bf16.gmra.mrb[52].mxu0 %vm307_vm0, %v11680_v23 }
 0x19d   : > { %9824 = vmatprep.mubr.msk.bf16.mxu0 %vm307_vm0, %v11687_v25 }
 0x1a4   : > { %9825 = vmatmul.mubr.msk.bf16.gmra.mrb[56].mxu0 %vm307_vm0, %v11704_v50 }
 0x1a5   : > { %9828 = vmatprep.mubr.msk.bf16.mxu0 %vm307_vm0, %v11715_v31 }
 0x1ac   : > { %9829 = vmatmul.mubr.msk.bf16.gmra.mrb[60].mxu0 %vm307_vm0, %v2081_v55  ;;  %v10990_v55 = vld [vmem:[#allocation2 + $0x38] sm:$0xff] }
 0x1ad   : > { %9834 = vmatprep.mubr.msk.bf16.mxu0 %vm307_vm0, %v2356_v62  ;;  %v10991_v62 = vld [vmem:[#allocation2 + $0x40] sm:$0xff] }
 0x1b4   : > { %9835 = vmatmul.mubr.msk.bf16.vlgmr.msra.gmra.mrb[32].mxu0 %vm307_vm0, %v11594_v27  ;;  %v2464_v27 = vrot.slane %v13617_v49, 7  ;;  %v2951_v49 = vld [vmem:[#allocation2 + $0x20] sm:$0xff] }
 0x1b5   : > { %9867 = vmatpush3.bf16.msra.mxu0 %v2756_v3  ;;  %9838 = vmatprep.mubr.msk.bf16.mxu0 %vm307_vm0, %v11602_v4  ;;  %v13618_v4 = vshll.u32 %v11622_v38, 16  ;;  %v13621_v3 = vld [vmem:[#allocation3_spill] sm:$0xff] }
 0x1b6   : > { %10927 = vmatprep.subr.msk.bf16.mxu0 %vm1436_vm2, %v8743_v36  ;;  %v13622_v36 = vld [vmem:[#allocation4_spill] sm:$0xff] }
 0x1bc   : > { %9839 = vmatmul.mubr.msk.bf16.gmra.mrb[36].mxu0 %vm307_vm0, %v11633_v6  ;;  %v13619_v6 = vshrl.u32 %v11630_v54, 16 }
 0x1bd   : > { %9842 = vmatprep.mubr.msk.bf16.mxu0 %vm307_vm0, %v11636_v9 }
 0x1be   : > { %v12121_v9 = vrot.slane %v13619_v6, 7 }
 0x1c4   : > { %9843 = vmatmul.mubr.msk.bf16.gmra.mrb[40].mxu0 %vm307_vm0, %v11641_v60  ;;  %v13620_v60 = vshll.u32 %v11630_v54, 16 }
 0x1c5   : > { %9846 = vmatprep.mubr.msk.bf16.mxu0 %vm307_vm0, %v11701_v44 }
 0x1c6   : > { %v2475_v44 = vor.u32 %v13620_v60, %v12121_v9 }
 0x1cc   : > { %9847 = vmatmul.mubr.msk.bf16.gmra.mrb[44].mxu0 %vm307_vm0, %v11747_v10  ;;  %v2467_v10 = vor.u32 %v13618_v4, %v2464_v27 }
 0x1cd   : > { %9850 = vmatprep.mubr.msk.bf16.mxu0 %vm307_vm0, %v11766_v20  ;;  %v12135_v20 = vsel %vm1601_vm4, %v2464_v27, %v2475_v44  ;;  %v2952_v27 = vld [vmem:[#allocation2 + $0x28] sm:$0xff] }
 0x1ce   : > { %v2982_v60 = vshrl.u32 %v2952_v27, 16 }
 0x1d4   : > { %9851 = vmatmul.mubr.msk.bf16.gmra.mrb[48].mxu0 %vm307_vm0, %v11793_v42  ;;  %v12127_v42 = vsel %vm1601_vm4, %v11878_v14, %v2467_v10  ;;  %v8760_v14 = vld [vmem:[%s13469_s4 + $0xc] sm:$0x3] }
 0x1d5   : > { %9854 = vmatprep.mubr.msk.bf16.mxu0 %vm307_vm0, %v11797_v28  ;;  %v10987_v28 = vld [vmem:[#allocation2 + $0x20] sm:$0xff] }
 0x1dc   : > { %9855 = vmatmul.mubr.msk.bf16.gmra.mrb[52].mxu0 %vm307_vm0, %v11882_v47 }
 0x1dd   : > { %9858 = vmatprep.mubr.msk.bf16.mxu0 %vm307_vm0, %v11890_v40 }
 0x1e4   : > { %9859 = vmatmul.mubr.msk.bf16.gmra.mrb[56].mxu0 %vm307_vm0, %v11914_v7 }
 0x1e5   : > { %9862 = vmatprep.mubr.msk.bf16.mxu0 %vm307_vm0, %v12127_v42 }
 0x1ec   : > { %9863 = vmatmul.mubr.msk.bf16.gmra.mrb[60].mxu0 %vm307_vm0, %v12135_v20 }
 0x1ed   : > { %9868 = vmatprep.mubr.msk.bf16.mxu0 %vm307_vm0, %v10987_v28  ;;  %v3546_v28 = vsel %vm1436_vm2, %v8760_v14, 0 }
 0x1f4   : > { %9869 = vmatmul.mubr.msk.bf16.vlgmr.msra.gmra.mrb[32].mxu0 %vm307_vm0, %v10988_v1 }
 0x1f5   : > { %9901 = vmatpush3.bf16.msra.mxu0 %v3151_v37  ;;  %9872 = vmatprep.mubr.msk.bf16.mxu0 %vm307_vm0, %v10989_v11  ;;  %v13623_v37 = vld [vmem:[#allocation15_spill] sm:$0xff]  ;;  %v8777_v11 = vld [vmem:[%s13469_s4 + $0xe] sm:$0x3] }
 0x1f6   : > { %10928 = vmatprep.subr.msk.bf16.mxu0 %vm1436_vm2, %v8760_v14  ;;  %v13629_v14 = vld [vmem:[#allocation9_spill] sm:$0xff] }
 0x1fc   : > { %9873 = vmatmul.mubr.msk.bf16.gmra.mrb[36].mxu0 %vm307_vm0, %v10990_v55  ;;  %v13624_v55 = vld [vmem:[#allocation17_spill] sm:$0xff] }
 0x1fd   : > { %9876 = vmatprep.mubr.msk.bf16.mxu0 %vm307_vm0, %v10991_v62  ;;  %v13625_v62 = vld [vmem:[#allocation16_spill] sm:$0xff] }
 0x204   : > { %9877 = vmatmul.mubr.msk.bf16.gmra.mrb[40].mxu0 %vm307_vm0, %v10992_v35  ;;  %v3005_v35 = vsel %vm1949_vm3, %v13625_v62, %v11624_v52  ;;  %v13626_v52 = vld [vmem:[#allocation8_spill] sm:$0xff] }
 0x205   : > { %9880 = vmatprep.mubr.msk.bf16.mxu0 %vm307_vm0, %v11451_v61  ;;  %v2973_v61 = vshll.u32 %v2951_v49, 16 }
 0x20c   : > { %9881 = vmatmul.mubr.msk.bf16.gmra.mrb[44].mxu0 %vm307_vm0, %v11458_v48  ;;  %v2975_v48 = vrot.slane %v2973_v61, 1  ;;  %v13631_v61 = vld [vmem:[#allocation6_spill] sm:$0xff] }
 0x20d   : > { %9884 = vmatprep.mubr.msk.bf16.mxu0 %vm307_vm0, %v11479_v57  ;;  %v2971_v57 = vshrl.u32 %v2951_v49, 16 }
 0x20f   : > { %v2976_v4 = vor.u32 %v2975_v48, %v2971_v57 }
 0x214   : > { %9885 = vmatmul.mubr.msk.bf16.gmra.mrb[48].mxu0 %vm307_vm0, %v11486_v16  ;;  %v2978_v16 = vshll.u32 %v2952_v27, 16  ;;  %v13632_v27 = vshrl.u32 %v13631_v61, 16 }
 0x215   : > { %9888 = vmatprep.mubr.msk.bf16.mxu0 %vm307_vm0, %v13621_v3 }
 0x216   : > { %v2980_v10 = vrot.slane %v2978_v16, 1  ;;  %v3380_v48 = vrot.slane %v13632_v27, 7  ;;  %v13633_v16 = vld [vmem:[#allocation10_spill] sm:$0xff] }
 0x218   : > { %v2981_v6 = vsel %vm1949_vm3, %v2976_v4, %v2980_v10  ;;  %v2984_v44 = vor.u32 %v2982_v60, %v2980_v10  ;;  %v13634_v4 = vshrl.u32 %v13633_v16, 16 }
 0x21a   : > { %v2989_v1 = vsel %vm1949_vm3, %v2984_v44, %v13623_v37  ;;  %v3388_v10 = vrot.slane %v13634_v4, 7  ;;  %v13636_v44 = vshll.u32 %v13633_v16, 16 }
 0x21c   : > { %9889 = vmatmul.mubr.msk.bf16.gmra.mrb[52].mxu0 %vm307_vm0, %v13622_v36 }
 0x21d   : > { %9892 = vmatprep.mubr.msk.bf16.mxu0 %vm307_vm0, %v11530_v5 }
 0x224   : > { %9893 = vmatmul.mubr.msk.bf16.gmra.mrb[56].mxu0 %vm307_vm0, %v11538_v45 }
 0x225   : > { %9896 = vmatprep.mubr.msk.bf16.mxu0 %vm307_vm0, %v11622_v38 }
 0x22c   : > { %9897 = vmatmul.mubr.msk.bf16.gmra.mrb[60].mxu0 %vm307_vm0, %v11630_v54 }
 0x22d   : > { %9902 = vmatprep.mubr.msk.bf16.mxu0 %vm307_vm0, %v2981_v6  ;;  %v13635_v6 = vshll.u32 %v13631_v61, 16 }
 0x22f   : > { %v3383_v60 = vor.u32 %v3380_v48, %v13635_v6 }
 0x234   : > { %9903 = vmatmul.mubr.msk.bf16.vlgmr.msra.gmra.mrb[32].mxu0 %vm307_vm0, %v2989_v1  ;;  %v13637_v1 = vld [vmem:[#allocation11_spill] sm:$0xff] }
 0x235   : > { %9935 = vmatpush3.bf16.msra.mxu0 %v3546_v28  ;;  %9906 = vmatprep.mubr.msk.bf16.mxu0 %vm307_vm0, %v13624_v55  ;;  %v3391_v28 = vor.u32 %v13636_v44, %v3388_v10  ;;  %v13638_v62 = vshrl.u32 %v13637_v1, 16 }
 0x236   : > { %10929 = vmatprep.subr.msk.bf16.mxu0 %vm1436_vm2, %v8777_v11 }
 0x23c   : > { %9907 = vmatmul.mubr.msk.bf16.gmra.mrb[36].mxu0 %vm307_vm0, %v3005_v35  ;;  %v3396_v35 = vrot.slane %v13638_v62, 7  ;;  %v13649_v62 = vshll.u32 %v11784_v46, 16 }
 0x23d   : > { %9910 = vmatprep.mubr.msk.bf16.mxu0 %vm307_vm0, %v11657_v24  ;;  %v2967_v24 = vld [vmem:[#allocation2 + $0xa0] sm:$0x1] }
 0x244   : > { %9911 = vmatmul.mubr.msk.bf16.gmra.mrb[40].mxu0 %vm307_vm0, %v11662_v22  ;;  %v13627_v22 = vld [vmem:[#allocation7_spill] sm:$0xff] }
 0x245   : > { %9914 = vmatprep.mubr.msk.bf16.mxu0 %vm307_vm0, %v11669_v21  ;;  %v3346_v21 = vld [vmem:[#allocation2 + $0x28] sm:$0x80] }
 0x246   : > { %v3366_v3 = vshrl.u32 %v3346_v21, 16  ;;  %v3392_v21 = vsel %vm1601_vm4, %v3380_v48, %v3391_v28  ;;  %v13645_v48 = vshrl.u32 %v11782_v8, 16  ;;  %v13648_v28 = vshrl.u32 %v11784_v46, 16 }
 0x248   : > { %v3368_v49 = vrot.slane %v3366_v3, 7 }
 0x24c   : > { %9915 = vmatmul.mubr.msk.bf16.gmra.mrb[44].mxu0 %vm307_vm0, %v11672_v59  ;;  %v13628_v59 = vshrl.u32 %v13627_v22, 16 }
 0x24d   : > { %9918 = vmatprep.mubr.msk.bf16.mxu0 %vm307_vm0, %v11677_v0 }
 0x24e   : > { %v3372_v0 = vrot.slane %v13628_v59, 7 }
 0x250   : > { %v3384_v37 = vsel %vm1601_vm4, %v3372_v0, %v3383_v60  ;;  %v13647_v60 = vshll.u32 %v11782_v8, 16 }
 0x254   : > { %9919 = vmatmul.mubr.msk.bf16.gmra.mrb[48].mxu0 %vm307_vm0, %v11680_v23  ;;  %v3098_v23 = vshll.u32 %v2967_v24, 16  ;;  %v8794_v24 = vld [vmem:[%s13469_s4 + $0x10] sm:$0x3] }
 0x255   : > { %9922 = vmatprep.mubr.msk.bf16.mxu0 %vm307_vm0, %v11687_v25  ;;  %v13630_v25 = vshll.u32 %v13627_v22, 16 }
 0x257   : > { %v3375_v36 = vor.u32 %v3372_v0, %v13630_v25 }
 0x259   : > { %v3376_v57 = vsel %vm1601_vm4, %v3368_v49, %v3375_v36 }
 0x25c   : > { %9923 = vmatmul.mubr.msk.bf16.gmra.mrb[52].mxu0 %vm307_vm0, %v11704_v50  ;;  %v3100_v50 = vrot.slane %v3098_v23, 1 }
 0x25d   : > { %9926 = vmatprep.mubr.msk.bf16.mxu0 %vm307_vm0, %v11715_v31 }
 0x25e   : > { %v3101_v31 = vsel %vm1949_vm3, %v11722_v63, %v3100_v50  ;;  %v3776_v63 = vsel %vm1436_vm2, %v8777_v11, 0  ;;  %v13641_v11 = vshll.u32 %v13637_v1, 16  ;;  %v13643_v50 = vld [vmem:[#allocation14_spill] sm:$0xff] }
 0x25f   : > { %v13644_v49 = vshrl.u32 %v13643_v50, 16  ;;  %v13646_v4 = vshll.u32 %v13643_v50, 16 }
 0x260   : > { %v3399_v0 = vor.u32 %v13641_v11, %v3396_v35 }
 0x262   : > { %v3400_v36 = vsel %vm1601_vm4, %v3388_v10, %v3399_v0 }
 0x264   : > { %9927 = vmatmul.mubr.msk.bf16.gmra.mrb[56].mxu0 %vm307_vm0, %v13626_v52  ;;  %v13639_v52 = vld [vmem:[#allocation12_spill] sm:$0xff] }
 0x265   : > { %9930 = vmatprep.mubr.msk.bf16.mxu0 %vm307_vm0, %v13629_v14  ;;  %v13640_v59 = vshrl.u32 %v13639_v52, 16  ;;  %v13642_v3 = vshll.u32 %v13639_v52, 16 }
 0x267   : > { %v3404_v23 = vrot.slane %v13640_v59, 7  ;;  %v13650_v59 = vld [vmem:[#allocation13_spill] sm:$0xff] }
 0x269   : > { %v3407_v25 = vor.u32 %v13642_v3, %v3404_v23  ;;  %v13652_v3 = vshll.u32 %v11826_v30, 16 }
 0x26b   : > { %v3408_v27 = vsel %vm1601_vm4, %v3396_v35, %v3407_v25 }
 0x26c   : > { %9931 = vmatmul.mubr.msk.bf16.gmra.mrb[60].mxu0 %vm307_vm0, %v3101_v31  ;;  %v3412_v31 = vrot.slane %v13644_v49, 7 }
 0x26d   : > { %9936 = vmatprep.mubr.msk.bf16.mxu0 %vm307_vm0, %v3376_v57  ;;  %v3420_v57 = vrot.slane %v13645_v48, 7 }
 0x26e   : > { %v3415_v6 = vor.u32 %v13646_v4, %v3412_v31 }
 0x26f   : > { %v3423_v44 = vor.u32 %v13647_v60, %v3420_v57 }
 0x270   : > { %v3416_v10 = vsel %vm1601_vm4, %v3404_v23, %v3415_v6  ;;  %v13651_v23 = vshrl.u32 %v11826_v30, 16 }
 0x272   : > { %v3484_v0 = vrot.slane %v13651_v23, 7  ;;  %v8861_v23 = vld [vmem:[%s13469_s4 + $0x2] sm:$0x3] }
 0x274   : > { %9937 = vmatmul.mubr.msk.bf16.vlgmr.msra.gmra.mrb[32].mxu0 %vm307_vm0, %v3384_v37  ;;  %v3424_v37 = vsel %vm1601_vm4, %v3412_v31, %v3423_v44  ;;  %v12279_v25 = vor.u32 %v13652_v3, %v3484_v0  ;;  %v4171_v31 = vsel %vm1436_vm2, %v8794_v24, 0 }
 0x275   : > { %9969 = vmatpush3.bf16.msra.mxu0 %v3776_v63  ;;  %9940 = vmatprep.mubr.msk.bf16.mxu0 %vm307_vm0, %v3392_v21  ;;  %v3428_v63 = vrot.slane %v13648_v28, 7 }
 0x276   : > { %10930 = vmatprep.subr.msk.bf16.mxu0 %vm1436_vm2, %v8794_v24 }
 0x277   : > { %v3431_v35 = vor.u32 %v13649_v62, %v3428_v63  ;;  %v3440_v11 = vsel %vm1601_vm4, %v3428_v63, %v13650_v59  ;;  %v3987_v63 = vld [vmem:[#allocation2 + $0xb0] sm:$0x1]  ;;  %v13660_v59 = vld [vmem:[#allocation20_spill] sm:$0xff] }
 0x278   : > { %v13658_v62 = vld [vmem:[#allocation21_spill] sm:$0xff] }
 0x279   : > { %v3432_v21 = vsel %vm1601_vm4, %v3420_v57, %v3431_v35  ;;  %v13659_v35 = vld [vmem:[#allocation22_spill] sm:$0xff] }
 0x27c   : > { %9941 = vmatmul.mubr.msk.bf16.gmra.mrb[36].mxu0 %vm307_vm0, %v3400_v36  ;;  %v13653_v36 = vshrl.u32 %v11841_v43, 16 }
 0x27d   : > { %9944 = vmatprep.mubr.msk.bf16.mxu0 %vm307_vm0, %v3408_v27 }
 0x27e   : > { %v12283_v49 = vrot.slane %v13653_v36, 7 }
 0x284   : > { %9945 = vmatmul.mubr.msk.bf16.gmra.mrb[40].mxu0 %vm307_vm0, %v3416_v10  ;;  %v13657_v10 = vld [vmem:[#allocation5_spill] sm:$0xff] }
 0x285   : > { %9948 = vmatprep.mubr.msk.bf16.mxu0 %vm307_vm0, %v3424_v37  ;;  %v4118_v37 = vshll.u32 %v3987_v63, 16 }
 0x28c   : > { %9949 = vmatmul.mubr.msk.bf16.gmra.mrb[44].mxu0 %vm307_vm0, %v3432_v21  ;;  %v4120_v21 = vrot.slane %v4118_v37, 1 }
 0x28d   : > { %9952 = vmatprep.mubr.msk.bf16.mxu0 %vm307_vm0, %v3440_v11 }
 0x28e   : > { %v4121_v11 = vsel %vm1949_vm3, %v13660_v59, %v4120_v21 }
 0x294   : > { %9953 = vmatmul.mubr.msk.bf16.gmra.mrb[48].mxu0 %vm307_vm0, %v11882_v47  ;;  %v13654_v47 = vshll.u32 %v11841_v43, 16 }
 0x295   : > { %9956 = vmatprep.mubr.msk.bf16.mxu0 %vm307_vm0, %v11890_v40 }
 0x296   : > { %v3495_v40 = vor.u32 %v13654_v47, %v12283_v49 }
 0x29c   : > { %9957 = vmatmul.mubr.msk.bf16.gmra.mrb[52].mxu0 %vm307_vm0, %v11914_v7  ;;  %v3488_v7 = vsel %vm1601_vm4, %v12121_v9, %v12279_v25 }
 0x29d   : > { %9960 = vmatprep.mubr.msk.bf16.mxu0 %vm307_vm0, %v12127_v42  ;;  %v12295_v42 = vsel %vm1601_vm4, %v3484_v0, %v3495_v40 }
 0x2a4   : > { %9961 = vmatmul.mubr.msk.bf16.gmra.mrb[56].mxu0 %vm307_vm0, %v12135_v20  ;;  %v4452_v20 = vld [vmem:[%s13471_s6] sm:$0x3] }
 0x2a5   : > { %9964 = vmatprep.mubr.msk.bf16.mxu0 %vm307_vm0, %v3488_v7  ;;  %10931 = vmatprep.subr.msk.bf16.mxu1 %vm1436_vm2, %v4452_v20  ;;  %v4508_v9 = vsel %vm1436_vm2, %v4452_v20, 0 }
 0x2a6   : > { %10037 = vmatpush3.bf16.msra.mxu1 %v4508_v9 }
 0x2a7   : > { %10932 = vmatprep.subr.msk.bf16.mxu1 %vm1436_vm2, %v8861_v23 }
 0x2ac   : > { %9965 = vmatmul.mubr.msk.bf16.gmra.mrb[60].mxu0 %vm307_vm0, %v12295_v42 }
 0x2ad   : > { %9970 = vmatprep.mubr.msk.bf16.mxu0 %vm307_vm0, %v13627_v22  ;;  %v10993_v22 = vld [vmem:[#allocation2 + $0x70] sm:$0xff] }
 0x2b4   : > { %9971 = vmatmul.mubr.msk.bf16.vlgmr.msra.gmra.mrb[32].mxu0 %vm307_vm0, %v13631_v61  ;;  %v10994_v61 = vld [vmem:[#allocation2 + $0x78] sm:$0xff] }
 0x2b5   : > { %10003 = vmatpush3.bf16.msra.mxu0 %v4171_v31  ;;  %9974 = vmatprep.mubr.msk.bf16.mxu0 %vm307_vm0, %v13633_v16 }
 0x2bc   : > { %9975 = vmatmul.mubr.msk.bf16.gmra.mrb[36].mxu0 %vm307_vm0, %v13637_v1 }
 0x2bd   : > { %9978 = vmatprep.mubr.msk.bf16.mxu0 %vm307_vm0, %v13639_v52 }
 0x2c4   : > { %9979 = vmatmul.mubr.msk.bf16.gmra.mrb[40].mxu0 %vm307_vm0, %v13643_v50 }
 0x2c5   : > { %9982 = vmatprep.mubr.msk.bf16.mxu0 %vm307_vm0, %v11782_v8 }
 0x2cc   : > { %9983 = vmatmul.mubr.msk.bf16.gmra.mrb[44].mxu0 %vm307_vm0, %v11784_v46  ;;  %v13655_v46 = vld [vmem:[#allocation18_spill] sm:$0xff] }
 0x2cd   : > { %9986 = vmatprep.mubr.msk.bf16.mxu0 %vm307_vm0, %v10993_v22 }
 0x2d4   : > { %9987 = vmatmul.mubr.msk.bf16.gmra.mrb[48].mxu0 %vm307_vm0, %v10994_v61 }
 0x2d5   : > { %9990 = vmatprep.mubr.msk.bf16.mxu0 %vm307_vm0, %v11530_v5  ;;  %v3979_v5 = vld [vmem:[#allocation2 + $0x70] sm:$0xff] }
 0x2d6   : > { %v4058_v8 = vshrl.u32 %v3979_v5, 16 }
 0x2dc   : > { %9991 = vmatmul.mubr.msk.bf16.gmra.mrb[52].mxu0 %vm307_vm0, %v11538_v45  ;;  %v4054_v45 = vshll.u32 %v3979_v5, 16 }
 0x2dd   : > { %9994 = vmatprep.mubr.msk.bf16.mxu0 %vm307_vm0, %v11622_v38  ;;  %v3980_v38 = vld [vmem:[#allocation2 + $0x78] sm:$0xff] }
 0x2e4   : > { %9995 = vmatmul.mubr.msk.bf16.gmra.mrb[56].mxu0 %vm307_vm0, %v11630_v54  ;;  %v3981_v54 = vld [vmem:[#allocation2 + $0x80] sm:$0xff] }
 0x2e5   : > { %9998 = vmatprep.mubr.msk.bf16.mxu0 %vm307_vm0, %v11826_v30  ;;  %v4062_v30 = vshll.u32 %v3980_v38, 16 }
 0x2e7   : > { %v4064_v16 = vrot.slane %v4062_v30, 1 }
 0x2ec   : > { %9999 = vmatmul.mubr.msk.bf16.gmra.mrb[60].mxu0 %vm307_vm0, %v11841_v43  ;;  %v4056_v43 = vrot.slane %v4054_v45, 1 }
 0x2ed   : > { %10004 = vmatprep.mubr.msk.bf16.mxu0 %vm307_vm0, %v13624_v55  ;;  %v4070_v55 = vshll.u32 %v3981_v54, 16 }
 0x2ef   : > { %v4072_v52 = vrot.slane %v4070_v55, 1  ;;  %v12390_v55 = vld [vmem:[%s13469_s4] sm:$0x3] }
 0x2f4   : > { %10005 = vmatmul.mubr.msk.bf16.vlgmr.msra.gmra.mrb[32].mxu0 %vm307_vm0, %v13655_v46 }
 0x2f5   : > { %10008 = vmatprep.mubr.msk.bf16.mxu0 %vm307_vm0, %v11852_v33  ;;  %v4060_v33 = vor.u32 %v4058_v8, %v4056_v43  ;;  %v5028_v8 = vsel %vm1436_vm2, %v8861_v23, 0 }
 0x2f7   : > { %v4065_v24 = vsel %vm1949_vm3, %v4060_v33, %v4064_v16 }
 0x2fc   : > { %10009 = vmatmul.mubr.msk.bf16.gmra.mrb[36].mxu0 %vm307_vm0, %v11855_v13  ;;  %v13656_v13 = vld [vmem:[#allocation19_spill] sm:$0xff] }
 0x2fd   : > { %10012 = vmatprep.mubr.msk.bf16.mxu0 %vm307_vm0, %v11858_v19  ;;  %v4057_v1 = vsel %vm1949_vm3, %v13656_v13, %v4056_v43  ;;  %v3982_v19 = vld [vmem:[#allocation2 + $0x88] sm:$0xff] }
 0x2fe   : > { %v4078_v50 = vshll.u32 %v3982_v19, 16  ;;  %v4082_v60 = vshrl.u32 %v3982_v19, 16 }
 0x300   : > { %v4080_v57 = vrot.slane %v4078_v50, 1 }
 0x302   : > { %v4084_v44 = vor.u32 %v4082_v60, %v4080_v57 }
 0x304   : > { %10013 = vmatmul.mubr.msk.bf16.gmra.mrb[40].mxu0 %vm307_vm0, %v11862_v51  ;;  %v4074_v51 = vshrl.u32 %v3981_v54, 16  ;;  %v4089_v28 = vsel %vm1949_vm3, %v4084_v44, %v13657_v10 }
 0x305   : > { %10016 = vmatprep.mubr.msk.bf16.mxu0 %vm307_vm0, %v11874_v58  ;;  %v4066_v58 = vshrl.u32 %v3980_v38, 16 }
 0x306   : > { %v4076_v27 = vor.u32 %v4074_v51, %v4072_v52 }
 0x307   : > { %v4068_v48 = vor.u32 %v4066_v58, %v4064_v16 }
 0x308   : > { %v4081_v6 = vsel %vm1949_vm3, %v4076_v27, %v4080_v57 }
 0x309   : > { %v4073_v4 = vsel %vm1949_vm3, %v4068_v48, %v4072_v52 }
 0x30c   : > { %10017 = vmatmul.mubr.msk.bf16.gmra.mrb[44].mxu0 %vm307_vm0, %v4057_v1 }
 0x30d   : > { %10020 = vmatprep.mubr.msk.bf16.mxu0 %vm307_vm0, %v4065_v24 }
 0x314   : > { %10021 = vmatmul.mubr.msk.bf16.gmra.mrb[48].mxu0 %vm307_vm0, %v4073_v4 }
 0x315   : > { %10024 = vmatprep.mubr.msk.bf16.mxu0 %vm307_vm0, %v4081_v6 }
 0x31c   : > { %10025 = vmatmul.mubr.msk.bf16.gmra.mrb[52].mxu0 %vm307_vm0, %v4089_v28 }
 0x31d   : > { %10028 = vmatprep.mubr.msk.bf16.mxu0 %vm307_vm0, %v13629_v14  ;;  %v12377_v14 = vld [vmem:[%s13470_s5] ss:$0 sm:$0xff] }
 0x324   : > { %10029 = vmatmul.mubr.msk.bf16.gmra.mrb[56].mxu0 %vm307_vm0, %v13658_v62 }
 0x325   : > { %10032 = vmatprep.mubr.msk.bf16.mxu0 %vm307_vm0, %v13659_v35 }
 0x32c   : > { %10033 = vmatmul.mubr.msk.bf16.gmra.mrb[60].mxu0 %vm307_vm0, %v4121_v11 }
 0x3c7   : > { %v10006_v0 = vpop.f32.mrb[32].mxu0 }
 0x3c8   : > { %v4374_v3 = vadd.f32 %v10006_v0, %v12377_v14  ;;  %v4207_v36 = vpop.f32.mrb[33].mxu0 }
 0x3c9   : > { %v4372_v7 = vadd.f32 %v12377_v14, %v4207_v36  ;;  %v10007_v47 = vpop.f32.mrb[34].mxu0 }
 0x3ca   : > { %v4375_v40 = vadd.f32 %v10007_v47, %v12377_v14  ;;  %v4210_v20 = vpop.f32.mrb[35].mxu0  ;;  %v4406_v31 = vmax.f32 %v4374_v3, 0.0 }
 0x3cb   : > { %v4373_v9 = vadd.f32 %v12377_v14, %v4210_v20  ;;  %v4404_v61 = vmax.f32 %v4372_v7, 0.0 }
 0x3cc   : > { %v4407_v22 = vmax.f32 %v4375_v40, 0.0 }
 0x3cd   : > { %v4405_v46 = vmax.f32 %v4373_v9, 0.0 }
 0x3ce   : > { %v4437_v5 = vpack.c.bf16 %v4407_v22, %v4406_v31 }
 0x3cf   : > { %v4436_v45 = vpack.c.bf16 %v4405_v46, %v4404_v61  ;;  %v10010_v38 = vpop.f32.mrb[36].mxu0 }
 0x3d0   : > { %v4378_v43 = vadd.f32 %v10010_v38, %v12377_v14  ;;  %v4223_v54 = vpop.f32.mrb[37].mxu0 }
 0x3d1   : > { %v4376_v30 = vadd.f32 %v12377_v14, %v4223_v54  ;;  %v10011_v33 = vpop.f32.mrb[38].mxu0  ;;  %10038 = vmatprep.mubr.msk.bf16.mxu1 %vm307_vm0, %v4436_v45 }
 0x3d2   : > { %v4379_v16 = vadd.f32 %v10011_v33, %v12377_v14  ;;  %v4226_v13 = vpop.f32.mrb[39].mxu0  ;;  %10039 = vmatmul.mubr.msk.bf16.vlgmr.msra.gmra.mrb[32].mxu1 %vm307_vm0, %v4437_v5  ;;  %v4410_v19 = vmax.f32 %v4378_v43, 0.0 }
 0x3d3   : > { %v4377_v1 = vadd.f32 %v12377_v14, %v4226_v13  ;;  %10071 = vmatpush3.bf16.msra.mxu1 %v5028_v8  ;;  %v4408_v52 = vmax.f32 %v4376_v30, 0.0 }
 0x3d4   : > { %v4411_v24 = vmax.f32 %v4379_v16, 0.0  ;;  %10933 = vmatprep.subr.msk.bf16.mxu1 %vm1436_vm2, %v12390_v55 }
 0x3d5   : > { %v4409_v51 = vmax.f32 %v4377_v1, 0.0 }
 0x3d6   : > { %v4439_v50 = vpack.c.bf16 %v4411_v24, %v4410_v19 }
 0x3d7   : > { %v4438_v58 = vpack.c.bf16 %v4409_v51, %v4408_v52  ;;  %v10014_v27 = vpop.f32.mrb[40].mxu0 }
 0x3d8   : > { %v4382_v48 = vadd.f32 %v10014_v27, %v12377_v14  ;;  %v4239_v57 = vpop.f32.mrb[41].mxu0 }
 0x3d9   : > { %v4380_v4 = vadd.f32 %v12377_v14, %v4239_v57  ;;  %v10015_v6 = vpop.f32.mrb[42].mxu0  ;;  %10042 = vmatprep.mubr.msk.bf16.mxu1 %vm307_vm0, %v4438_v58 }
 0x3da   : > { %v4383_v60 = vadd.f32 %v10015_v6, %v12377_v14  ;;  %v4242_v44 = vpop.f32.mrb[43].mxu0  ;;  %10043 = vmatmul.mubr.msk.bf16.gmra.mrb[36].mxu1 %vm307_vm0, %v4439_v50  ;;  %v4414_v28 = vmax.f32 %v4382_v48, 0.0 }
 0x3db   : > { %v4381_v10 = vadd.f32 %v12377_v14, %v4242_v44  ;;  %v4412_v37 = vmax.f32 %v4380_v4, 0.0 }
 0x3dc   : > { %v4415_v63 = vmax.f32 %v4383_v60, 0.0 }
 0x3dd   : > { %v4413_v62 = vmax.f32 %v4381_v10, 0.0 }
 0x3de   : > { %v4441_v21 = vpack.c.bf16 %v4415_v63, %v4414_v28 }
 0x3df   : > { %v4440_v11 = vpack.c.bf16 %v4413_v62, %v4412_v37  ;;  %v10018_v23 = vpop.f32.mrb[44].mxu0 }
 0x3e0   : > { %v4386_v0 = vadd.f32 %v10018_v23, %v12377_v14  ;;  %v4255_v3 = vpop.f32.mrb[45].mxu0 }
 0x3e1   : > { %v4384_v36 = vadd.f32 %v12377_v14, %v4255_v3  ;;  %v10019_v7 = vpop.f32.mrb[46].mxu0  ;;  %10046 = vmatprep.mubr.msk.bf16.mxu1 %vm307_vm0, %v4440_v11 }
 0x3e2   : > { %v4387_v47 = vadd.f32 %v10019_v7, %v12377_v14  ;;  %v4258_v40 = vpop.f32.mrb[47].mxu0  ;;  %10047 = vmatmul.mubr.msk.bf16.gmra.mrb[40].mxu1 %vm307_vm0, %v4441_v21  ;;  %v4418_v9 = vmax.f32 %v4386_v0, 0.0 }
 0x3e3   : > { %v4385_v20 = vadd.f32 %v12377_v14, %v4258_v40  ;;  %v4416_v22 = vmax.f32 %v4384_v36, 0.0 }
 0x3e4   : > { %v4419_v31 = vmax.f32 %v4387_v47, 0.0 }
 0x3e5   : > { %v4417_v61 = vmax.f32 %v4385_v20, 0.0 }
 0x3e6   : > { %v4443_v46 = vpack.c.bf16 %v4419_v31, %v4418_v9 }
 0x3e7   : > { %v4442_v5 = vpack.c.bf16 %v4417_v61, %v4416_v22  ;;  %v10022_v45 = vpop.f32.mrb[48].mxu0 }
 0x3e8   : > { %v4390_v38 = vadd.f32 %v10022_v45, %v12377_v14  ;;  %v4271_v43 = vpop.f32.mrb[49].mxu0 }
 0x3e9   : > { %v4388_v54 = vadd.f32 %v12377_v14, %v4271_v43  ;;  %v10023_v8 = vpop.f32.mrb[50].mxu0  ;;  %10050 = vmatprep.mubr.msk.bf16.mxu1 %vm307_vm0, %v4442_v5 }
 0x3ea   : > { %v4391_v30 = vadd.f32 %v10023_v8, %v12377_v14  ;;  %v4274_v33 = vpop.f32.mrb[51].mxu0  ;;  %10051 = vmatmul.mubr.msk.bf16.gmra.mrb[44].mxu1 %vm307_vm0, %v4443_v46  ;;  %v4422_v13 = vmax.f32 %v4390_v38, 0.0 }
 0x3eb   : > { %v4389_v16 = vadd.f32 %v12377_v14, %v4274_v33  ;;  %v4420_v19 = vmax.f32 %v4388_v54, 0.0 }
 0x3ec   : > { %v4423_v1 = vmax.f32 %v4391_v30, 0.0 }
 0x3ed   : > { %v4421_v24 = vmax.f32 %v4389_v16, 0.0 }
 0x3ee   : > { %v4445_v52 = vpack.c.bf16 %v4423_v1, %v4422_v13 }
 0x3ef   : > { %v4444_v51 = vpack.c.bf16 %v4421_v24, %v4420_v19  ;;  %v10026_v50 = vpop.f32.mrb[52].mxu0 }
 0x3f0   : > { %v4394_v58 = vadd.f32 %v10026_v50, %v12377_v14  ;;  %v4287_v27 = vpop.f32.mrb[53].mxu0  ;;  %v13661_v50 = vld [vmem:[#allocation23_spill] sm:$0xff] }
 0x3f1   : > { %v4392_v48 = vadd.f32 %v12377_v14, %v4287_v27  ;;  %v10027_v57 = vpop.f32.mrb[54].mxu0  ;;  %10054 = vmatprep.mubr.msk.bf16.mxu1 %vm307_vm0, %v4444_v51  ;;  %v5356_v51 = vsel %vm1436_vm2, %v12390_v55, 0  ;;  %v10996_v27 = vld [vmem:[#allocation2 + $0xa8] sm:$0xff]  ;;  %v12453_v55 = vld [vmem:[#allocation2 + $0xb8] sm:$0xff] }
 0x3f2   : > { %v4395_v4 = vadd.f32 %v10027_v57, %v12377_v14  ;;  %v4290_v6 = vpop.f32.mrb[55].mxu0  ;;  %10055 = vmatmul.mubr.msk.bf16.gmra.mrb[48].mxu1 %vm307_vm0, %v4445_v52  ;;  %v4426_v44 = vmax.f32 %v4394_v58, 0.0  ;;  %v12435_v52 = vld [vmem:[#allocation2 + $0x90] sm:$0xff]  ;;  %v10995_v58 = vld [vmem:[#allocation2 + $0xa0] sm:$0xff] }
 0x3f3   : > { %v4393_v60 = vadd.f32 %v12377_v14, %v4290_v6  ;;  %v4424_v28 = vmax.f32 %v4392_v48, 0.0  ;;  %v12449_v48 = vld [vmem:[#allocation2 + $0xb0] sm:$0xff]  ;;  %v12457_v57 = vld [vmem:[#allocation2 + $0xc0] sm:$0xff] }
 0x3f4   : > { %v4427_v10 = vmax.f32 %v4395_v4, 0.0  ;;  %v12461_v4 = vld [vmem:[#allocation2 + $0xc8] sm:$0xff]  ;;  %v12465_v6 = vld [vmem:[#allocation2 + $0xd0] sm:$0xff] }
 0x3f5   : > { %v4425_v63 = vmax.f32 %v4393_v60, 0.0  ;;  %v12469_v60 = vld [vmem:[#allocation2 + $0xd8] sm:$0xff] }
 0x3f6   : > { %v4447_v37 = vpack.c.bf16 %v4427_v10, %v4426_v44  ;;  %v12473_v44 = vld [vmem:[#allocation2 + $0xe0] sm:$0xff]  ;;  %v12477_v10 = vld [vmem:[#allocation2 + $0xe8] sm:$0xff] }
 0x3f7   : > { %v4446_v62 = vpack.c.bf16 %v4425_v63, %v4424_v28  ;;  %v10030_v21 = vpop.f32.mrb[56].mxu0  ;;  %v12481_v28 = vld [vmem:[#allocation2 + $0xf0] sm:$0xff]  ;;  %v5195_v63 = vshrl.u32 %v12435_v52, 16 }
 0x3f8   : > { %v4398_v11 = vadd.f32 %v10030_v21, %v12377_v14  ;;  %v4303_v23 = vpop.f32.mrb[57].mxu0 }
 0x3f9   : > { %v4396_v0 = vadd.f32 %v12377_v14, %v4303_v23  ;;  %v10031_v3 = vpop.f32.mrb[58].mxu0  ;;  %10058 = vmatprep.mubr.msk.bf16.mxu1 %vm307_vm0, %v4446_v62  ;;  %v4960_v62 = vld [vmem:[#allocation2 + $0x88] sm:$0x80]  ;;  %v5197_v21 = vrot.slane %v5195_v63, 7  ;;  %v5198_v23 = vshll.u32 %v12435_v52, 16 }
 0x3fa   : > { %v4399_v36 = vadd.f32 %v10031_v3, %v12377_v14  ;;  %v4306_v7 = vpop.f32.mrb[59].mxu0  ;;  %10059 = vmatmul.mubr.msk.bf16.gmra.mrb[52].mxu1 %vm307_vm0, %v4447_v37  ;;  %v4430_v40 = vmax.f32 %v4398_v11, 0.0  ;;  %v12486_v37 = vld [vmem:[#allocation2 + $0xf8] sm:$0xff]  ;;  %v12492_v11 = vld [vmem:[#allocation2 + $0x100] sm:$0xff] }
 0x3fb   : > { %v4397_v47 = vadd.f32 %v12377_v14, %v4306_v7  ;;  %v4428_v9 = vmax.f32 %v4396_v0, 0.0  ;;  %v5192_v0 = vshrl.u32 %v4960_v62, 16  ;;  %v5200_v3 = vor.u32 %v5198_v23, %v5197_v21 }
 0x3fc   : > { %v4431_v20 = vmax.f32 %v4399_v36, 0.0  ;;  %v13662_v7 = vshrl.u32 %v13661_v50, 16  ;;  %v5254_v62 = vshll.u32 %v12465_v6, 16  ;;  %v13551_v39 = vshrl.u32 %v12492_v11, 16 }
 0x3fd   : > { %v4429_v31 = vmax.f32 %v4397_v47, 0.0  ;;  %v5194_v36 = vrot.slane %v5192_v0, 7  ;;  %v13553_v0 = vshrl.u32 %v12469_v60, 16 }
 0x3fe   : > { %v4449_v22 = vpack.c.bf16 %v4431_v20, %v4430_v40  ;;  %v5204_v47 = vrot.slane %v13662_v7, 7  ;;  %v12501_v40 = vld [vmem:[#allocation2 + $0x108] sm:$0xff] }
 0x3ff   : > { %v4448_v61 = vpack.c.bf16 %v4429_v31, %v4428_v9  ;;  %v10034_v46 = vpop.f32.mrb[60].mxu0  ;;  %v5201_v20 = vsel %vm1601_vm4, %v5194_v36, %v5200_v3  ;;  %v13663_v9 = vshll.u32 %v13661_v50, 16  ;;  %v13557_v36 = vshrl.u32 %v12473_v44, 16 }
 0x400   : > { %v4402_v5 = vadd.f32 %v10034_v46, %v12377_v14  ;;  %v4319_v45 = vpop.f32.mrb[61].mxu0  ;;  %v5260_v7 = vrot.slane %v13553_v0, 7  ;;  %v13555_v0 = vshll.u32 %v12501_v40, 16 }
 0x401   : > { %v4400_v38 = vadd.f32 %v12377_v14, %v4319_v45  ;;  %v10035_v43 = vpop.f32.mrb[62].mxu0  ;;  %10062 = vmatprep.mubr.msk.bf16.mxu1 %vm307_vm0, %v4448_v61  ;;  %v5207_v31 = vor.u32 %v13663_v9, %v5204_v47 }
 0x402   : > { %v4403_v54 = vadd.f32 %v10035_v43, %v12377_v14  ;;  %v4322_v8 = vpop.f32.mrb[63].mxu0  ;;  %10063 = vmatmul.mubr.msk.bf16.gmra.mrb[56].mxu1 %vm307_vm0, %v4449_v22  ;;  %v4434_v33 = vmax.f32 %v4402_v5, 0.0  ;;  %v5223_v22 = vshrl.u32 %v12449_v48, 16  ;;  %v12515_v5 = vld [vmem:[%s13469_s4 + $0x6] sm:$0x3]  ;;  %v5226_v43 = vshll.u32 %v12449_v48, 16 }
 0x403   : > { %v4401_v30 = vadd.f32 %v12377_v14, %v4322_v8  ;;  %v4432_v13 = vmax.f32 %v4400_v38, 0.0  ;;  %v8894_v14 = vld [vmem:[%s13469_s4 + $0x4] sm:$0x3]  ;;  %v5208_v46 = vsel %vm1601_vm4, %v5197_v21, %v5207_v31  ;;  %v5215_v38 = vsel %vm1601_vm4, %v5204_v47, %v12279_v25 }
 0x404   : > { %v4435_v16 = vmax.f32 %v4403_v54, 0.0  ;;  %v5718_v61 = vsel %vm1436_vm2, %v8894_v14, 0  ;;  %v5225_v45 = vrot.slane %v5223_v22, 7  ;;  %v5230_v54 = vshrl.u32 %v12453_v55, 16 }
 0x405   : > { %v4433_v1 = vmax.f32 %v4401_v30, 0.0  ;;  %v5237_v30 = vshrl.u32 %v12457_v57, 16  ;;  %v5261_v31 = vshll.u32 %v12469_v60, 16 }
 0x406   : > { %v4451_v19 = vpack.c.bf16 %v4435_v16, %v4434_v33  ;;  %v12529_v8 = vor.u32 %v5226_v43, %v5225_v45  ;;  %v5232_v33 = vrot.slane %v5230_v54, 7 }
 0x407   : > { %v4450_v24 = vpack.c.bf16 %v4433_v1, %v4432_v13  ;;  %v5239_v25 = vrot.slane %v5237_v30, 7  ;;  %v5233_v13 = vshll.u32 %v12453_v55, 16  ;;  %v5240_v1 = vshll.u32 %v12457_v57, 16 }
 0x408   : > { %v5229_v16 = vsel %vm1601_vm4, %v12283_v49, %v12529_v8 }
 0x409   : > { %10066 = vmatprep.mubr.msk.bf16.mxu1 %vm307_vm0, %v4450_v24  ;;  %v5244_v24 = vshrl.u32 %v12461_v4, 16 }
 0x40a   : > { %10067 = vmatmul.mubr.msk.bf16.gmra.mrb[60].mxu1 %vm307_vm0, %v4451_v19  ;;  %v5235_v19 = vor.u32 %v5233_v13, %v5232_v33 }
 0x40b   : > { %10072 = vmatprep.mubr.msk.bf16.mxu1 %vm307_vm0, %v12435_v52  ;;  %v13665_v52 = vld [vmem:[#allocation25_spill] sm:$0xff] }
 0x40c   : > { %v12553_v49 = vsel %vm1601_vm4, %v5225_v45, %v5235_v19  ;;  %v13546_v45 = vshrl.u32 %v12477_v10, 16 }
 0x412   : > { %10073 = vmatmul.mubr.msk.bf16.vlgmr.msra.gmra.mrb[64].mxu1 %vm307_vm0, %v13661_v50 }
 0x413   : > { %10105 = vmatpush3.bf16.msra.mxu1 %v5356_v51  ;;  %10076 = vmatprep.mubr.msk.bf16.mxu1 %vm307_vm0, %v10995_v58  ;;  %v5242_v51 = vor.u32 %v5240_v1, %v5239_v25 }
 0x414   : > { %10934 = vmatprep.subr.msk.bf16.mxu1 %vm1436_vm2, %v8894_v14  ;;  %v5246_v14 = vrot.slane %v5244_v24, 7 }
 0x415   : > { %v12560_v58 = vsel %vm1601_vm4, %v5232_v33, %v5242_v51  ;;  %v13547_v33 = vshrl.u32 %v12481_v28, 16 }
 0x417   : > { %v5281_v19 = vrot.slane %v13547_v33, 7 }
 0x41a   : > { %10077 = vmatmul.mubr.msk.bf16.gmra.mrb[68].mxu1 %vm307_vm0, %v10996_v27  ;;  %v5247_v27 = vshll.u32 %v12461_v4, 16 }
 0x41b   : > { %10080 = vmatprep.mubr.msk.bf16.mxu1 %vm307_vm0, %v12449_v48 }
 0x41c   : > { %v5249_v21 = vor.u32 %v5247_v27, %v5246_v14 }
 0x41e   : > { %v12575_v47 = vsel %vm1601_vm4, %v5239_v25, %v5249_v21  ;;  %v5274_v25 = vrot.slane %v13546_v45, 7  ;;  %v13549_v21 = vshll.u32 %v12481_v28, 16  ;;  %v5295_v45 = vrot.slane %v13551_v39, 7 }
 0x422   : > { %10081 = vmatmul.mubr.msk.bf16.gmra.mrb[72].mxu1 %vm307_vm0, %v12453_v55 }
 0x423   : > { %10084 = vmatprep.mubr.msk.bf16.mxu1 %vm307_vm0, %v12457_v57 }
 0x42a   : > { %10085 = vmatmul.mubr.msk.bf16.gmra.mrb[76].mxu1 %vm307_vm0, %v12461_v4 }
 0x42b   : > { %10088 = vmatprep.mubr.msk.bf16.mxu1 %vm307_vm0, %v12465_v6 }
 0x432   : > { %10089 = vmatmul.mubr.msk.bf16.gmra.mrb[80].mxu1 %vm307_vm0, %v12469_v60 }
 0x433   : > { %10092 = vmatprep.mubr.msk.bf16.mxu1 %vm307_vm0, %v12473_v44 }
 0x43a   : > { %10093 = vmatmul.mubr.msk.bf16.gmra.mrb[84].mxu1 %vm307_vm0, %v12477_v10 }
 0x43b   : > { %10096 = vmatprep.mubr.msk.bf16.mxu1 %vm307_vm0, %v12481_v28 }
 0x442   : > { %10097 = vmatmul.mubr.msk.bf16.gmra.mrb[88].mxu1 %vm307_vm0, %v12486_v37 }
 0x443   : > { %10100 = vmatprep.mubr.msk.bf16.mxu1 %vm307_vm0, %v12492_v11 }
 0x44a   : > { %10101 = vmatmul.mubr.msk.bf16.gmra.mrb[92].mxu1 %vm307_vm0, %v12501_v40 }
 0x44b   : > { %10106 = vmatprep.mubr.msk.bf16.mxu1 %vm307_vm0, %v5201_v20  ;;  %v5267_v20 = vrot.slane %v13557_v36, 7 }
 0x452   : > { %10107 = vmatmul.mubr.msk.bf16.vlgmr.msra.gmra.mrb[64].mxu1 %vm307_vm0, %v5208_v46  ;;  %v5263_v46 = vor.u32 %v5261_v31, %v5260_v7 }
 0x453   : > { %10139 = vmatpush3.bf16.msra.mxu1 %v5718_v61  ;;  %10110 = vmatprep.mubr.msk.bf16.mxu1 %vm307_vm0, %v5215_v38  ;;  %v5268_v61 = vshll.u32 %v12473_v44, 16 }
 0x454   : > { %10935 = vmatprep.subr.msk.bf16.mxu1 %vm1436_vm2, %v12515_v5 }
 0x455   : > { %v5270_v38 = vor.u32 %v5268_v61, %v5267_v20 }
 0x457   : > { %v12604_v51 = vsel %vm1601_vm4, %v5260_v7, %v5270_v38 }
 0x45a   : > { %10111 = vmatmul.mubr.msk.bf16.gmra.mrb[68].mxu1 %vm307_vm0, %v12295_v42  ;;  %v5251_v42 = vshrl.u32 %v12465_v6, 16 }
 0x45b   : > { %10114 = vmatprep.mubr.msk.bf16.mxu1 %vm307_vm0, %v5229_v16 }
 0x45c   : > { %v5253_v50 = vrot.slane %v5251_v42, 7 }
 0x45e   : > { %v5256_v3 = vor.u32 %v5254_v62, %v5253_v50  ;;  %v12597_v16 = vsel %vm1601_vm4, %v5253_v50, %v5263_v46  ;;  %v5284_v46 = vor.u32 %v13549_v21, %v5281_v19  ;;  %v13556_v21 = vshll.u32 %v12492_v11, 16 }
 0x460   : > { %v12582_v9 = vsel %vm1601_vm4, %v5246_v14, %v5256_v3  ;;  %v13548_v14 = vshll.u32 %v12477_v10, 16  ;;  %v13550_v3 = vshrl.u32 %v12486_v37, 16  ;;  %v12626_v33 = vsel %vm1601_vm4, %v5274_v25, %v5284_v46 }
 0x462   : > { %10115 = vmatmul.mubr.msk.bf16.gmra.mrb[72].mxu1 %vm307_vm0, %v12553_v49  ;;  %v5277_v50 = vor.u32 %v13548_v14, %v5274_v25  ;;  %v5288_v7 = vrot.slane %v13550_v3, 7  ;;  %v13552_v14 = vshll.u32 %v12486_v37, 16  ;;  %v5298_v3 = vor.u32 %v13556_v21, %v5295_v45 }
 0x463   : > { %10118 = vmatprep.mubr.msk.bf16.mxu1 %vm307_vm0, %v12560_v58 }
 0x464   : > { %v12619_v38 = vsel %vm1601_vm4, %v5267_v20, %v5277_v50  ;;  %v5291_v20 = vor.u32 %v13552_v14, %v5288_v7  ;;  %v13554_v50 = vshrl.u32 %v12501_v40, 16  ;;  %v12647_v46 = vsel %vm1601_vm4, %v5288_v7, %v5298_v3  ;;  %v13664_v3 = vld [vmem:[#allocation24_spill] sm:$0xff] }
 0x465   : > { %v5542_v14 = vrot.slane %v5198_v23, 1  ;;  %v6112_v7 = vsel %vm1436_vm2, %v12515_v5, 0 }
 0x466   : > { %v12639_v39 = vrot.slane %v13554_v50, 7  ;;  %v12642_v25 = vsel %vm1601_vm4, %v5281_v19, %v5291_v20 }
 0x467   : > { %v5543_v19 = vor.u32 %v5542_v14, %v5195_v63  ;;  %v5571_v63 = vrot.slane %v5226_v43, 1 }
 0x468   : > { %v5305_v50 = vor.u32 %v13555_v0, %v12639_v39  ;;  %v12672_v0 = vld [vmem:[%s13469_s4 + $0x8] sm:$0x3] }
 0x469   : > { %v5548_v23 = vsel %vm1949_vm3, %v5543_v19, %v13664_v3  ;;  %v5575_v5 = vor.u32 %v5571_v63, %v5223_v22  ;;  %v5572_v14 = vsel %vm1949_vm3, %v13660_v59, %v5571_v63  ;;  %v9257_v19 = vld [vmem:[%s11095_s18 + $0x8] sm:$0xff]  }
 0x46a   : > { %10119 = vmatmul.mubr.msk.bf16.gmra.mrb[76].mxu1 %vm307_vm0, %v12575_v47  ;;  %v12660_v20 = vsel %vm1601_vm4, %v5295_v45, %v5305_v50  ;;  %v5579_v45 = vrot.slane %v5233_v13, 1  ;;  %v5595_v13 = vrot.slane %v5247_v27, 1 }
 0x46b   : > { %10122 = vmatprep.mubr.msk.bf16.mxu1 %vm307_vm0, %v12582_v9 }
 0x46c   : > { %v5580_v43 = vsel %vm1949_vm3, %v5575_v5, %v5579_v45  ;;  %v5583_v22 = vor.u32 %v5579_v45, %v5230_v54  ;;  %v12710_v54 = vld [vmem:[%s13472_s7] ss:$0 sm:$0xff]  ;;  %v9136_v5 = vunpack.c.h.bf16 %v9257_v19 }
 0x472   : > { %10123 = vmatmul.mubr.msk.bf16.gmra.mrb[80].mxu1 %vm307_vm0, %v12597_v16 }
 0x473   : > { %10126 = vmatprep.mubr.msk.bf16.mxu1 %vm307_vm0, %v12604_v51 }
 0x47a   : > { %10127 = vmatmul.mubr.msk.bf16.gmra.mrb[84].mxu1 %vm307_vm0, %v12619_v38 }
 0x47b   : > { %10130 = vmatprep.mubr.msk.bf16.mxu1 %vm307_vm0, %v12626_v33 }
 0x482   : > { %10131 = vmatmul.mubr.msk.bf16.gmra.mrb[88].mxu1 %vm307_vm0, %v12642_v25 }
 0x483   : > { %10134 = vmatprep.mubr.msk.bf16.mxu1 %vm307_vm0, %v12647_v46 }
 0x48a   : > { %10135 = vmatmul.mubr.msk.bf16.gmra.mrb[92].mxu1 %vm307_vm0, %v12660_v20 }
 0x48b   : > { %10140 = vmatprep.mubr.msk.bf16.mxu1 %vm307_vm0, %v5548_v23  ;;  %v9130_v23 = vld [vmem:[%s11095_s18] sm:$0xff]  }
 0x492   : > { %10141 = vmatmul.mubr.msk.bf16.vlgmr.msra.gmra.mrb[64].mxu1 %vm307_vm0, %v13665_v52 }
 0x493   : > { %10173 = vmatpush3.bf16.msra.mxu1 %v6112_v7  ;;  %10144 = vmatprep.mubr.msk.bf16.mxu1 %vm307_vm0, %v13659_v35  ;;  %v5587_v35 = vrot.slane %v5240_v1, 1  ;;  %v5603_v1 = vrot.slane %v5254_v62, 1  ;;  %v9131_v7 = vunpack.c.l.bf16 %v9130_v23 }
 0x494   : > { %10936 = vmatprep.subr.msk.bf16.mxu1 %vm1436_vm2, %v12672_v0 }
 0x495   : > { %v5591_v50 = vor.u32 %v5587_v35, %v5237_v30  ;;  %v5588_v59 = vsel %vm1949_vm3, %v5583_v22, %v5587_v35  ;;  %v9135_v30 = vunpack.c.l.bf16 %v9257_v19  ;;  %v5607_v45 = vor.u32 %v5603_v1, %v5251_v42 }
 0x496   : > { %v5599_v35 = vor.u32 %v5595_v13, %v5244_v24  ;;  %v9258_v24 = vld [vmem:[%s11095_s18 + $0x10] sm:$0xff]  }
 0x497   : > { %v5596_v3 = vsel %vm1949_vm3, %v5591_v50, %v5595_v13  ;;  %v5619_v13 = vrot.slane %v5268_v61, 1 }
 0x498   : > { %v5604_v42 = vsel %vm1949_vm3, %v5599_v35, %v5603_v1 }
 0x49a   : > { %10145 = vmatmul.mubr.msk.bf16.gmra.mrb[68].mxu1 %vm307_vm0, %v5572_v14 }
 0x49b   : > { %10148 = vmatprep.mubr.msk.bf16.mxu1 %vm307_vm0, %v5580_v43  ;;  %v9132_v43 = vunpack.c.h.bf16 %v9130_v23 }
 0x4a2   : > { %10149 = vmatmul.mubr.msk.bf16.gmra.mrb[72].mxu1 %vm307_vm0, %v5588_v59 }
 0x4a3   : > { %10152 = vmatprep.mubr.msk.bf16.mxu1 %vm307_vm0, %v5596_v3  ;;  %v5611_v3 = vrot.slane %v5261_v31, 1 }
 0x4a5   : > { %v10040_v27 = vpop.f32.mrb[32].mxu1  ;;  %v5612_v23 = vsel %vm1949_vm3, %v5607_v45, %v5611_v3 }
 0x4a6   : > { %v4553_v52 = vadd.f32 %v10040_v27, %v12710_v54  ;;  %v4544_v63 = vpop.f32.mrb[33].mxu1 }
 0x4a7   : > { %v4545_v62 = vadd.f32 %v12710_v54, %v4544_v63  ;;  %v10041_v14 = vpop.f32.mrb[34].mxu1  ;;  %v9259_v63 = vld [vmem:[%s11095_s18 + $0x18] sm:$0xff]  }
 0x4a8   : > { %v4737_v50 = vadd.f32 %v9135_v30, %v4553_v52  ;;  %v4556_v22 = vadd.f32 %v10041_v14, %v12710_v54  ;;  %v4547_v59 = vpop.f32.mrb[35].mxu1  ;;  %v9143_v52 = vunpack.c.l.bf16 %v9259_v63 }
 0x4a9   : > { %v4735_v19 = vadd.f32 %v9131_v7, %v4545_v62  ;;  %v4548_v27 = vadd.f32 %v12710_v54, %v4547_v59  ;;  %v9139_v62 = vunpack.c.l.bf16 %v9258_v24 }
 0x4aa   : > { %v4769_v21 = vmax.f32 %v4737_v50, 0.0  ;;  %v4738_v36 = vadd.f32 %v9136_v5, %v4556_v22  ;;  %10153 = vmatmul.mubr.msk.bf16.gmra.mrb[76].mxu1 %vm307_vm0, %v5604_v42  ;;  %v9144_v22 = vunpack.c.h.bf16 %v9259_v63  ;;  %v13667_v42 = vshrl.u32 %v12469_v60, 16 }
 0x4ab   : > { %v4767_v31 = vmax.f32 %v4735_v19, 0.0  ;;  %v4736_v1 = vadd.f32 %v9132_v43, %v4548_v27  ;;  %10156 = vmatprep.mubr.msk.bf16.mxu1 %vm307_vm0, %v5612_v23  ;;  %v13666_v43 = vshrl.u32 %v12473_v44, 16  ;;  %v9140_v27 = vunpack.c.h.bf16 %v9258_v24 }
 0x4ac   : > { %v9067_v30 = vpack.c.bf16 %v4769_v21, %v4769_v21  ;;  %v4770_v7 = vmax.f32 %v4738_v36, 0.0  ;;  %v5615_v23 = vor.u32 %v5611_v3, %v13667_v42 }
 0x4ad   : > { %v9065_v5 = vpack.c.bf16 %v4767_v31, %v4767_v31  ;;  %v4768_v45 = vmax.f32 %v4736_v1, 0.0  ;;  %v10044_v61 = vpop.f32.mrb[36].mxu1  ;;  %v5623_v59 = vor.u32 %v5619_v13, %v13666_v43 }
 0x4ae   : > { %4930 = vst.msk [vmem:[%s12734_s29 + $0x8] sm:$0xf] %vm4927_vm5, %v9067_v30  ;;  %v9068_v14 = vpack.c.bf16 %v4770_v7, %v4770_v7  ;;  %v4569_v35 = vadd.f32 %v10044_v61, %v12710_v54  ;;  %v4560_v50 = vpop.f32.mrb[37].mxu1  ;;  %v13668_v30 = vshll.u32 %v12477_v10, 16  ;;  %v5620_v24 = vsel %vm1949_vm3, %v5615_v23, %v5619_v13  ;;  %v9261_v61 = vld [vmem:[%s11095_s18 + $0x28] sm:$0xff]  }
 0x4af   : > { %4928 = vst.msk [vmem:[%s12734_s29] sm:$0xf] %vm4927_vm5, %v9065_v5  ;;  %v9066_v36 = vpack.c.bf16 %v4768_v45, %v4768_v45  ;;  %v4561_v21 = vadd.f32 %v12710_v54, %v4560_v50  ;;  %v10045_v19 = vpop.f32.mrb[38].mxu1  ;;  %v9151_v13 = vunpack.c.l.bf16 %v9261_v61 }
 0x4b0   : > { %4931 = vst.msk [vmem:[%s12734_s29 + $0xc] sm:$0xf] %vm4927_vm5, %v9068_v14  ;;  %v4741_v31 = vadd.f32 %v9143_v52, %v4569_v35  ;;  %v4572_v63 = vadd.f32 %v10045_v19, %v12710_v54  ;;  %v4563_v1 = vpop.f32.mrb[39].mxu1  ;;  %v5627_v7 = vrot.slane %v13668_v30, 1  ;;  %v9260_v14 = vld [vmem:[%s11095_s18 + $0x20] sm:$0xff]   ;;  %v13669_v35 = vshll.u32 %v12481_v28, 16 }
 0x4b1   : > { %4929 = vst.msk [vmem:[%s12734_s29 + $0x4] sm:$0xf] %vm4927_vm5, %v9066_v36  ;;  %v4739_v5 = vadd.f32 %v9139_v62, %v4561_v21  ;;  %v4564_v45 = vadd.f32 %v12710_v54, %v4563_v1  ;;  %v9152_v30 = vunpack.c.h.bf16 %v9261_v61 }
 0x4b2   : > { %v4773_v50 = vmax.f32 %v4741_v31, 0.0  ;;  %v4742_v3 = vadd.f32 %v9144_v22, %v4572_v63  ;;  %10157 = vmatmul.mubr.msk.bf16.gmra.mrb[80].mxu1 %vm307_vm0, %v5620_v24  ;;  %v5628_v52 = vsel %vm1949_vm3, %v5623_v59, %v5627_v7  ;;  %v5635_v43 = vrot.slane %v13669_v35, 1 }
 0x4b3   : > { %v4771_v19 = vmax.f32 %v4739_v5, 0.0  ;;  %v4740_v36 = vadd.f32 %v9140_v27, %v4564_v45  ;;  %10160 = vmatprep.mubr.msk.bf16.mxu1 %vm307_vm0, %v5628_v52  ;;  %v9147_v31 = vunpack.c.l.bf16 %v9260_v14  ;;  %v13670_v27 = vshrl.u32 %v12481_v28, 16 }
 0x4b4   : > { %v9071_v62 = vpack.c.bf16 %v4773_v50, %v4773_v50  ;;  %v4774_v21 = vmax.f32 %v4742_v3, 0.0  ;;  %v9148_v3 = vunpack.c.h.bf16 %v9260_v14  ;;  %v13671_v52 = vshrl.u32 %v12477_v10, 16 }
 0x4b5   : > { %v9069_v42 = vpack.c.bf16 %v4771_v19, %v4771_v19  ;;  %v4772_v23 = vmax.f32 %v4740_v36, 0.0  ;;  %v10048_v22 = vpop.f32.mrb[40].mxu1  ;;  %v5639_v5 = vor.u32 %v5635_v43, %v13670_v27 }
 0x4b6   : > { %4934 = vst.msk [vmem:[%s12734_s29 + $0x18] sm:$0xf] %vm4927_vm5, %v9071_v62  ;;  %v9072_v59 = vpack.c.bf16 %v4774_v21, %v4774_v21  ;;  %v4585_v63 = vadd.f32 %v10048_v22, %v12710_v54  ;;  %v4576_v1 = vpop.f32.mrb[41].mxu1  ;;  %v5631_v35 = vor.u32 %v5627_v7, %v13671_v52  ;;  %v13672_v62 = vshll.u32 %v12486_v37, 16  ;;  %v9263_v22 = vld [vmem:[%s11095_s18 + $0x38] sm:$0xff]  }
 0x4b7   : > { %4932 = vst.msk [vmem:[%s12734_s29 + $0x10] sm:$0xf] %vm4927_vm5, %v9069_v42  ;;  %v9070_v45 = vpack.c.bf16 %v4772_v23, %v4772_v23  ;;  %v4577_v24 = vadd.f32 %v12710_v54, %v4576_v1  ;;  %v10049_v50 = vpop.f32.mrb[42].mxu1 }
 0x4b8   : > { %4935 = vst.msk [vmem:[%s12734_s29 + $0x1c] sm:$0xf] %vm4927_vm5, %v9072_v59  ;;  %v4745_v19 = vadd.f32 %v9151_v13, %v4585_v63  ;;  %v4588_v61 = vadd.f32 %v10049_v50, %v12710_v54  ;;  %v4579_v36 = vpop.f32.mrb[43].mxu1  ;;  %v5643_v21 = vrot.slane %v13672_v62, 1  ;;  %v5636_v14 = vsel %vm1949_vm3, %v5631_v35, %v5635_v43  ;;  %v9262_v59 = vld [vmem:[%s11095_s18 + $0x30] sm:$0xff]  }
 0x4b9   : > { %4933 = vst.msk [vmem:[%s12734_s29 + $0x14] sm:$0xf] %vm4927_vm5, %v9070_v45  ;;  %v4743_v42 = vadd.f32 %v9147_v31, %v4577_v24  ;;  %v4580_v23 = vadd.f32 %v12710_v54, %v4579_v36  ;;  %v13673_v63 = vshll.u32 %v12492_v11, 16  ;;  %v9159_v43 = vunpack.c.l.bf16 %v9263_v22 }
 0x4ba   : > { %v4777_v1 = vmax.f32 %v4745_v19, 0.0  ;;  %v4746_v7 = vadd.f32 %v9152_v30, %v4588_v61  ;;  %10161 = vmatmul.mubr.msk.bf16.gmra.mrb[84].mxu1 %vm307_vm0, %v5636_v14  ;;  %v5644_v13 = vsel %vm1949_vm3, %v5639_v5, %v5643_v21  ;;  %v9155_v30 = vunpack.c.l.bf16 %v9262_v59 }
 0x4bb   : > { %v5651_v27 = vrot.slane %v13673_v63, 1  ;;  %v4775_v50 = vmax.f32 %v4743_v42, 0.0  ;;  %v4744_v52 = vadd.f32 %v9148_v3, %v4580_v23  ;;  %10164 = vmatprep.mubr.msk.bf16.mxu1 %vm307_vm0, %v5644_v13  ;;  %v9160_v62 = vunpack.c.h.bf16 %v9263_v22  ;;  %v5535_v23 = vld [vmem:[#allocation2 + $0x110] sm:$0x1] }
 0x4bc   : > { %v9075_v31 = vpack.c.bf16 %v4777_v1, %v4777_v1  ;;  %v4778_v45 = vmax.f32 %v4746_v7, 0.0  ;;  %v13674_v3 = vshrl.u32 %v12492_v11, 16  ;;  %v9156_v13 = vunpack.c.h.bf16 %v9262_v59 }
 0x4bd   : > { %v9073_v24 = vpack.c.bf16 %v4775_v50, %v4775_v50  ;;  %v4776_v35 = vmax.f32 %v4744_v52, 0.0  ;;  %v10052_v19 = vpop.f32.mrb[44].mxu1  ;;  %v13675_v63 = vshrl.u32 %v12486_v37, 16  ;;  %v5913_v52 = vld [vmem:[#allocation2 + $0x98] sm:$0x80] }
 0x4be   : > { %4938 = vst.msk [vmem:[%s12734_s29 + $0x28] sm:$0xf] %vm4927_vm5, %v9075_v31  ;;  %v9076_v5 = vpack.c.bf16 %v4778_v45, %v4778_v45  ;;  %v4601_v61 = vadd.f32 %v10052_v19, %v12710_v54  ;;  %v4592_v36 = vpop.f32.mrb[45].mxu1  ;;  %v5655_v42 = vor.u32 %v5651_v27, %v13674_v3  ;;  %v13676_v19 = vshll.u32 %v12501_v40, 16  ;;  %v9265_v3 = vld [vmem:[%s11095_s18 + $0x48] sm:$0xff]  }
 0x4bf   : > { %4936 = vst.msk [vmem:[%s12734_s29 + $0x20] sm:$0xf] %vm4927_vm5, %v9073_v24  ;;  %v9074_v14 = vpack.c.bf16 %v4776_v35, %v4776_v35  ;;  %v4593_v1 = vadd.f32 %v12710_v54, %v4592_v36  ;;  %v10053_v7 = vpop.f32.mrb[46].mxu1  ;;  %v5647_v50 = vor.u32 %v5643_v21, %v13675_v63  ;;  %v5665_v21 = vshll.u32 %v5535_v23, 16 }
 0x4c0   : > { %4939 = vst.msk [vmem:[%s12734_s29 + $0x2c] sm:$0xf] %vm4927_vm5, %v9076_v5  ;;  %v4749_v22 = vadd.f32 %v9159_v43, %v4601_v61  ;;  %v4604_v31 = vadd.f32 %v10053_v7, %v12710_v54  ;;  %v4595_v45 = vpop.f32.mrb[47].mxu1  ;;  %v5659_v24 = vrot.slane %v13676_v19, 1  ;;  %v9264_v5 = vld [vmem:[%s11095_s18 + $0x40] sm:$0xff]   ;;  %v5932_v61 = vshrl.u32 %v5913_v52, 16 }
 0x4c1   : > { %4937 = vst.msk [vmem:[%s12734_s29 + $0x24] sm:$0xf] %vm4927_vm5, %v9074_v14  ;;  %v4747_v35 = vadd.f32 %v9155_v30, %v4593_v1  ;;  %v4596_v36 = vadd.f32 %v12710_v54, %v4595_v45  ;;  %v5652_v59 = vsel %vm1949_vm3, %v5647_v50, %v5651_v27  ;;  %v9167_v1 = vunpack.c.l.bf16 %v9265_v3  ;;  %v13677_v27 = vld [vmem:[#allocation26_spill] sm:$0xff] }
 0x4c2   : > { %v4781_v63 = vmax.f32 %v4749_v22, 0.0  ;;  %v4750_v32 = vadd.f32 %v9160_v62, %v4604_v31  ;;  %10165 = vmatmul.mubr.msk.bf16.gmra.mrb[88].mxu1 %vm307_vm0, %v5652_v59  ;;  %v5660_v43 = vsel %vm1949_vm3, %v5655_v42, %v5659_v24  ;;  %v13678_v50 = vshrl.u32 %v13677_v27, 16 }
 0x4c3   : > { %v4779_v7 = vmax.f32 %v4747_v35, 0.0  ;;  %v4748_v19 = vadd.f32 %v9156_v13, %v4596_v36  ;;  %10168 = vmatprep.mubr.msk.bf16.mxu1 %vm307_vm0, %v5660_v43  ;;  %v9163_v45 = vunpack.c.l.bf16 %v9264_v5  ;;  %v5667_v42 = vrot.slane %v5665_v21, 1 }
 0x4c4   : > { %v9079_v30 = vpack.c.bf16 %v4781_v63, %v4781_v63  ;;  %v4782_v14 = vmax.f32 %v4750_v32, 0.0  ;;  %v12815_v23 = vrot.slane %v13678_v50, 7  ;;  %v9168_v36 = vunpack.c.h.bf16 %v9265_v3 }
 0x4c5   : > { %v9077_v62 = vpack.c.bf16 %v4779_v7, %v4779_v7  ;;  %v4780_v22 = vmax.f32 %v4748_v19, 0.0  ;;  %v10056_v31 = vpop.f32.mrb[48].mxu1  ;;  %v5934_v32 = vrot.slane %v5932_v61, 7  ;;  %v9164_v7 = vunpack.c.h.bf16 %v9264_v5 }
 0x4c6   : > { %4942 = vst.msk [vmem:[%s12734_s29 + $0x38] sm:$0xf] %vm4927_vm5, %v9079_v30  ;;  %v9080_v52 = vpack.c.bf16 %v4782_v14, %v4782_v14  ;;  %v4617_v13 = vadd.f32 %v10056_v31, %v12710_v54  ;;  %v4608_v35 = vpop.f32.mrb[49].mxu1  ;;  %v13679_v19 = vshrl.u32 %v12501_v40, 16  ;;  %v13680_v3 = vshll.u32 %v13677_v27, 16  ;;  %v9267_v31 = vld [vmem:[%s11095_s18 + $0x58] sm:$0xff]  }
 0x4c7   : > { %4940 = vst.msk [vmem:[%s12734_s29 + $0x30] sm:$0xf] %vm4927_vm5, %v9077_v62  ;;  %v9078_v59 = vpack.c.bf16 %v4780_v22, %v4780_v22  ;;  %v4609_v63 = vadd.f32 %v12710_v54, %v4608_v35  ;;  %v10057_v43 = vpop.f32.mrb[50].mxu1  ;;  %v9266_v27 = vld [vmem:[%s11095_s18 + $0x50] sm:$0xff]  }
 0x4c8   : > { %v5663_v21 = vor.u32 %v5659_v24, %v13679_v19  ;;  %4943 = vst.msk [vmem:[%s12734_s29 + $0x3c] sm:$0xf] %vm4927_vm5, %v9080_v52  ;;  %v4753_v30 = vadd.f32 %v9167_v1, %v4617_v13  ;;  %v4620_v14 = vadd.f32 %v10057_v43, %v12710_v54  ;;  %v4611_v50 = vpop.f32.mrb[51].mxu1  ;;  %v5941_v61 = vor.u32 %v13680_v3, %v12815_v23  ;;  %v13681_v24 = vld [vmem:[#allocation27_spill] sm:$0xff] }
 0x4c9   : > { %4941 = vst.msk [vmem:[%s12734_s29 + $0x34] sm:$0xf] %vm4927_vm5, %v9078_v59  ;;  %v4751_v62 = vadd.f32 %v9163_v45, %v4609_v63  ;;  %v4612_v22 = vadd.f32 %v12710_v54, %v4611_v50  ;;  %v13682_v35 = vshrl.u32 %v13681_v24, 16 }
 0x4ca   : > { %v5668_v5 = vsel %vm1949_vm3, %v5663_v21, %v5667_v42  ;;  %v4785_v52 = vmax.f32 %v4753_v30, 0.0  ;;  %v4754_v1 = vadd.f32 %v9168_v36, %v4620_v14  ;;  %v5942_v13 = vsel %vm1601_vm4, %v5934_v32, %v5941_v61 }
 0x4cb   : > { %v5946_v19 = vrot.slane %v13682_v35, 7  ;;  %10169 = vmatmul.mubr.msk.bf16.gmra.mrb[92].mxu1 %vm307_vm0, %v5668_v5  ;;  %v4783_v43 = vmax.f32 %v4751_v62, 0.0  ;;  %v4752_v59 = vadd.f32 %v9164_v7, %v4612_v22  ;;  %v9175_v42 = vunpack.c.l.bf16 %v9267_v31 }
 0x4cc   : > { %10174 = vmatprep.mubr.msk.bf16.mxu1 %vm307_vm0, %v5942_v13  ;;  %v9083_v45 = vpack.c.bf16 %v4785_v52, %v4785_v52  ;;  %v4786_v63 = vmax.f32 %v4754_v1, 0.0  ;;  %v9171_v30 = vunpack.c.l.bf16 %v9266_v27  ;;  %v13683_v36 = vshll.u32 %v13681_v24, 16 }
 0x4cd   : > { %v9081_v21 = vpack.c.bf16 %v4783_v43, %v4783_v43  ;;  %v4784_v50 = vmax.f32 %v4752_v59, 0.0  ;;  %v10060_v3 = vpop.f32.mrb[52].mxu1  ;;  %v9176_v62 = vunpack.c.h.bf16 %v9267_v31  ;;  %v9172_v52 = vunpack.c.h.bf16 %v9266_v27  ;;  %v12864_v27 = vld [vmem:[%s13469_s4 + $0xa] sm:$0x3] }
 0x4ce   : > { %v5949_v14 = vor.u32 %v13683_v36, %v5946_v19  ;;  %4946 = vst.msk [vmem:[%s12734_s29 + $0x48] sm:$0xf] %vm4927_vm5, %v9083_v45  ;;  %v9084_v32 = vpack.c.bf16 %v4786_v63, %v4786_v63  ;;  %v4633_v61 = vadd.f32 %v10060_v3, %v12710_v54  ;;  %v4624_v7 = vpop.f32.mrb[53].mxu1  ;;  %v6341_v43 = vsel %vm1436_vm2, %v12672_v0, 0  ;;  %v9269_v63 = vld [vmem:[%s11095_s18 + $0x68] sm:$0xff]  }
 0x4cf   : > { %4944 = vst.msk [vmem:[%s12734_s29 + $0x40] sm:$0xf] %vm4927_vm5, %v9081_v21  ;;  %v9082_v22 = vpack.c.bf16 %v4784_v50, %v4784_v50  ;;  %v4625_v5 = vadd.f32 %v12710_v54, %v4624_v7  ;;  %v10061_v35 = vpop.f32.mrb[54].mxu1  ;;  %v5958_v0 = vsel %vm1601_vm4, %v5946_v19, %v12529_v8  ;;  %v9268_v50 = vld [vmem:[%s11095_s18 + $0x60] sm:$0xff]  }
 0x4d0   : > { %4947 = vst.msk [vmem:[%s12734_s29 + $0x4c] sm:$0xf] %vm4927_vm5, %v9084_v32  ;;  %v4757_v24 = vadd.f32 %v9175_v42, %v4633_v61  ;;  %v4636_v1 = vadd.f32 %v10061_v35, %v12710_v54  ;;  %v4627_v13 = vpop.f32.mrb[55].mxu1  ;;  %v5950_v45 = vsel %vm1601_vm4, %v12815_v23, %v5949_v14  ;;  %v9183_v14 = vunpack.c.l.bf16 %v9269_v63 }
 0x4d1   : > { %4945 = vst.msk [vmem:[%s12734_s29 + $0x44] sm:$0xf] %vm4927_vm5, %v9082_v22  ;;  %v4755_v31 = vadd.f32 %v9171_v30, %v4625_v5  ;;  %v4628_v59 = vadd.f32 %v12710_v54, %v4627_v13  ;;  %v9184_v5 = vunpack.c.h.bf16 %v9269_v63  ;;  %v9271_v63 = vld [vmem:[%s11095_s18 + $0x78] sm:$0xff]  }
 0x4d2   : > { %v4789_v42 = vmax.f32 %v4757_v24, 0.0  ;;  %v4758_v21 = vadd.f32 %v9176_v62, %v4636_v1  ;;  %v9179_v62 = vunpack.c.l.bf16 %v9268_v50  ;;  %v9180_v1 = vunpack.c.h.bf16 %v9268_v50 }
 0x4d3   : > { %10175 = vmatmul.mubr.msk.bf16.vlgmr.msra.gmra.mrb[64].mxu1 %vm307_vm0, %v5950_v45  ;;  %v4787_v3 = vmax.f32 %v4755_v31, 0.0  ;;  %v4756_v30 = vadd.f32 %v9172_v52, %v4628_v59 }
 0x4d4   : > { %10207 = vmatpush3.bf16.msra.mxu1 %v6341_v43  ;;  %10178 = vmatprep.mubr.msk.bf16.mxu1 %vm307_vm0, %v5958_v0  ;;  %v9087_v23 = vpack.c.bf16 %v4789_v42, %v4789_v42  ;;  %v4790_v36 = vmax.f32 %v4758_v21, 0.0  ;;  %v9270_v0 = vld [vmem:[%s11095_s18 + $0x70] sm:$0xff]  }
 0x4d5   : > { %10937 = vmatprep.subr.msk.bf16.mxu1 %vm1436_vm2, %v12864_v27  ;;  %v9085_v32 = vpack.c.bf16 %v4787_v3, %v4787_v3  ;;  %v4788_v61 = vmax.f32 %v4756_v30, 0.0  ;;  %v10064_v7 = vpop.f32.mrb[56].mxu1 }
 0x4d6   : > { %4950 = vst.msk [vmem:[%s12734_s29 + $0x58] sm:$0xf] %vm4927_vm5, %v9087_v23  ;;  %v9088_v8 = vpack.c.bf16 %v4790_v36, %v4790_v36  ;;  %v4649_v19 = vadd.f32 %v10064_v7, %v12710_v54  ;;  %v4640_v22 = vpop.f32.mrb[57].mxu1  ;;  %v9191_v36 = vunpack.c.l.bf16 %v9271_v63  ;;  %v9187_v7 = vunpack.c.l.bf16 %v9270_v0 }
 0x4d7   : > { %4948 = vst.msk [vmem:[%s12734_s29 + $0x50] sm:$0xf] %vm4927_vm5, %v9085_v32  ;;  %v9086_v35 = vpack.c.bf16 %v4788_v61, %v4788_v61  ;;  %v4641_v52 = vadd.f32 %v12710_v54, %v4640_v22  ;;  %v10065_v24 = vpop.f32.mrb[58].mxu1 }
 0x4d8   : > { %4951 = vst.msk [vmem:[%s12734_s29 + $0x5c] sm:$0xf] %vm4927_vm5, %v9088_v8  ;;  %v4761_v13 = vadd.f32 %v9183_v14, %v4649_v19  ;;  %v4652_v43 = vadd.f32 %v10065_v24, %v12710_v54  ;;  %v4643_v31 = vpop.f32.mrb[59].mxu1  ;;  %v9192_v19 = vunpack.c.h.bf16 %v9271_v63 }
 0x4d9   : > { %4949 = vst.msk [vmem:[%s12734_s29 + $0x54] sm:$0xf] %vm4927_vm5, %v9086_v35  ;;  %v4759_v59 = vadd.f32 %v9179_v62, %v4641_v52  ;;  %v4644_v45 = vadd.f32 %v12710_v54, %v4643_v31  ;;  %v9188_v35 = vunpack.c.h.bf16 %v9270_v0 }
 0x4da   : > { %v4793_v42 = vmax.f32 %v4761_v13, 0.0  ;;  %v4762_v21 = vadd.f32 %v9184_v5, %v4652_v43 }
 0x4db   : > { %10179 = vmatmul.mubr.msk.bf16.gmra.mrb[68].mxu1 %vm307_vm0, %v12553_v49  ;;  %v4791_v50 = vmax.f32 %v4759_v59, 0.0  ;;  %v4760_v3 = vadd.f32 %v9180_v1, %v4644_v45 }
 0x4dc   : > { %10182 = vmatprep.mubr.msk.bf16.mxu1 %vm307_vm0, %v12560_v58  ;;  %v9091_v30 = vpack.c.bf16 %v4793_v42, %v4793_v42  ;;  %v4794_v23 = vmax.f32 %v4762_v21, 0.0 }
 0x4dd   : > { %v9089_v14 = vpack.c.bf16 %v4791_v50, %v4791_v50  ;;  %v4792_v32 = vmax.f32 %v4760_v3, 0.0  ;;  %v10068_v61 = vpop.f32.mrb[60].mxu1 }
 0x4de   : > { %4954 = vst.msk [vmem:[%s12734_s29 + $0x68] sm:$0xf] %vm4927_vm5, %v9091_v30  ;;  %v9092_v62 = vpack.c.bf16 %v4794_v23, %v4794_v23  ;;  %v4665_v49 = vadd.f32 %v10068_v61, %v12710_v54  ;;  %v4656_v8 = vpop.f32.mrb[61].mxu1  ;;  %v10998_v61 = vld [vmem:[#allocation2 + $0xa8] sm:$0xff] }
 0x4df   : > { %4952 = vst.msk [vmem:[%s12734_s29 + $0x60] sm:$0xf] %vm4927_vm5, %v9089_v14  ;;  %v9090_v22 = vpack.c.bf16 %v4792_v32, %v4792_v32  ;;  %v4657_v58 = vadd.f32 %v12710_v54, %v4656_v8  ;;  %v10069_v5 = vpop.f32.mrb[62].mxu1  ;;  %v10997_v32 = vld [vmem:[#allocation2 + $0xa0] sm:$0xff] }
 0x4e0   : > { %4955 = vst.msk [vmem:[%s12734_s29 + $0x6c] sm:$0xf] %vm4927_vm5, %v9092_v62  ;;  %v4765_v52 = vadd.f32 %v9191_v36, %v4665_v49  ;;  %v4668_v24 = vadd.f32 %v10069_v5, %v12710_v54  ;;  %v4659_v1 = vpop.f32.mrb[63].mxu1  ;;  %v13032_v5 = vld [vmem:[#allocation2 + $0xd8] sm:$0xff] }
 0x4e1   : > { %4953 = vst.msk [vmem:[%s12734_s29 + $0x64] sm:$0xf] %vm4927_vm5, %v9090_v22  ;;  %v4763_v13 = vadd.f32 %v9187_v7, %v4657_v58  ;;  %v4660_v43 = vadd.f32 %v12710_v54, %v4659_v1  ;;  %v13018_v7 = vld [vmem:[#allocation2 + $0xb8] sm:$0xff]  ;;  %v6610_v1 = vshll.u32 %v13032_v5, 16 }
 0x4e2   : > { %v4797_v31 = vmax.f32 %v4765_v52, 0.0  ;;  %v4766_v59 = vadd.f32 %v9192_v19, %v4668_v24  ;;  %v6582_v62 = vshrl.u32 %v13018_v7, 16 }
 0x4e3   : > { %10183 = vmatmul.mubr.msk.bf16.gmra.mrb[72].mxu1 %vm307_vm0, %v12575_v47  ;;  %v4795_v45 = vmax.f32 %v4763_v13, 0.0  ;;  %v4764_v63 = vadd.f32 %v9188_v35, %v4660_v43  ;;  %v13684_v47 = vld [vmem:[#allocation30_spill] sm:$0xff] }
 0x4e4   : > { %10186 = vmatprep.mubr.msk.bf16.mxu1 %vm307_vm0, %v12582_v9  ;;  %v9095_v42 = vpack.c.bf16 %v4797_v31, %v4797_v31  ;;  %v4798_v21 = vmax.f32 %v4766_v59, 0.0  ;;  %v13685_v9 = vshrl.u32 %v13684_v47, 16  ;;  %v6584_v19 = vor.u32 %v6582_v62, %v12052_v56  ;;  %v13043_v56 = vld [vmem:[#allocation2 + $0xe0] sm:$0xff] }
 0x4e5   : > { %v9093_v0 = vpack.c.bf16 %v4795_v45, %v4795_v45  ;;  %v4796_v50 = vmax.f32 %v4764_v63, 0.0  ;;  %v6618_v31 = vshll.u32 %v13043_v56, 16  ;;  %v6612_v45 = vrot.slane %v6610_v1, 1 }
 0x4e6   : > { %4958 = vst.msk [vmem:[%s12734_s29 + $0x78] sm:$0xf] %vm4927_vm5, %v9095_v42  ;;  %v9096_v3 = vpack.c.bf16 %v4798_v21, %v4798_v21  ;;  %v6050_v30 = vrot.slane %v13685_v9, 7  ;;  %v13058_v42 = vld [vmem:[#allocation2 + $0xe8] sm:$0xff] }
 0x4e7   : > { %4956 = vst.msk [vmem:[%s12734_s29 + $0x70] sm:$0xf] %vm4927_vm5, %v9093_v0  ;;  %v9094_v54 = vpack.c.bf16 %v4796_v50, %v4796_v50  ;;  %v6620_v0 = vrot.slane %v6618_v31, 1  ;;  %v13069_v50 = vld [vmem:[#allocation2 + $0xf0] sm:$0xff] }
 0x4e8   : > { %4959 = vst.msk [vmem:[%s12734_s29 + $0x7c] sm:$0xf] %vm4927_vm5, %v9096_v3  ;;  %v6622_v3 = vshrl.u32 %v13043_v56, 16 }
 0x4e9   : > { %4957 = vst.msk [vmem:[%s12734_s29 + $0x74] sm:$0xf] %vm4927_vm5, %v9094_v54  ;;  %v6626_v54 = vshll.u32 %v13058_v42, 16 }
 0x4ea   : > { %v6624_v9 = vor.u32 %v6622_v3, %v6620_v0 }
 0x4eb   : > { %10187 = vmatmul.mubr.msk.bf16.gmra.mrb[76].mxu1 %vm307_vm0, %v12597_v16  ;;  %v13686_v16 = vshll.u32 %v13684_v47, 16  ;;  %v6614_v47 = vshrl.u32 %v13032_v5, 16 }
 0x4ec   : > { %10190 = vmatprep.mubr.msk.bf16.mxu1 %vm307_vm0, %v12604_v51  ;;  %v13687_v51 = vld [vmem:[#allocation31_spill] sm:$0xff] }
 0x4ed   : > { %v12931_v23 = vor.u32 %v13686_v16, %v6050_v30  ;;  %v13688_v36 = vshrl.u32 %v13687_v51, 16  ;;  %v6616_v16 = vor.u32 %v6614_v47, %v6612_v45 }
 0x4ef   : > { %v12935_v14 = vrot.slane %v13688_v36, 7  ;;  %v13082_v36 = vsel %vm1949_vm3, %v6616_v16, %v6620_v0 }
 0x4f3   : > { %10191 = vmatmul.mubr.msk.bf16.gmra.mrb[80].mxu1 %vm307_vm0, %v12619_v38  ;;  %v13689_v38 = vshll.u32 %v13687_v51, 16  ;;  %v6628_v51 = vrot.slane %v6626_v54, 1 }
 0x4f4   : > { %10194 = vmatprep.mubr.msk.bf16.mxu1 %vm307_vm0, %v12626_v33  ;;  %v6054_v33 = vsel %vm1601_vm4, %v12639_v39, %v12931_v23  ;;  %v8962_v39 = vld [vmem:[%s13469_s4 + $0xc] sm:$0x3] }
 0x4fb   : > { %10195 = vmatmul.mubr.msk.bf16.gmra.mrb[84].mxu1 %vm307_vm0, %v12642_v25  ;;  %v6061_v25 = vor.u32 %v13689_v38, %v12935_v14  ;;  %v13089_v38 = vsel %vm1949_vm3, %v6624_v9, %v6628_v51  ;;  %v6552_v9 = vld [vmem:[#allocation2 + $0x120] sm:$0x1] }
 0x4fc   : > { %10198 = vmatprep.mubr.msk.bf16.mxu1 %vm307_vm0, %v12647_v46  ;;  %v6682_v16 = vshll.u32 %v6552_v9, 16  ;;  %v6963_v9 = vrot.slane %v6582_v62, 7 }
 0x4fd   : > { %v12947_v46 = vsel %vm1601_vm4, %v6050_v30, %v6061_v25  ;;  %v6634_v30 = vshll.u32 %v13069_v50, 16 }
 0x4ff   : > { %v6636_v25 = vrot.slane %v6634_v30, 1 }
 0x503   : > { %10199 = vmatmul.mubr.msk.bf16.gmra.mrb[88].mxu1 %vm307_vm0, %v12660_v20  ;;  %v6735_v20 = vsel %vm1436_vm2, %v12864_v27, 0 }
 0x504   : > { %10202 = vmatprep.mubr.msk.bf16.mxu1 %vm307_vm0, %v6054_v33  ;;  %v13084_v33 = vld [vmem:[#allocation2 + $0xf8] sm:$0xff] }
 0x50b   : > { %10203 = vmatmul.mubr.msk.bf16.gmra.mrb[92].mxu1 %vm307_vm0, %v12947_v46 }
 0x50c   : > { %10208 = vmatprep.mubr.msk.bf16.mxu1 %vm307_vm0, %v10997_v32  ;;  %v13095_v32 = vld [vmem:[#allocation2 + $0x100] sm:$0xff] }
 0x513   : > { %10209 = vmatmul.mubr.msk.bf16.vlgmr.msra.gmra.mrb[64].mxu1 %vm307_vm0, %v10998_v61  ;;  %v6630_v61 = vshrl.u32 %v13058_v42, 16 }
 0x514   : > { %10241 = vmatpush3.bf16.msra.mxu1 %v6735_v20  ;;  %10212 = vmatprep.mubr.msk.bf16.mxu1 %vm307_vm0, %v12449_v48  ;;  %v12983_v48 = vld [vmem:[#allocation2 + $0x110] sm:$0xff]  ;;  %v6638_v20 = vshrl.u32 %v13069_v50, 16 }
 0x515   : > { %10938 = vmatprep.subr.msk.bf16.mxu1 %vm1436_vm2, %v8962_v39 }
 0x51b   : > { %10213 = vmatmul.mubr.msk.bf16.gmra.mrb[68].mxu1 %vm307_vm0, %v12453_v55  ;;  %v12987_v55 = vld [vmem:[#allocation2 + $0x118] sm:$0xff] }
 0x51c   : > { %10216 = vmatprep.mubr.msk.bf16.mxu1 %vm307_vm0, %v12457_v57  ;;  %v13690_v57 = vld [vmem:[#allocation28_spill] sm:$0xff] }
 0x523   : > { %10217 = vmatmul.mubr.msk.bf16.gmra.mrb[72].mxu1 %vm307_vm0, %v12461_v4  ;;  %v12993_v4 = vld [vmem:[#allocation2 + $0xc0] sm:$0xff] }
 0x524   : > { %10220 = vmatprep.mubr.msk.bf16.mxu1 %vm307_vm0, %v12465_v6  ;;  %v6586_v6 = vshll.u32 %v12993_v4, 16 }
 0x52b   : > { %10221 = vmatmul.mubr.msk.bf16.gmra.mrb[76].mxu1 %vm307_vm0, %v12469_v60  ;;  %v7129_v60 = vsel %vm1436_vm2, %v8962_v39, 0  ;;  %v13559_v39 = vshll.u32 %v13084_v33, 16 }
 0x52c   : > { %10224 = vmatprep.mubr.msk.bf16.mxu1 %vm307_vm0, %v12473_v44  ;;  %v13691_v44 = vld [vmem:[#allocation29_spill] sm:$0xff] }
 0x533   : > { %10225 = vmatmul.mubr.msk.bf16.gmra.mrb[80].mxu1 %vm307_vm0, %v12477_v10  ;;  %v6573_v10 = vsel %vm1949_vm3, %v13691_v44, %v12039_v26  ;;  %v6590_v26 = vshrl.u32 %v12993_v4, 16  ;;  %v6632_v44 = vor.u32 %v6630_v61, %v6628_v51  ;;  %v6930_v51 = vld [vmem:[#allocation2 + $0xa8] sm:$0x80] }
 0x534   : > { %10228 = vmatprep.mubr.msk.bf16.mxu1 %vm307_vm0, %v12481_v28  ;;  %v13000_v28 = vld [vmem:[#allocation2 + $0xc8] sm:$0xff] }
 0x535   : > { %v6594_v27 = vshll.u32 %v13000_v28, 16  ;;  %v6598_v13 = vshrl.u32 %v13000_v28, 16 }
 0x537   : > { %v6596_v22 = vrot.slane %v6594_v27, 1 }
 0x539   : > { %v6600_v59 = vor.u32 %v6598_v13, %v6596_v22 }
 0x53b   : > { %10229 = vmatmul.mubr.msk.bf16.gmra.mrb[84].mxu1 %vm307_vm0, %v12486_v37  ;;  %v13005_v37 = vld [vmem:[%s13469_s4 + $0xe] sm:$0x3] }
 0x53c   : > { %10232 = vmatprep.mubr.msk.bf16.mxu1 %vm307_vm0, %v12492_v11  ;;  %v6588_v11 = vrot.slane %v6586_v6, 1 }
 0x53e   : > { %v6592_v49 = vor.u32 %v6590_v26, %v6588_v11  ;;  %v13030_v58 = vsel %vm1949_vm3, %v6584_v19, %v6588_v11  ;;  %v13106_v11 = vsel %vm1949_vm3, %v6632_v44, %v6636_v25  ;;  %v13693_v44 = vld [vmem:[#allocation32_spill] sm:$0xff] }
 0x540   : > { %v13037_v35 = vsel %vm1949_vm3, %v6592_v49, %v6596_v22  ;;  %v6654_v22 = vshrl.u32 %v13095_v32, 16 }
 0x543   : > { %10233 = vmatmul.mubr.msk.bf16.gmra.mrb[88].mxu1 %vm307_vm0, %v12501_v40  ;;  %v13012_v40 = vld [vmem:[#allocation2 + $0xd0] sm:$0xff] }
 0x544   : > { %10236 = vmatprep.mubr.msk.bf16.mxu1 %vm307_vm0, %v12983_v48  ;;  %v6602_v8 = vshll.u32 %v13012_v40, 16  ;;  %v6606_v24 = vshrl.u32 %v13012_v40, 16 }
 0x546   : > { %v6604_v52 = vrot.slane %v6602_v8, 1 }
 0x548   : > { %v6608_v43 = vor.u32 %v6606_v24, %v6604_v52  ;;  %v13056_v63 = vsel %vm1949_vm3, %v6600_v59, %v6604_v52  ;;  %v6646_v52 = vshrl.u32 %v13084_v33, 16 }
 0x54a   : > { %v13063_v21 = vsel %vm1949_vm3, %v6608_v43, %v6612_v45 }
 0x54b   : > { %10237 = vmatmul.mubr.msk.bf16.gmra.mrb[92].mxu1 %vm307_vm0, %v12987_v55 }
 0x54c   : > { %10242 = vmatprep.mubr.msk.bf16.mxu1 %vm307_vm0, %v13690_v57  ;;  %v6640_v57 = vor.u32 %v6638_v20, %v6636_v25  ;;  %v13692_v25 = vshrl.u32 %v12018_v53, 16 }
 0x553   : > { %10243 = vmatmul.mubr.msk.bf16.vlgmr.msra.gmra.mrb[64].mxu1 %vm307_vm0, %v6573_v10  ;;  %v6644_v10 = vrot.slane %v13559_v39, 1 }
 0x554   : > { %10275 = vmatpush3.bf16.msra.mxu1 %v7129_v60  ;;  %10246 = vmatprep.mubr.msk.bf16.mxu1 %vm307_vm0, %v12065_v2  ;;  %v13558_v60 = vshll.u32 %v13095_v32, 16 }
 0x555   : > { %10939 = vmatprep.subr.msk.bf16.mxu1 %vm1436_vm2, %v13005_v37  ;;  %v13111_v49 = vsel %vm1949_vm3, %v6640_v57, %v6644_v10  ;;  %v6648_v59 = vor.u32 %v6646_v52, %v6644_v10  ;;  %v6955_v57 = vrot.slane %v13692_v25, 7  ;;  %v6949_v10 = vshrl.u32 %v6930_v51, 16 }
 0x556   : > { %v6652_v19 = vrot.slane %v13558_v60, 1  ;;  %v6971_v25 = vrot.slane %v6590_v26, 7  ;;  %v13159_v26 = vld [vmem:[%s13469_s4 + $0x10] sm:$0x3] }
 0x558   : > { %v6656_v43 = vor.u32 %v6654_v22, %v6652_v19  ;;  %v13120_v45 = vsel %vm1949_vm3, %v6648_v59, %v6652_v19  ;;  %v6684_v19 = vrot.slane %v6682_v16, 1  ;;  %v6951_v59 = vrot.slane %v6949_v10, 7 }
 0x559   : > { %v13695_v16 = vshll.u32 %v12033_v18, 16  ;;  %v6974_v51 = vor.u32 %v6971_v25, %v6586_v6  ;;  %v6987_v6 = vrot.slane %v6606_v24, 7  ;;  %v7003_v10 = vrot.slane %v6622_v3, 7 }
 0x55a   : > { %v13126_v0 = vsel %vm1949_vm3, %v6656_v43, %v12044_v17  ;;  %v13694_v17 = vshll.u32 %v12018_v53, 16  ;;  %v6685_v60 = vsel %vm1949_vm3, %v12026_v15, %v6684_v19  ;;  %v7358_v15 = vsel %vm1436_vm2, %v13005_v37, 0 }
 0x55b   : > { %10247 = vmatmul.mubr.msk.bf16.gmra.mrb[68].mxu1 %vm307_vm0, %v13030_v58  ;;  %v6966_v53 = vor.u32 %v6963_v9, %v13695_v16  ;;  %v6975_v18 = vsel %vm1601_vm4, %v6963_v9, %v6974_v51  ;;  %v7035_v9 = vrot.slane %v6654_v22, 7  ;;  %v13697_v16 = vshll.u32 %v13095_v32, 16 }
 0x55c   : > { %10250 = vmatprep.mubr.msk.bf16.mxu1 %vm307_vm0, %v13037_v35  ;;  %v6958_v43 = vor.u32 %v6955_v57, %v13694_v17  ;;  %v7011_v17 = vrot.slane %v6630_v61, 7  ;;  %v13699_v22 = vshll.u32 %v12020_v12, 16 }
 0x55d   : > { %v6967_v62 = vsel %vm1601_vm4, %v6955_v57, %v6966_v53  ;;  %v6995_v57 = vrot.slane %v6614_v47, 7  ;;  %v7038_v53 = vor.u32 %v7035_v9, %v13697_v16 }
 0x55e   : > { %v6959_v39 = vsel %vm1601_vm4, %v6951_v59, %v6958_v43  ;;  %v7019_v43 = vrot.slane %v6638_v20, 7  ;;  %v7014_v3 = vor.u32 %v7011_v17, %v6626_v54  ;;  %v7027_v59 = vrot.slane %v6646_v52, 7 }
 0x55f   : > { %v13696_v20 = vshll.u32 %v13084_v33, 16 }
 0x560   : > { %v7039_v52 = vsel %vm1601_vm4, %v7027_v59, %v7038_v53 }
 0x563   : > { %10251 = vmatmul.mubr.msk.bf16.gmra.mrb[72].mxu1 %vm307_vm0, %v13056_v63 }
 0x564   : > { %10254 = vmatprep.mubr.msk.bf16.mxu1 %vm307_vm0, %v13063_v21 }
 0x56b   : > { %10255 = vmatmul.mubr.msk.bf16.gmra.mrb[76].mxu1 %vm307_vm0, %v13082_v36 }
 0x56c   : > { %10258 = vmatprep.mubr.msk.bf16.mxu1 %vm307_vm0, %v13089_v38 }
 0x573   : > { %10259 = vmatmul.mubr.msk.bf16.gmra.mrb[80].mxu1 %vm307_vm0, %v13106_v11 }
 0x574   : > { %10262 = vmatprep.mubr.msk.bf16.mxu1 %vm307_vm0, %v13111_v49 }
 0x57b   : > { %10263 = vmatmul.mubr.msk.bf16.gmra.mrb[84].mxu1 %vm307_vm0, %v13120_v45 }
 0x57c   : > { %10266 = vmatprep.mubr.msk.bf16.mxu1 %vm307_vm0, %v13126_v0 }
 0x583   : > { %10267 = vmatmul.mubr.msk.bf16.gmra.mrb[88].mxu1 %vm307_vm0, %v12068_v41 }
 0x584   : > { %10270 = vmatprep.mubr.msk.bf16.mxu1 %vm307_vm0, %v13693_v44 }
 0x58b   : > { %10271 = vmatmul.mubr.msk.bf16.gmra.mrb[92].mxu1 %vm307_vm0, %v6685_v60  ;;  %v6979_v60 = vrot.slane %v6598_v13, 7  ;;  %v6990_v13 = vor.u32 %v6987_v6, %v6602_v8  ;;  %v7006_v8 = vor.u32 %v7003_v10, %v6618_v31  ;;  %v7015_v31 = vsel %vm1601_vm4, %v7003_v10, %v7014_v3 }
 0x58c   : > { %10276 = vmatprep.mubr.msk.bf16.mxu1 %vm307_vm0, %v6959_v39 }
 0x58d   : > { %v6982_v37 = vor.u32 %v6979_v60, %v6594_v27  ;;  %v6991_v24 = vsel %vm1601_vm4, %v6979_v60, %v6990_v13  ;;  %v6998_v27 = vor.u32 %v6995_v57, %v6610_v1  ;;  %v7007_v47 = vsel %vm1601_vm4, %v6995_v57, %v7006_v8 }
 0x58e   : > { %v7022_v1 = vor.u32 %v7019_v43, %v6634_v30  ;;  %v13698_v30 = vshrl.u32 %v12020_v12, 16  ;;  %v13700_v57 = vshll.u32 %v12060_v34, 16  ;;  %v8027_v34 = vld [vmem:[%s13471_s6] sm:$0x3] }
 0x58f   : > { %v6983_v39 = vsel %vm1601_vm4, %v6971_v25, %v6982_v37  ;;  %v6999_v19 = vsel %vm1601_vm4, %v6987_v6, %v6998_v27  ;;  %v7030_v25 = vor.u32 %v7027_v59, %v13696_v20  ;;  %10941 = vmatprep.subr.msk.bf16.mxu0 %vm1436_vm2, %v8027_v34 }
 0x590   : > { %v7023_v61 = vsel %vm1601_vm4, %v7011_v17, %v7022_v1  ;;  %v7043_v51 = vrot.slane %v13698_v30, 7 }
 0x591   : > { %v7031_v54 = vsel %vm1601_vm4, %v7019_v43, %v7030_v25 }
 0x592   : > { %v7055_v37 = vsel %vm1601_vm4, %v7043_v51, %v12931_v23 }
 0x593   : > { %10277 = vmatmul.mubr.msk.bf16.vlgmr.msra.gmra.mrb[64].mxu1 %vm307_vm0, %v6967_v62  ;;  %v11002_v62 = vld [vmem:[#allocation2 + $0x120] sm:$0xff] }
 0x594   : > { %10309 = vmatpush3.bf16.msra.mxu1 %v7358_v15  ;;  %10280 = vmatprep.mubr.msk.bf16.mxu1 %vm307_vm0, %v6975_v18  ;;  %v7046_v15 = vor.u32 %v7043_v51, %v13699_v22  ;;  %v7065_v60 = vshrl.u32 %v11002_v62, 16  ;;  %v6946_v18 = vld [vmem:[#allocation2 + $0x128] sm:$0xff] }
 0x595   : > { %10940 = vmatprep.subr.msk.bf16.mxu1 %vm1436_vm2, %v13159_v26  ;;  %v7076_v12 = vshll.u32 %v6946_v18, 16 }
 0x596   : > { %v7047_v6 = vsel %vm1601_vm4, %v7035_v9, %v7046_v15  ;;  %v7067_v13 = vrot.slane %v7065_v60, 7 }
 0x59b   : > { %10281 = vmatmul.mubr.msk.bf16.gmra.mrb[68].mxu1 %vm307_vm0, %v6983_v39  ;;  %v7073_v39 = vshrl.u32 %v6946_v18, 16 }
 0x59c   : > { %10284 = vmatprep.mubr.msk.bf16.mxu1 %vm307_vm0, %v6991_v24  ;;  %v7070_v24 = vor.u32 %v13700_v57, %v7067_v13 }
 0x59d   : > { %v7075_v10 = vrot.slane %v7073_v39, 7 }
 0x59e   : > { %v7071_v27 = vsel %vm1601_vm4, %v12935_v14, %v7070_v24  ;;  %v7752_v14 = vsel %vm1436_vm2, %v13159_v26, 0 }
 0x59f   : > { %v7078_v8 = vor.u32 %v7076_v12, %v7075_v10 }
 0x5a1   : > { %v7079_v23 = vsel %vm1601_vm4, %v7067_v13, %v7078_v8 }
 0x5a3   : > { %10285 = vmatmul.mubr.msk.bf16.gmra.mrb[72].mxu1 %vm307_vm0, %v6999_v19  ;;  %v11003_v19 = vld [vmem:[#allocation2 + $0xb0] sm:$0xff] }
 0x5a4   : > { %10288 = vmatprep.mubr.msk.bf16.mxu1 %vm307_vm0, %v7007_v47 }
 0x5ab   : > { %10289 = vmatmul.mubr.msk.bf16.gmra.mrb[76].mxu1 %vm307_vm0, %v7015_v31 }
 0x5ac   : > { %10292 = vmatprep.mubr.msk.bf16.mxu1 %vm307_vm0, %v7023_v61 }
 0x5b3   : > { %10293 = vmatmul.mubr.msk.bf16.gmra.mrb[80].mxu1 %vm307_vm0, %v7031_v54 }
 0x5b4   : > { %10296 = vmatprep.mubr.msk.bf16.mxu1 %vm307_vm0, %v7039_v52 }
 0x5bb   : > { %10297 = vmatmul.mubr.msk.bf16.gmra.mrb[84].mxu1 %vm307_vm0, %v7047_v6 }
 0x5bc   : > { %10300 = vmatprep.mubr.msk.bf16.mxu1 %vm307_vm0, %v7055_v37 }
 0x5c3   : > { %10301 = vmatmul.mubr.msk.bf16.gmra.mrb[88].mxu1 %vm307_vm0, %v12947_v46  ;;  %v8077_v46 = vsel %vm1436_vm2, %v8027_v34, 0 }
 0x5c4   : > { %10304 = vmatprep.mubr.msk.bf16.mxu1 %vm307_vm0, %v7071_v27  ;;  %10377 = vmatpush3.bf16.msra.mxu0 %v8077_v46 }
 0x5cb   : > { %10305 = vmatmul.mubr.msk.bf16.gmra.mrb[92].mxu1 %vm307_vm0, %v7079_v23 }
 0x5cc   : > { %10310 = vmatprep.mubr.msk.bf16.mxu1 %vm307_vm0, %v11003_v19 }
 0x5d3   : > { %10311 = vmatmul.mubr.msk.bf16.vlgmr.msra.gmra.mrb[64].mxu1 %vm307_vm0, %v13018_v7  ;;  %v13701_v7 = vld [vmem:[#allocation33_spill] sm:$0xff] }
 0x5d4   : > { %10343 = vmatpush3.bf16.msra.mxu1 %v7752_v14  ;;  %10314 = vmatprep.mubr.msk.bf16.mxu1 %vm307_vm0, %v12993_v4  ;;  %v11004_v4 = vld [vmem:[#allocation2 + $0x108] sm:$0xff] }
 0x5db   : > { %10315 = vmatmul.mubr.msk.bf16.gmra.mrb[68].mxu1 %vm307_vm0, %v13000_v28 }
 0x5dc   : > { %10318 = vmatprep.mubr.msk.bf16.mxu1 %vm307_vm0, %v13012_v40 }
 0x5e3   : > { %10319 = vmatmul.mubr.msk.bf16.gmra.mrb[72].mxu1 %vm307_vm0, %v13032_v5 }
 0x5e4   : > { %10322 = vmatprep.mubr.msk.bf16.mxu1 %vm307_vm0, %v13043_v56 }
 0x5eb   : > { %10323 = vmatmul.mubr.msk.bf16.gmra.mrb[76].mxu1 %vm307_vm0, %v13058_v42 }
 0x5ec   : > { %10326 = vmatprep.mubr.msk.bf16.mxu1 %vm307_vm0, %v13069_v50 }
 0x5f3   : > { %10327 = vmatmul.mubr.msk.bf16.gmra.mrb[80].mxu1 %vm307_vm0, %v13084_v33 }
 0x5f4   : > { %10330 = vmatprep.mubr.msk.bf16.mxu1 %vm307_vm0, %v13095_v32 }
 0x5fb   : > { %10331 = vmatmul.mubr.msk.bf16.gmra.mrb[84].mxu1 %vm307_vm0, %v11004_v4 }
 0x5fc   : > { %10334 = vmatprep.mubr.msk.bf16.mxu1 %vm307_vm0, %v12983_v48  ;;  %v7693_v48 = vrot.slane %v7076_v12, 1 }
 0x603   : > { %10335 = vmatmul.mubr.msk.bf16.gmra.mrb[88].mxu1 %vm307_vm0, %v12987_v55  ;;  %v7569_v55 = vld [vmem:[#allocation2 + $0x130] sm:$0x1] }
 0x604   : > { %10338 = vmatprep.mubr.msk.bf16.mxu1 %vm307_vm0, %v11002_v62  ;;  %v7699_v28 = vshll.u32 %v7569_v55, 16 }
 0x606   : > { %v7701_v5 = vrot.slane %v7699_v28, 1 }
 0x60b   : > { %10339 = vmatmul.mubr.msk.bf16.gmra.mrb[92].mxu1 %vm307_vm0, %v6946_v18 }
 0x60c   : > { %10344 = vmatprep.mubr.msk.bf16.mxu1 %vm307_vm0, %v12065_v2  ;;  %v7689_v2 = vor.u32 %v12077_v29, %v7065_v60  ;;  %v13295_v29 = vld [vmem:[%s13470_s5] ss:$0 sm:$0xff] }
 0x60e   : > { %v7694_v40 = vsel %vm1949_vm3, %v7689_v2, %v7693_v48 }
 0x613   : > { %10345 = vmatmul.mubr.msk.bf16.vlgmr.msra.gmra.mrb[64].mxu1 %vm307_vm0, %v13030_v58  ;;  %v7697_v58 = vor.u32 %v7693_v48, %v7073_v39 }
 0x614   : > { %10348 = vmatprep.mubr.msk.bf16.mxu1 %vm307_vm0, %v13037_v35 }
 0x615   : > { %v7702_v35 = vsel %vm1949_vm3, %v7697_v58, %v7701_v5 }
 0x61b   : > { %10349 = vmatmul.mubr.msk.bf16.gmra.mrb[68].mxu1 %vm307_vm0, %v13056_v63 }
 0x61c   : > { %10352 = vmatprep.mubr.msk.bf16.mxu1 %vm307_vm0, %v13063_v21 }
 0x623   : > { %10353 = vmatmul.mubr.msk.bf16.gmra.mrb[72].mxu1 %vm307_vm0, %v13082_v36 }
 0x624   : > { %10356 = vmatprep.mubr.msk.bf16.mxu1 %vm307_vm0, %v13089_v38 }
 0x62b   : > { %10357 = vmatmul.mubr.msk.bf16.gmra.mrb[76].mxu1 %vm307_vm0, %v13106_v11 }
 0x62c   : > { %10360 = vmatprep.mubr.msk.bf16.mxu1 %vm307_vm0, %v13111_v49 }
 0x633   : > { %10361 = vmatmul.mubr.msk.bf16.gmra.mrb[80].mxu1 %vm307_vm0, %v13120_v45 }
 0x634   : > { %10364 = vmatprep.mubr.msk.bf16.mxu1 %vm307_vm0, %v13126_v0 }
 0x63b   : > { %10365 = vmatmul.mubr.msk.bf16.gmra.mrb[84].mxu1 %vm307_vm0, %v12068_v41 }
 0x63c   : > { %10368 = vmatprep.mubr.msk.bf16.mxu1 %vm307_vm0, %v13693_v44 }
 0x643   : > { %10369 = vmatmul.mubr.msk.bf16.gmra.mrb[88].mxu1 %vm307_vm0, %v13701_v7 }
 0x644   : > { %10372 = vmatprep.mubr.msk.bf16.mxu1 %vm307_vm0, %v7694_v40 }
 0x64b   : > { %10373 = vmatmul.mubr.msk.bf16.gmra.mrb[92].mxu1 %vm307_vm0, %v7702_v35 }
 0x6e6   : > { %v10346_v41 = vpop.f32.mrb[64].mxu1 }
 0x6e7   : > { %v7949_v56 = vadd.f32 %v13295_v29, %v10346_v41  ;;  %v7788_v63 = vpop.f32.mrb[65].mxu1 }
 0x6e8   : > { %v7947_v42 = vadd.f32 %v13295_v29, %v7788_v63  ;;  %v10347_v21 = vpop.f32.mrb[66].mxu1 }
 0x6e9   : > { %v7950_v50 = vadd.f32 %v13295_v29, %v10347_v21  ;;  %v7791_v36 = vpop.f32.mrb[67].mxu1  ;;  %v7981_v38 = vmax.f32 %v7949_v56, 0.0 }
 0x6ea   : > { %v7948_v33 = vadd.f32 %v13295_v29, %v7791_v36  ;;  %v7979_v11 = vmax.f32 %v7947_v42, 0.0 }
 0x6eb   : > { %v7982_v32 = vmax.f32 %v7950_v50, 0.0 }
 0x6ec   : > { %v7980_v49 = vmax.f32 %v7948_v33, 0.0 }
 0x6ed   : > { %v8012_v45 = vpack.c.bf16 %v7982_v32, %v7981_v38 }
 0x6ee   : > { %v8011_v0 = vpack.c.bf16 %v7980_v49, %v7979_v11  ;;  %v10350_v44 = vpop.f32.mrb[68].mxu1 }
 0x6ef   : > { %v7953_v26 = vadd.f32 %v13295_v29, %v10350_v44  ;;  %v7804_v17 = vpop.f32.mrb[69].mxu1 }
 0x6f0   : > { %v7951_v47 = vadd.f32 %v13295_v29, %v7804_v17  ;;  %v10351_v43 = vpop.f32.mrb[70].mxu1  ;;  %10378 = vmatprep.mubr.msk.bf16.mxu0 %vm307_vm0, %v8011_v0 }
 0x6f1   : > { %v7954_v3 = vadd.f32 %v13295_v29, %v10351_v43  ;;  %v7807_v1 = vpop.f32.mrb[71].mxu1  ;;  %10379 = vmatmul.mubr.msk.bf16.vlgmr.msra.gmra.mrb[64].mxu0 %vm307_vm0, %v8012_v45  ;;  %v7985_v59 = vmax.f32 %v7953_v26, 0.0 }
 0x6f2   : > { %v7952_v31 = vadd.f32 %v13295_v29, %v7807_v1  ;;  %v7983_v9 = vmax.f32 %v7951_v47, 0.0 }
 0x6f3   : > { %v7986_v61 = vmax.f32 %v7954_v3, 0.0 }
 0x6f4   : > { %v7984_v20 = vmax.f32 %v7952_v31, 0.0 }
 0x6f5   : > { %v8014_v25 = vpack.c.bf16 %v7986_v61, %v7985_v59 }
 0x6f6   : > { %v8013_v16 = vpack.c.bf16 %v7984_v20, %v7983_v9  ;;  %v10354_v53 = vpop.f32.mrb[72].mxu1 }
 0x6f7   : > { %v7957_v54 = vadd.f32 %v13295_v29, %v10354_v53  ;;  %v7820_v30 = vpop.f32.mrb[73].mxu1 }
 0x6f8   : > { %v7955_v51 = vadd.f32 %v13295_v29, %v7820_v30  ;;  %v10355_v52 = vpop.f32.mrb[74].mxu1  ;;  %10382 = vmatprep.mubr.msk.bf16.mxu0 %vm307_vm0, %v8013_v16 }
 0x6f9   : > { %v7958_v22 = vadd.f32 %v13295_v29, %v10355_v52  ;;  %v7823_v15 = vpop.f32.mrb[75].mxu1  ;;  %10383 = vmatmul.mubr.msk.bf16.gmra.mrb[68].mxu0 %vm307_vm0, %v8014_v25  ;;  %v7989_v60 = vmax.f32 %v7957_v54, 0.0 }
 0x6fa   : > { %v7956_v62 = vadd.f32 %v13295_v29, %v7823_v15  ;;  %v7987_v6 = vmax.f32 %v7955_v51, 0.0 }
 0x6fb   : > { %v7990_v18 = vmax.f32 %v7958_v22, 0.0 }
 0x6fc   : > { %v7988_v37 = vmax.f32 %v7956_v62, 0.0 }
 0x6fd   : > { %v8016_v13 = vpack.c.bf16 %v7990_v18, %v7989_v60 }
 0x6fe   : > { %v8015_v39 = vpack.c.bf16 %v7988_v37, %v7987_v6  ;;  %v10358_v57 = vpop.f32.mrb[76].mxu1 }
 0x6ff   : > { %v7961_v24 = vadd.f32 %v13295_v29, %v10358_v57  ;;  %v7836_v10 = vpop.f32.mrb[77].mxu1 }
 0x700   : > { %v7959_v12 = vadd.f32 %v13295_v29, %v7836_v10  ;;  %v10359_v27 = vpop.f32.mrb[78].mxu1  ;;  %10386 = vmatprep.mubr.msk.bf16.mxu0 %vm307_vm0, %v8015_v39 }
 0x701   : > { %v7962_v8 = vadd.f32 %v13295_v29, %v10359_v27  ;;  %v7839_v23 = vpop.f32.mrb[79].mxu1  ;;  %10387 = vmatmul.mubr.msk.bf16.gmra.mrb[72].mxu0 %vm307_vm0, %v8016_v13  ;;  %v7993_v19 = vmax.f32 %v7961_v24, 0.0 }
 0x702   : > { %v7960_v34 = vadd.f32 %v13295_v29, %v7839_v23  ;;  %v7991_v14 = vmax.f32 %v7959_v12, 0.0 }
 0x703   : > { %v7994_v46 = vmax.f32 %v7962_v8, 0.0 }
 0x704   : > { %v7992_v4 = vmax.f32 %v7960_v34, 0.0  ;;  %v9273_v34 = vld [vmem:[%s11095_s18 + $0x88] sm:$0xff]  }
 0x705   : > { %v8018_v2 = vpack.c.bf16 %v7994_v46, %v7993_v19  ;;  %v9272_v19 = vld [vmem:[%s11095_s18 + $0x80] sm:$0xff]   ;;  %v9199_v46 = vunpack.c.l.bf16 %v9273_v34 }
 0x706   : > { %v8017_v48 = vpack.c.bf16 %v7992_v4, %v7991_v14  ;;  %v10362_v55 = vpop.f32.mrb[80].mxu1  ;;  %v9195_v4 = vunpack.c.l.bf16 %v9272_v19 }
 0x707   : > { %v7965_v28 = vadd.f32 %v13295_v29, %v10362_v55  ;;  %v7852_v40 = vpop.f32.mrb[81].mxu1  ;;  %v9200_v55 = vunpack.c.h.bf16 %v9273_v34 }
 0x708   : > { %v7963_v7 = vadd.f32 %v13295_v29, %v7852_v40  ;;  %v10363_v58 = vpop.f32.mrb[82].mxu1  ;;  %10390 = vmatprep.mubr.msk.bf16.mxu0 %vm307_vm0, %v8017_v48 }
 0x709   : > { %v7966_v5 = vadd.f32 %v13295_v29, %v10363_v58  ;;  %v7855_v35 = vpop.f32.mrb[83].mxu1  ;;  %10391 = vmatmul.mubr.msk.bf16.gmra.mrb[76].mxu0 %vm307_vm0, %v8018_v2  ;;  %v7997_v56 = vmax.f32 %v7965_v28, 0.0 }
 0x70a   : > { %v7964_v41 = vadd.f32 %v13295_v29, %v7855_v35  ;;  %v7995_v42 = vmax.f32 %v7963_v7, 0.0  ;;  %v9196_v7 = vunpack.c.h.bf16 %v9272_v19 }
 0x70b   : > { %v7998_v63 = vmax.f32 %v7966_v5, 0.0 }
 0x70c   : > { %v7996_v21 = vmax.f32 %v7964_v41, 0.0 }
 0x70d   : > { %v8020_v50 = vpack.c.bf16 %v7998_v63, %v7997_v56  ;;  %v9275_v63 = vld [vmem:[%s11095_s18 + $0x98] sm:$0xff]  }
 0x70e   : > { %v8019_v36 = vpack.c.bf16 %v7996_v21, %v7995_v42  ;;  %v10366_v33 = vpop.f32.mrb[84].mxu1 }
 0x70f   : > { %v7969_v38 = vadd.f32 %v13295_v29, %v10366_v33  ;;  %v7868_v32 = vpop.f32.mrb[85].mxu1 }
 0x710   : > { %v7967_v11 = vadd.f32 %v13295_v29, %v7868_v32  ;;  %v10367_v49 = vpop.f32.mrb[86].mxu1  ;;  %10394 = vmatprep.mubr.msk.bf16.mxu0 %vm307_vm0, %v8019_v36 }
 0x711   : > { %v7970_v45 = vadd.f32 %v13295_v29, %v10367_v49  ;;  %v7871_v0 = vpop.f32.mrb[87].mxu1  ;;  %10395 = vmatmul.mubr.msk.bf16.gmra.mrb[80].mxu0 %vm307_vm0, %v8020_v50  ;;  %v8001_v26 = vmax.f32 %v7969_v38, 0.0  ;;  %v9274_v50 = vld [vmem:[%s11095_s18 + $0x90] sm:$0xff]  }
 0x712   : > { %v7968_v44 = vadd.f32 %v13295_v29, %v7871_v0  ;;  %v7999_v47 = vmax.f32 %v7967_v11, 0.0  ;;  %v9207_v11 = vunpack.c.l.bf16 %v9275_v63 }
 0x713   : > { %v8002_v17 = vmax.f32 %v7970_v45, 0.0 }
 0x714   : > { %v8000_v43 = vmax.f32 %v7968_v44, 0.0  ;;  %v9203_v44 = vunpack.c.l.bf16 %v9274_v50 }
 0x715   : > { %v8022_v3 = vpack.c.bf16 %v8002_v17, %v8001_v26 }
 0x716   : > { %v8021_v1 = vpack.c.bf16 %v8000_v43, %v7999_v47  ;;  %v10370_v31 = vpop.f32.mrb[88].mxu1  ;;  %v9208_v43 = vunpack.c.h.bf16 %v9275_v63 }
 0x717   : > { %v7973_v59 = vadd.f32 %v13295_v29, %v10370_v31  ;;  %v7884_v61 = vpop.f32.mrb[89].mxu1 }
 0x718   : > { %v7971_v9 = vadd.f32 %v13295_v29, %v7884_v61  ;;  %v10371_v20 = vpop.f32.mrb[90].mxu1  ;;  %10398 = vmatprep.mubr.msk.bf16.mxu0 %vm307_vm0, %v8021_v1 }
 0x719   : > { %v7974_v25 = vadd.f32 %v13295_v29, %v10371_v20  ;;  %v7887_v16 = vpop.f32.mrb[91].mxu1  ;;  %10399 = vmatmul.mubr.msk.bf16.gmra.mrb[84].mxu0 %vm307_vm0, %v8022_v3  ;;  %v8005_v54 = vmax.f32 %v7973_v59, 0.0  ;;  %v9204_v59 = vunpack.c.h.bf16 %v9274_v50 }
 0x71a   : > { %v7972_v53 = vadd.f32 %v13295_v29, %v7887_v16  ;;  %v8003_v51 = vmax.f32 %v7971_v9, 0.0 }
 0x71b   : > { %v8006_v30 = vmax.f32 %v7974_v25, 0.0 }
 0x71c   : > { %v8004_v52 = vmax.f32 %v7972_v53, 0.0  ;;  %v9277_v53 = vld [vmem:[%s11095_s18 + $0xa8] sm:$0xff]  }
 0x71d   : > { %v8024_v22 = vpack.c.bf16 %v8006_v30, %v8005_v54 }
 0x71e   : > { %v8023_v15 = vpack.c.bf16 %v8004_v52, %v8003_v51  ;;  %v10374_v62 = vpop.f32.mrb[92].mxu1  ;;  %v9276_v51 = vld [vmem:[%s11095_s18 + $0xa0] sm:$0xff]  }
 0x71f   : > { %v7977_v60 = vadd.f32 %v13295_v29, %v10374_v62  ;;  %v7900_v18 = vpop.f32.mrb[93].mxu1 }
 0x720   : > { %v7975_v6 = vadd.f32 %v13295_v29, %v7900_v18  ;;  %v10375_v37 = vpop.f32.mrb[94].mxu1  ;;  %10402 = vmatprep.mubr.msk.bf16.mxu0 %vm307_vm0, %v8023_v15 }
 0x721   : > { %v7978_v13 = vadd.f32 %v13295_v29, %v10375_v37  ;;  %v7903_v39 = vpop.f32.mrb[95].mxu1  ;;  %10403 = vmatmul.mubr.msk.bf16.gmra.mrb[88].mxu0 %vm307_vm0, %v8024_v22  ;;  %v8009_v24 = vmax.f32 %v7977_v60, 0.0  ;;  %v9215_v60 = vunpack.c.l.bf16 %v9277_v53 }
 0x722   : > { %v7976_v57 = vadd.f32 %v13295_v29, %v7903_v39  ;;  %v8007_v12 = vmax.f32 %v7975_v6, 0.0  ;;  %v13350_v29 = vld [vmem:[%s13472_s7] ss:$0 sm:$0xff] }
 0x723   : > { %v8010_v10 = vmax.f32 %v7978_v13, 0.0  ;;  %v9211_v13 = vunpack.c.l.bf16 %v9276_v51 }
 0x724   : > { %v8008_v27 = vmax.f32 %v7976_v57, 0.0 }
 0x725   : > { %v8026_v8 = vpack.c.bf16 %v8010_v10, %v8009_v24  ;;  %v9216_v10 = vunpack.c.h.bf16 %v9277_v53 }
 0x726   : > { %v8025_v23 = vpack.c.bf16 %v8008_v27, %v8007_v12 }
 0x728   : > { %10406 = vmatprep.mubr.msk.bf16.mxu0 %vm307_vm0, %v8025_v23  ;;  %v9212_v23 = vunpack.c.h.bf16 %v9276_v51 }
 0x729   : > { %10407 = vmatmul.mubr.msk.bf16.gmra.mrb[92].mxu0 %vm307_vm0, %v8026_v8 }
 0x7c4   : > { %v10380_v14 = vpop.f32.mrb[64].mxu0 }
 0x7c5   : > { %v8122_v2 = vadd.f32 %v13350_v29, %v10380_v14  ;;  %v8113_v48 = vpop.f32.mrb[65].mxu0 }
 0x7c6   : > { %v8114_v28 = vadd.f32 %v13350_v29, %v8113_v48  ;;  %v10381_v40 = vpop.f32.mrb[66].mxu0 }
 0x7c7   : > { %v8306_v58 = vadd.f32 %v9199_v46, %v8122_v2  ;;  %v8125_v5 = vadd.f32 %v13350_v29, %v10381_v40  ;;  %v8116_v35 = vpop.f32.mrb[67].mxu0  ;;  %v9279_v2 = vld [vmem:[%s11095_s18 + $0xb8] sm:$0xff]  }
 0x7c8   : > { %v8304_v41 = vadd.f32 %v9195_v4, %v8114_v28  ;;  %v8117_v56 = vadd.f32 %v13350_v29, %v8116_v35  ;;  %v9278_v28 = vld [vmem:[%s11095_s18 + $0xb0] sm:$0xff]   ;;  %v9223_v35 = vunpack.c.l.bf16 %v9279_v2 }
 0x7c9   : > { %v8338_v42 = vmax.f32 %v8306_v58, 0.0  ;;  %v8307_v21 = vadd.f32 %v9200_v55, %v8125_v5 }
 0x7ca   : > { %v8336_v36 = vmax.f32 %v8304_v41, 0.0  ;;  %v8305_v33 = vadd.f32 %v9196_v7, %v8117_v56 }
 0x7cb   : > { %v9099_v38 = vpack.c.bf16 %v8338_v42, %v8338_v42  ;;  %v8339_v32 = vmax.f32 %v8307_v21, 0.0  ;;  %v9219_v42 = vunpack.c.l.bf16 %v9278_v28 }
 0x7cc   : > { %v9097_v49 = vpack.c.bf16 %v8336_v36, %v8336_v36  ;;  %v8337_v45 = vmax.f32 %v8305_v33, 0.0  ;;  %v10384_v0 = vpop.f32.mrb[68].mxu0  ;;  %v9224_v33 = vunpack.c.h.bf16 %v9279_v2 }
 0x7cd   : > { %8498 = vst.msk [vmem:[%s12734_s29 + $0x88] sm:$0xf] %vm4927_vm5, %v9099_v38  ;;  %v9100_v26 = vpack.c.bf16 %v8339_v32, %v8339_v32  ;;  %v8138_v17 = vadd.f32 %v13350_v29, %v10384_v0  ;;  %v8129_v47 = vpop.f32.mrb[69].mxu0 }
 0x7ce   : > { %8496 = vst.msk [vmem:[%s12734_s29 + $0x80] sm:$0xf] %vm4927_vm5, %v9097_v49  ;;  %v9098_v3 = vpack.c.bf16 %v8337_v45, %v8337_v45  ;;  %v8130_v1 = vadd.f32 %v13350_v29, %v8129_v47  ;;  %v10385_v31 = vpop.f32.mrb[70].mxu0  ;;  %v9220_v49 = vunpack.c.h.bf16 %v9278_v28  ;;  %v9281_v47 = vld [vmem:[%s11095_s18 + $0xc8] sm:$0xff]  }
 0x7cf   : > { %8499 = vst.msk [vmem:[%s12734_s29 + $0x8c] sm:$0xf] %vm4927_vm5, %v9100_v26  ;;  %v8310_v61 = vadd.f32 %v9207_v11, %v8138_v17  ;;  %v8141_v9 = vadd.f32 %v13350_v29, %v10385_v31  ;;  %v8132_v20 = vpop.f32.mrb[71].mxu0 }
 0x7d0   : > { %8497 = vst.msk [vmem:[%s12734_s29 + $0x84] sm:$0xf] %vm4927_vm5, %v9098_v3  ;;  %v8308_v25 = vadd.f32 %v9203_v44, %v8130_v1  ;;  %v8133_v16 = vadd.f32 %v13350_v29, %v8132_v20  ;;  %v9280_v1 = vld [vmem:[%s11095_s18 + $0xc0] sm:$0xff]   ;;  %v9231_v20 = vunpack.c.l.bf16 %v9281_v47 }
 0x7d1   : > { %v8342_v54 = vmax.f32 %v8310_v61, 0.0  ;;  %v8311_v30 = vadd.f32 %v9208_v43, %v8141_v9 }
 0x7d2   : > { %v8340_v52 = vmax.f32 %v8308_v25, 0.0  ;;  %v8309_v22 = vadd.f32 %v9204_v59, %v8133_v16 }
 0x7d3   : > { %v9103_v15 = vpack.c.bf16 %v8342_v54, %v8342_v54  ;;  %v8343_v62 = vmax.f32 %v8311_v30, 0.0  ;;  %v9227_v54 = vunpack.c.l.bf16 %v9280_v1 }
 0x7d4   : > { %v9101_v18 = vpack.c.bf16 %v8340_v52, %v8340_v52  ;;  %v8341_v6 = vmax.f32 %v8309_v22, 0.0  ;;  %v10388_v37 = vpop.f32.mrb[72].mxu0  ;;  %v9232_v22 = vunpack.c.h.bf16 %v9281_v47 }
 0x7d5   : > { %8502 = vst.msk [vmem:[%s12734_s29 + $0x98] sm:$0xf] %vm4927_vm5, %v9103_v15  ;;  %v9104_v39 = vpack.c.bf16 %v8343_v62, %v8343_v62  ;;  %v8154_v57 = vadd.f32 %v13350_v29, %v10388_v37  ;;  %v8145_v24 = vpop.f32.mrb[73].mxu0 }
 0x7d6   : > { %8500 = vst.msk [vmem:[%s12734_s29 + $0x90] sm:$0xf] %vm4927_vm5, %v9101_v18  ;;  %v9102_v12 = vpack.c.bf16 %v8341_v6, %v8341_v6  ;;  %v8146_v27 = vadd.f32 %v13350_v29, %v8145_v24  ;;  %v10389_v8 = vpop.f32.mrb[74].mxu0  ;;  %v9228_v18 = vunpack.c.h.bf16 %v9280_v1  ;;  %v9283_v24 = vld [vmem:[%s11095_s18 + $0xd8] sm:$0xff]  }
 0x7d7   : > { %8503 = vst.msk [vmem:[%s12734_s29 + $0x9c] sm:$0xf] %vm4927_vm5, %v9104_v39  ;;  %v8314_v34 = vadd.f32 %v9215_v60, %v8154_v57  ;;  %v8157_v19 = vadd.f32 %v13350_v29, %v10389_v8  ;;  %v8148_v46 = vpop.f32.mrb[75].mxu0 }
 0x7d8   : > { %8501 = vst.msk [vmem:[%s12734_s29 + $0x94] sm:$0xf] %vm4927_vm5, %v9102_v12  ;;  %v8312_v14 = vadd.f32 %v9211_v13, %v8146_v27  ;;  %v8149_v4 = vadd.f32 %v13350_v29, %v8148_v46  ;;  %v9282_v27 = vld [vmem:[%s11095_s18 + $0xd0] sm:$0xff]   ;;  %v9239_v46 = vunpack.c.l.bf16 %v9283_v24 }
 0x7d9   : > { %v8346_v48 = vmax.f32 %v8314_v34, 0.0  ;;  %v8315_v55 = vadd.f32 %v9216_v10, %v8157_v19 }
 0x7da   : > { %v8344_v40 = vmax.f32 %v8312_v14, 0.0  ;;  %v8313_v7 = vadd.f32 %v9212_v23, %v8149_v4 }
 0x7db   : > { %v9107_v58 = vpack.c.bf16 %v8346_v48, %v8346_v48  ;;  %v8347_v5 = vmax.f32 %v8315_v55, 0.0  ;;  %v9235_v48 = vunpack.c.l.bf16 %v9282_v27 }
 0x7dc   : > { %v9105_v41 = vpack.c.bf16 %v8344_v40, %v8344_v40  ;;  %v8345_v56 = vmax.f32 %v8313_v7, 0.0  ;;  %v10392_v63 = vpop.f32.mrb[76].mxu0  ;;  %v9240_v7 = vunpack.c.h.bf16 %v9283_v24 }
 0x7dd   : > { %8506 = vst.msk [vmem:[%s12734_s29 + $0xa8] sm:$0xf] %vm4927_vm5, %v9107_v58  ;;  %v9108_v21 = vpack.c.bf16 %v8347_v5, %v8347_v5  ;;  %v8170_v50 = vadd.f32 %v13350_v29, %v10392_v63  ;;  %v8161_v36 = vpop.f32.mrb[77].mxu0 }
 0x7de   : > { %8504 = vst.msk [vmem:[%s12734_s29 + $0xa0] sm:$0xf] %vm4927_vm5, %v9105_v41  ;;  %v9106_v38 = vpack.c.bf16 %v8345_v56, %v8345_v56  ;;  %v8162_v32 = vadd.f32 %v13350_v29, %v8161_v36  ;;  %v10393_v11 = vpop.f32.mrb[78].mxu0  ;;  %v9236_v41 = vunpack.c.h.bf16 %v9282_v27  ;;  %v9285_v36 = vld [vmem:[%s11095_s18 + $0xe8] sm:$0xff]  }
 0x7df   : > { %8507 = vst.msk [vmem:[%s12734_s29 + $0xac] sm:$0xf] %vm4927_vm5, %v9108_v21  ;;  %v8318_v45 = vadd.f32 %v9223_v35, %v8170_v50  ;;  %v8173_v0 = vadd.f32 %v13350_v29, %v10393_v11  ;;  %v8164_v44 = vpop.f32.mrb[79].mxu0 }
 0x7e0   : > { %8505 = vst.msk [vmem:[%s12734_s29 + $0xa4] sm:$0xf] %vm4927_vm5, %v9106_v38  ;;  %v8316_v26 = vadd.f32 %v9219_v42, %v8162_v32  ;;  %v8165_v17 = vadd.f32 %v13350_v29, %v8164_v44  ;;  %v9284_v32 = vld [vmem:[%s11095_s18 + $0xe0] sm:$0xff]   ;;  %v9247_v44 = vunpack.c.l.bf16 %v9285_v36 }
 0x7e1   : > { %v8350_v43 = vmax.f32 %v8318_v45, 0.0  ;;  %v8319_v3 = vadd.f32 %v9224_v33, %v8173_v0 }
 0x7e2   : > { %v8348_v31 = vmax.f32 %v8316_v26, 0.0  ;;  %v8317_v59 = vadd.f32 %v9220_v49, %v8165_v17 }
 0x7e3   : > { %v9111_v61 = vpack.c.bf16 %v8350_v43, %v8350_v43  ;;  %v8351_v9 = vmax.f32 %v8319_v3, 0.0  ;;  %v9243_v43 = vunpack.c.l.bf16 %v9284_v32 }
 0x7e4   : > { %v9109_v25 = vpack.c.bf16 %v8348_v31, %v8348_v31  ;;  %v8349_v16 = vmax.f32 %v8317_v59, 0.0  ;;  %v10396_v53 = vpop.f32.mrb[80].mxu0  ;;  %v9248_v59 = vunpack.c.h.bf16 %v9285_v36 }
 0x7e5   : > { %8510 = vst.msk [vmem:[%s12734_s29 + $0xb8] sm:$0xf] %vm4927_vm5, %v9111_v61  ;;  %v9112_v30 = vpack.c.bf16 %v8351_v9, %v8351_v9  ;;  %v8186_v51 = vadd.f32 %v13350_v29, %v10396_v53  ;;  %v8177_v52 = vpop.f32.mrb[81].mxu0 }
 0x7e6   : > { %8508 = vst.msk [vmem:[%s12734_s29 + $0xb0] sm:$0xf] %vm4927_vm5, %v9109_v25  ;;  %v9110_v15 = vpack.c.bf16 %v8349_v16, %v8349_v16  ;;  %v8178_v62 = vadd.f32 %v13350_v29, %v8177_v52  ;;  %v10397_v60 = vpop.f32.mrb[82].mxu0  ;;  %v9244_v25 = vunpack.c.h.bf16 %v9284_v32  ;;  %v9287_v52 = vld [vmem:[%s11095_s18 + $0xf8] sm:$0xff]  }
 0x7e7   : > { %8511 = vst.msk [vmem:[%s12734_s29 + $0xbc] sm:$0xf] %vm4927_vm5, %v9112_v30  ;;  %v8322_v6 = vadd.f32 %v9231_v20, %v8186_v51  ;;  %v8189_v37 = vadd.f32 %v13350_v29, %v10397_v60  ;;  %v8180_v13 = vpop.f32.mrb[83].mxu0 }
 0x7e8   : > { %8509 = vst.msk [vmem:[%s12734_s29 + $0xb4] sm:$0xf] %vm4927_vm5, %v9110_v15  ;;  %v8320_v39 = vadd.f32 %v9227_v54, %v8178_v62  ;;  %v8181_v57 = vadd.f32 %v13350_v29, %v8180_v13  ;;  %v9286_v62 = vld [vmem:[%s11095_s18 + $0xf0] sm:$0xff]   ;;  %v9255_v13 = vunpack.c.l.bf16 %v9287_v52 }
 0x7e9   : > { %v8354_v10 = vmax.f32 %v8322_v6, 0.0  ;;  %v8323_v12 = vadd.f32 %v9232_v22, %v8189_v37 }
 0x7ea   : > { %v8352_v8 = vmax.f32 %v8320_v39, 0.0  ;;  %v8321_v23 = vadd.f32 %v9228_v18, %v8181_v57 }
 0x7eb   : > { %v9115_v34 = vpack.c.bf16 %v8354_v10, %v8354_v10  ;;  %v8355_v19 = vmax.f32 %v8323_v12, 0.0  ;;  %v9251_v10 = vunpack.c.l.bf16 %v9286_v62 }
 0x7ec   : > { %v9113_v14 = vpack.c.bf16 %v8352_v8, %v8352_v8  ;;  %v8353_v4 = vmax.f32 %v8321_v23, 0.0  ;;  %v10400_v2 = vpop.f32.mrb[84].mxu0  ;;  %v9256_v23 = vunpack.c.h.bf16 %v9287_v52 }
 0x7ed   : > { %8514 = vst.msk [vmem:[%s12734_s29 + $0xc8] sm:$0xf] %vm4927_vm5, %v9115_v34  ;;  %v9116_v55 = vpack.c.bf16 %v8355_v19, %v8355_v19  ;;  %v8202_v28 = vadd.f32 %v13350_v29, %v10400_v2  ;;  %v8193_v40 = vpop.f32.mrb[85].mxu0 }
 0x7ee   : > { %8512 = vst.msk [vmem:[%s12734_s29 + $0xc0] sm:$0xf] %vm4927_vm5, %v9113_v14  ;;  %v9114_v58 = vpack.c.bf16 %v8353_v4, %v8353_v4  ;;  %v8194_v5 = vadd.f32 %v13350_v29, %v8193_v40  ;;  %v10401_v35 = vpop.f32.mrb[86].mxu0  ;;  %v9252_v14 = vunpack.c.h.bf16 %v9286_v62 }
 0x7ef   : > { %8515 = vst.msk [vmem:[%s12734_s29 + $0xcc] sm:$0xf] %vm4927_vm5, %v9116_v55  ;;  %v8326_v56 = vadd.f32 %v9239_v46, %v8202_v28  ;;  %v8205_v63 = vadd.f32 %v13350_v29, %v10401_v35  ;;  %v8196_v42 = vpop.f32.mrb[87].mxu0 }
 0x7f0   : > { %8513 = vst.msk [vmem:[%s12734_s29 + $0xc4] sm:$0xf] %vm4927_vm5, %v9114_v58  ;;  %v8324_v21 = vadd.f32 %v9235_v48, %v8194_v5  ;;  %v8197_v50 = vadd.f32 %v13350_v29, %v8196_v42 }
 0x7f1   : > { %v8358_v33 = vmax.f32 %v8326_v56, 0.0  ;;  %v8327_v38 = vadd.f32 %v9240_v7, %v8205_v63 }
 0x7f2   : > { %v8356_v11 = vmax.f32 %v8324_v21, 0.0  ;;  %v8325_v49 = vadd.f32 %v9236_v41, %v8197_v50 }
 0x7f3   : > { %v9119_v45 = vpack.c.bf16 %v8358_v33, %v8358_v33  ;;  %v8359_v0 = vmax.f32 %v8327_v38, 0.0 }
 0x7f4   : > { %v9117_v26 = vpack.c.bf16 %v8356_v11, %v8356_v11  ;;  %v8357_v17 = vmax.f32 %v8325_v49, 0.0  ;;  %v10404_v47 = vpop.f32.mrb[88].mxu0 }
 0x7f5   : > { %8518 = vst.msk [vmem:[%s12734_s29 + $0xd8] sm:$0xf] %vm4927_vm5, %v9119_v45  ;;  %v9120_v3 = vpack.c.bf16 %v8359_v0, %v8359_v0  ;;  %v8218_v1 = vadd.f32 %v13350_v29, %v10404_v47  ;;  %v8209_v31 = vpop.f32.mrb[89].mxu0 }
 0x7f6   : > { %8516 = vst.msk [vmem:[%s12734_s29 + $0xd0] sm:$0xf] %vm4927_vm5, %v9117_v26  ;;  %v9118_v61 = vpack.c.bf16 %v8357_v17, %v8357_v17  ;;  %v8210_v9 = vadd.f32 %v13350_v29, %v8209_v31  ;;  %v10405_v20 = vpop.f32.mrb[90].mxu0 }
 0x7f7   : > { %8519 = vst.msk [vmem:[%s12734_s29 + $0xdc] sm:$0xf] %vm4927_vm5, %v9120_v3  ;;  %v8330_v16 = vadd.f32 %v9247_v44, %v8218_v1  ;;  %v8221_v53 = vadd.f32 %v13350_v29, %v10405_v20  ;;  %v8212_v54 = vpop.f32.mrb[91].mxu0 }
 0x7f8   : > { %8517 = vst.msk [vmem:[%s12734_s29 + $0xd4] sm:$0xf] %vm4927_vm5, %v9118_v61  ;;  %v8328_v30 = vadd.f32 %v9243_v43, %v8210_v9  ;;  %v8213_v51 = vadd.f32 %v13350_v29, %v8212_v54 }
 0x7f9   : > { %v8362_v22 = vmax.f32 %v8330_v16, 0.0  ;;  %v8331_v15 = vadd.f32 %v9248_v59, %v8221_v53 }
 0x7fa   : > { %v8360_v60 = vmax.f32 %v8328_v30, 0.0  ;;  %v8329_v18 = vadd.f32 %v9244_v25, %v8213_v51 }
 0x7fb   : > { %v9123_v6 = vpack.c.bf16 %v8362_v22, %v8362_v22  ;;  %v8363_v37 = vmax.f32 %v8331_v15, 0.0 }
 0x7fc   : > { %v9121_v39 = vpack.c.bf16 %v8360_v60, %v8360_v60  ;;  %v8361_v57 = vmax.f32 %v8329_v18, 0.0  ;;  %v10408_v24 = vpop.f32.mrb[92].mxu0 }
 0x7fd   : > { %8522 = vst.msk [vmem:[%s12734_s29 + $0xe8] sm:$0xf] %vm4927_vm5, %v9123_v6  ;;  %v9124_v12 = vpack.c.bf16 %v8363_v37, %v8363_v37  ;;  %v8234_v27 = vadd.f32 %v13350_v29, %v10408_v24  ;;  %v8225_v8 = vpop.f32.mrb[93].mxu0 }
 0x7fe   : > { %8520 = vst.msk [vmem:[%s12734_s29 + $0xe0] sm:$0xf] %vm4927_vm5, %v9121_v39  ;;  %v9122_v34 = vpack.c.bf16 %v8361_v57, %v8361_v57  ;;  %v8226_v19 = vadd.f32 %v13350_v29, %v8225_v8  ;;  %v10409_v46 = vpop.f32.mrb[94].mxu0 }
 0x7ff   : > { %8523 = vst.msk [vmem:[%s12734_s29 + $0xec] sm:$0xf] %vm4927_vm5, %v9124_v12  ;;  %v8334_v4 = vadd.f32 %v9255_v13, %v8234_v27  ;;  %v8237_v2 = vadd.f32 %v13350_v29, %v10409_v46  ;;  %v8228_v48 = vpop.f32.mrb[95].mxu0 }
 0x800   : > { %8521 = vst.msk [vmem:[%s12734_s29 + $0xe4] sm:$0xf] %vm4927_vm5, %v9122_v34  ;;  %v8332_v55 = vadd.f32 %v9251_v10, %v8226_v19  ;;  %v8229_v28 = vadd.f32 %v13350_v29, %v8228_v48 }
 0x801   : > { %v8366_v40 = vmax.f32 %v8334_v4, 0.0  ;;  %v8335_v7 = vadd.f32 %v9256_v23, %v8237_v2 }
 0x802   : > { %v8364_v58 = vmax.f32 %v8332_v55, 0.0  ;;  %v8333_v5 = vadd.f32 %v9252_v14, %v8229_v28 }
 0x803   : > { %v9127_v35 = vpack.c.bf16 %v8366_v40, %v8366_v40  ;;  %v8367_v41 = vmax.f32 %v8335_v7, 0.0 }
 0x804   : > { %v9125_v56 = vpack.c.bf16 %v8364_v58, %v8364_v58  ;;  %v8365_v63 = vmax.f32 %v8333_v5, 0.0 }
 0x805   : > { %8526 = vst.msk [vmem:[%s12734_s29 + $0xf8] sm:$0xf] %vm4927_vm5, %v9127_v35  ;;  %v9128_v42 = vpack.c.bf16 %v8367_v41, %v8367_v41 }
 0x806   : > { %8524 = vst.msk [vmem:[%s12734_s29 + $0xf0] sm:$0xf] %vm4927_vm5, %v9125_v56  ;;  %v9126_v21 = vpack.c.bf16 %v8365_v63, %v8365_v63 }
 0x807   : > { %8527 = vst.msk [vmem:[%s12734_s29 + $0xfc] sm:$0xf] %vm4927_vm5, %v9128_v42 }
 0x808   : > { %8525 = vst.msk [vmem:[%s12734_s29 + $0xf4] sm:$0xf] %vm4927_vm5, %v9126_v21 }
 0x809 PF: > { %s18_s27 = sadd.s32 1, %s11013_s27  }
 0x80a   : > { %p15_p4 = scmp.ge.s32.totalorder %s18_s27, 4  }
 0x80c   :  { %17 = sbr.rel (!%p15_p4) target bundleno = 1 (0x1), region = 90 }

</bundles_post_ra>
